<compile_context>
chip_gen: v6e
topology: v6e:2x2x1
jax: 0.10.0
libtpu: 0.0.40
codegen_flags: <defaults>
</compile_context>

<pallas_src>
import math
from functools import partial

import jax
import jax.numpy as jnp
import numpy as np
from jax import lax
from jax.experimental import pallas as pl
from jax.experimental.pallas import tpu as pltpu

LN_EPS = 1e-12  # HF BertConfig default layer_norm_eps


def _layer_norm(x, gamma, beta):
    mu = jnp.mean(x, axis=-1, keepdims=True)
    var = jnp.mean((x - mu) ** 2, axis=-1, keepdims=True)
    return (x - mu) * lax.rsqrt(var + LN_EPS) * gamma + beta


def _gelu_exact(x):
    # HF BertIntermediate default hidden_act='gelu' (erf-based, exact)
    return 0.5 * x * (1.0 + lax.erf(x * (1.0 / math.sqrt(2.0))))


# --------------------------------------------------------------------------
# Kernel 1: fused K|V projection, sequence-tiled, head-major outputs
#   K -> (nh, hd, S)  (lane-dense over sequence)
#   V -> (nh, S, hd)
# --------------------------------------------------------------------------
def kv_proj_kernel(num_heads, head_size, x_ref, wkv_ref, bkv_ref, k_ref, v_ref):
    tq, H = x_ref.shape
    nh, hd = num_heads, head_size
    x = x_ref[...].astype(wkv_ref.dtype)
    kv = jnp.dot(x, wkv_ref[...], preferred_element_type=jnp.float32) + bkv_ref[...]
    k = kv[:, :H].reshape(tq, nh, hd)
    v = kv[:, H:].reshape(tq, nh, hd)
    # Two-step permute (major swap, then batched minor transpose) keeps Mosaic
    # on known-good transpose paths.
    k = jnp.transpose(jnp.transpose(k, (1, 0, 2)), (0, 2, 1))    # (nh, hd, tq)
    k_ref[...] = k.astype(k_ref.dtype)
    v_ref[...] = jnp.transpose(v, (1, 0, 2)).astype(v_ref.dtype)  # (nh, tq, hd)


# --------------------------------------------------------------------------
# Kernel 2: Q projection + attention (heads batched, online softmax) +
#           self-output + FFN, tiled over query rows
# --------------------------------------------------------------------------
def attn_ffn_kernel(num_heads, head_size, n_kv, tkv, approx_recip,
                    x_ref, wq_ref, bq_ref, k_ref, v_ref, mask_ref,
                    wo_ref, bo_ref, ln1_g_ref, ln1_b_ref,
                    wi_ref, bi_ref, w2_ref, b2_ref, ln2_g_ref, ln2_b_ref,
                    out_ref):
    tq, H = x_ref.shape
    nh, hd = num_heads, head_size
    wdt = wq_ref.dtype     # projection / FFN MXU operand dtype
    adt = k_ref.dtype      # attention MXU operand dtype (Q / K / P / V)

    x = x_ref[...]                                               # (tq, H) f32
    # ---- Q projection (softmax scale already folded into wq/bq on host) ----
    q = jnp.dot(x.astype(wdt), wq_ref[...],
                preferred_element_type=jnp.float32) + bq_ref[...]
    q = jnp.transpose(q.reshape(tq, nh, hd), (1, 0, 2)).astype(adt)  # (nh, tq, hd)

    # ---- attention core (K resident as (nh, hd, S), V as (nh, S, hd)) ----
    if n_kv == 1:
        s = jnp.einsum("hqd,hdk->hqk", q, k_ref[...],
                       preferred_element_type=jnp.float32)       # (nh, tq, S)
        s = s + mask_ref[...][None, :, :]
        m = jnp.max(s, axis=-1, keepdims=True)
        p = jnp.exp(s - m)                                        # un-normalized probs
        l = jnp.sum(p, axis=-1, keepdims=True)
        acc = jnp.einsum("hqk,hkd->hqd", p.astype(adt), v_ref[...],
                         preferred_element_type=jnp.float32)      # (nh, tq, hd)
    else:
        # Online (flash-style) softmax over static key blocks: keeps the live
        # (nh, tq, tkv) score temporary bounded for long sequences.
        # NOTE: assumes finite mask values (e.g. -1e9); -inf rows would give
        # l == 0 and a NaN/inf normalization.
        m = jnp.full((nh, tq, 1), -jnp.inf, jnp.float32)
        l = jnp.zeros((nh, tq, 1), jnp.float32)
        acc = jnp.zeros((nh, tq, hd), jnp.float32)
        for kb in range(n_kv):                    # static unroll, static slices
            lo = kb * tkv
            k_blk = k_ref[:, :, lo:lo + tkv]      # (nh, hd, tkv)
            v_blk = v_ref[:, lo:lo + tkv, :]      # (nh, tkv, hd)
            msk = mask_ref[:, lo:lo + tkv]        # (tq|1, tkv)
            s = jnp.einsum("hqd,hdk->hqk", q, k_blk,
                           preferred_element_type=jnp.float32)
            s = s + msk[None, :, :]
            m_new = jnp.maximum(m, jnp.max(s, axis=-1, keepdims=True))
            alpha = jnp.exp(m - m_new)
            p = jnp.exp(s - m_new)
            l = alpha * l + jnp.sum(p, axis=-1, keepdims=True)
            acc = alpha * acc + jnp.einsum("hqk,hkd->hqd", p.astype(adt), v_blk,
                                           preferred_element_type=jnp.float32)
            m = m_new

    if approx_recip:
        ctx = acc * pl.reciprocal(l, approx=True)   # EUP slot (bf16 path)
    else:
        ctx = acc / l                               # exact divide (f32 parity)
    ctx = jnp.transpose(ctx, (1, 0, 2)).reshape(tq, H)

    # ---- BertSelfOutput: dense + residual + LayerNorm (f32 math) ----
    attn = jnp.dot(ctx.astype(wdt), wo_ref[...],
                   preferred_element_type=jnp.float32) + bo_ref[...]
    attn = _layer_norm(attn + x, ln1_g_ref[...], ln1_b_ref[...])

    # ---- BertIntermediate: dense + exact GELU ----
    inter = jnp.dot(attn.astype(wdt), wi_ref[...],
                    preferred_element_type=jnp.float32) + bi_ref[...]
    inter = _gelu_exact(inter)

    # ---- BertOutput: dense + residual + LayerNorm ----
    out = jnp.dot(inter.astype(wdt), w2_ref[...],
                  preferred_element_type=jnp.float32) + b2_ref[...]
    out = _layer_norm(out + attn, ln2_g_ref[...], ln2_b_ref[...])
    out_ref[...] = out.astype(out_ref.dtype)


# --------------------------------------------------------------------------
# Wrapper
# --------------------------------------------------------------------------
def _vmem_limit_bytes():
    # Per-generation VMEM budget with ~25% headroom for compiler scratch/spill.
    try:
        info = pltpu.get_tpu_info()
        cap = getattr(info, "vmem_capacity_bytes", None)
        if cap is None:
            return None
        return int(cap) * 3 // 4       # v7x: ~48 MiB, v5e/v6e: ~96 MiB
    except Exception:
        return None                    # leave compiler default


def _bert_layer_impl(x, attention_mask, params, num_heads, *,
                     tq, tkv, mxu_dtype, kv_dtype, approx_recip, resident_buffers):
    S, H = x.shape
    assert H % num_heads == 0
    hd = H // num_heads
    I = params["wi"].shape[1]
    assert S % tq == 0 and (tq % 128 == 0 or tq == S)
    assert S % tkv == 0
    n_kv = S // tkv
    grid = (S // tq,)
    wdt = jnp.dtype(mxu_dtype)
    kvdt = jnp.dtype(kv_dtype)

    # ---- host-side fusion / folding / casts ----
    scale = 1.0 / math.sqrt(hd)
    wq = (params["wq"] * scale).astype(wdt)      # softmax scale folded into Q proj
    bq = (params["bq"] * scale).astype(jnp.float32)
    wkv = jnp.concatenate([params["wk"], params["wv"]], axis=1).astype(wdt)
    bkv = jnp.concatenate([params["bk"], params["bv"]], axis=1).astype(jnp.float32)
    mask = attention_mask.astype(jnp.float32)

    if resident_buffers == 1:
        def resident(shape):
            return pl.BlockSpec(shape, lambda i, _n=len(shape): (0,) * _n,
                                pipeline_mode=pl.Buffered(1))
    else:
        def resident(shape):
            return pl.BlockSpec(shape, lambda i, _n=len(shape): (0,) * _n)

    def rows2d(shape):
        return pl.BlockSpec(shape, lambda i: (i, 0))

    cp = dict(dimension_semantics=("parallel",))
    vlim = _vmem_limit_bytes()
    if vlim is not None:
        cp["vmem_limit_bytes"] = vlim
    compiler_params = pltpu.CompilerParams(**cp)

    # ---- pass 1: fused K/V projection -> K (nh, hd, S), V (nh, S, hd) ----
    kv_cost = pl.CostEstimate(
        flops=int(2 * S * H * 2 * H),
        transcendentals=0,
        bytes_accessed=int(S * H * 4 + 2 * H * H * wdt.itemsize + 2 * H * 4
                           + 2 * S * H * kvdt.itemsize),
    )
    k, v = pl.pallas_call(
        partial(kv_proj_kernel, num_heads, hd),
        grid=grid,
        in_specs=[rows2d((tq, H)),                 # x tile (pipelined)
                  resident((H, 2 * H)),            # fused K|V weight (resident)
                  resident((1, 2 * H))],           # fused K|V bias
        out_specs=[pl.BlockSpec((num_heads, hd, tq), lambda i: (0, 0, i)),
                   pl.BlockSpec((num_heads, tq, hd), lambda i: (0, i, 0))],
        out_shape=[jax.ShapeDtypeStruct((num_heads, hd, S), kvdt),
                   jax.ShapeDtypeStruct((num_heads, S, hd), kvdt)],
        compiler_params=compiler_params,
        cost_estimate=kv_cost,
    )(x, wkv, bkv)

    # ---- pass 2: Q proj + attention + self-output + FFN, tiled over q rows ----
    mask_spec = resident((1, S)) if mask.shape[0] == 1 else rows2d((tq, S))
    attn_cost = pl.CostEstimate(
        flops=int(4 * S * H * H + 4 * S * S * H + 4 * S * H * I),
        transcendentals=int(num_heads * S * S + S * I + num_heads * S),
        bytes_accessed=int(S * H * 4 + 2 * S * H * kvdt.itemsize + mask.size * 4
                           + (2 * H * H + 2 * H * I) * wdt.itemsize
                           + (7 * H + I) * 4 + S * H * 4),
    )
    out = pl.pallas_call(
        partial(attn_ffn_kernel, num_heads, hd, n_kv, tkv, approx_recip),
        grid=grid,
        in_specs=[rows2d((tq, H)),                              # x tile (residual + Q src)
                  resident((H, H)), resident((1, H)),           # wq (scaled), bq
                  resident((num_heads, hd, S)),                 # K (resident)
                  resident((num_heads, S, hd)),                 # V (resident)
                  mask_spec,                                    # (1,S) row or (tq,S) tile
                  resident((H, H)), resident((1, H)),           # wo, bo
                  resident((1, H)), resident((1, H)),           # ln1 gamma, beta
                  resident((H, I)), resident((1, I)),           # wi, bi
                  resident((I, H)), resident((1, H)),           # w2, b2
                  resident((1, H)), resident((1, H))],          # ln2 gamma, beta
        out_specs=rows2d((tq, H)),
        out_shape=jax.ShapeDtypeStruct((S, H), jnp.float32),
        compiler_params=compiler_params,
        cost_estimate=attn_cost,
    )(x, wq, bq, k, v, mask,
      params["wo"].astype(wdt), params["bo"],
      params["ln1_g"], params["ln1_b"],
      params["wi"].astype(wdt), params["bi"],
      params["w2"].astype(wdt), params["b2"],
      params["ln2_g"], params["ln2_b"])
    return out


def bert_layer_for_tsp(x, attention_mask, params, num_heads, *, tq=None, tkv=None,
                       mxu_dtype=jnp.float32, kv_dtype=jnp.bfloat16,
                       approx_recip=None):
    S, H = x.shape
    if tq is None:
        if S >= 512 and S % 256 == 0:
            tq = 256            # fills MXU M dim; grid >= 2 keeps both v7x TCs busy
        elif S >= 256 and S % 128 == 0:
            tq = 128
        else:
            tq = S
    if tkv is None:
        # bound the (nh, tq, tkv) score temporary for long sequences
        tkv = 512 if (S > 1024 and S % 512 == 0) else S
    if approx_recip is None:
        approx_recip = jnp.dtype(mxu_dtype) != jnp.float32
    kwargs = dict(tq=tq, tkv=tkv, mxu_dtype=mxu_dtype, kv_dtype=kv_dtype,
                  approx_recip=approx_recip)
    try:
        return _bert_layer_impl(x, attention_mask, params, num_heads,
                                resident_buffers=1, **kwargs)
    except Exception:
        # pl.Buffered(1) single-buffering of resident operands not available on
        # this JAX/Mosaic version: fall back to default double-buffering.
        return _bert_layer_impl(x, attention_mask, params, num_heads,
                                resident_buffers=2, **kwargs)


# --------------------------------------------------------------------------
# Plain-JAX reference mirroring the PyTorch forward (eval mode)
# --------------------------------------------------------------------------
def reference(x, mask, params, num_heads):
    S, H = x.shape
    hd = H // num_heads
    q = x @ params["wq"] + params["bq"]
    k = x @ params["wk"] + params["bk"]
    v = x @ params["wv"] + params["bv"]
    qh = q.reshape(S, num_heads, hd).transpose(1, 0, 2)
    kh = k.reshape(S, num_heads, hd).transpose(1, 0, 2)
    vh = v.reshape(S, num_heads, hd).transpose(1, 0, 2)
    scores = jnp.einsum("hqd,hkd->hqk", qh, kh) / math.sqrt(hd) + mask[None]
    probs = jax.nn.softmax(scores, axis=-1)
    ctx = jnp.einsum("hqk,hkd->hqd", probs, vh).transpose(1, 0, 2).reshape(S, H)
    attn_out = _layer_norm(ctx @ params["wo"] + params["bo"] + x,
                           params["ln1_g"], params["ln1_b"])
    inter = _gelu_exact(attn_out @ params["wi"] + params["bi"])
    out = _layer_norm(inter @ params["w2"] + params["b2"] + attn_out,
                      params["ln2_g"], params["ln2_b"])
    return out


if __name__ == "__main__":
    # Tile-aligned small config: seq=256, hidden=128, heads=2 (head=64),
    # intermediate=512; tq=128 -> a 2-step "parallel" sequence grid.
    S, H, NH = 256, 128, 2
    I = 4 * H
    TQ = 128

    key = jax.random.PRNGKey(0)
    ks = jax.random.split(key, 13)
    init = lambda k, shape: (0.02 * jax.random.normal(k, shape)).astype(jnp.float32)

    params = {
        # Linear weights already stored as (in, out); biases as (1, out)
        "wq": init(ks[0], (H, H)),  "bq": init(ks[1], (1, H)),
        "wk": init(ks[2], (H, H)),  "bk": init(ks[3], (1, H)),
        "wv": init(ks[4], (H, H)),  "bv": init(ks[5], (1, H)),
        "wo": init(ks[6], (H, H)),  "bo": init(ks[7], (1, H)),
        "ln1_g": jnp.ones((1, H), jnp.float32), "ln1_b": jnp.zeros((1, H), jnp.float32),
        "wi": init(ks[8], (H, I)),  "bi": init(ks[9], (1, I)),
        "w2": init(ks[10], (I, H)), "b2": init(ks[11], (1, H)),
        "ln2_g": jnp.ones((1, H), jnp.float32), "ln2_b": jnp.zeros((1, H), jnp.float32),
    }

    x = jax.random.normal(ks[12], (S, H), dtype=jnp.float32)

    # Additive attention mask: last 32 key positions are padding.
    key_pos = jnp.arange(S)
    mask_row = jnp.where(key_pos[None, :] >= S - 32, -1e9, 0.0).astype(jnp.float32)  # (1, S)
    mask_full = jnp.broadcast_to(mask_row, (S, S))                                   # (S, S)

    ref = jax.block_until_ready(reference(x, mask_row, params, NH))

    # 1) all-f32 path, single key block, (1, S) key-padding row mask
    out1 = jax.block_until_ready(bert_layer_for_tsp(
        x, mask_row, params, NH, tq=TQ, tkv=S,
        mxu_dtype=jnp.float32, kv_dtype=jnp.float32))
    np.testing.assert_allclose(np.asarray(out1), np.asarray(ref), rtol=2e-3, atol=2e-3)

    # 2) f32, online-softmax key-block loop (tkv=128 -> 2 blocks), full (S, S) mask
    out2 = jax.block_until_ready(bert_layer_for_tsp(
        x, mask_full, params, NH, tq=TQ, tkv=128,
        mxu_dtype=jnp.float32, kv_dtype=jnp.float32))
    np.testing.assert_allclose(np.asarray(out2), np.asarray(ref), rtol=2e-3, atol=2e-3)

    # 3) bf16 MXU operands + bf16 K/V (defaults), f32 accumulation / softmax / LN
    out3 = jax.block_until_ready(bert_layer_for_tsp(
        x, mask_row, params, NH, tq=TQ, mxu_dtype=jnp.bfloat16))
    np.testing.assert_allclose(np.asarray(out3), np.asarray(ref), rtol=5e-2, atol=5e-2)

    print("KERNEL_OK")
</pallas_src>

<mosaic_0001>
module attributes {stable_mosaic.version = 11 : i64} {
  func.func @kv_proj_kernel(%arg0: i32, %arg1: memref<128x128xf32, #tpu.memory_space<vmem>>, %arg2: memref<128x256xf32, #tpu.memory_space<vmem>>, %arg3: memref<1x256xf32, #tpu.memory_space<vmem>>, %arg4: memref<2x64x128xf32, #tpu.memory_space<vmem>>, %arg5: memref<2x128x64xf32, #tpu.memory_space<vmem>>) attributes {dimension_semantics = [#tpu.dimension_semantics<parallel>], iteration_bounds = array<i64: 2>, scalar_prefetch = 0 : i64, scratch_operands = 0 : i64, tpu.core_type = #tpu.core_type<tc>, window_params = [{transform_indices = @transform_0, window_bounds = array<i64: 128, 128>}, {pipeline_mode = #tpu.pipeline_mode<synchronous>, transform_indices = @transform_1, window_bounds = array<i64: 128, 256>}, {pipeline_mode = #tpu.pipeline_mode<synchronous>, transform_indices = @transform_2, window_bounds = array<i64: 1, 256>}, {transform_indices = @transform_3, window_bounds = array<i64: 2, 64, 128>}, {transform_indices = @transform_4, window_bounds = array<i64: 2, 128, 64>}]} {
    %c0 = arith.constant 0 : index
    %c0_0 = arith.constant 0 : index
    %0 = vector.load %arg1[%c0, %c0_0] : memref<128x128xf32, #tpu.memory_space<vmem>>, vector<128x128xf32>
    %c0_1 = arith.constant 0 : index
    %c0_2 = arith.constant 0 : index
    %1 = vector.load %arg2[%c0_1, %c0_2] : memref<128x256xf32, #tpu.memory_space<vmem>>, vector<128x256xf32>
    %cst = arith.constant dense<0.000000e+00> : vector<128x256xf32>
    %2 = tpu.matmul %0, %1, %cst {dimension_numbers = #tpu.dot_dimension_numbers<[1], [0], [0], [1], [0, 0, 1, 1], [], []>} : vector<128x128xf32>, vector<128x256xf32>, vector<128x256xf32> -> vector<128x256xf32>
    %c0_3 = arith.constant 0 : index
    %c0_4 = arith.constant 0 : index
    %3 = vector.load %arg3[%c0_3, %c0_4] : memref<1x256xf32, #tpu.memory_space<vmem>>, vector<1x256xf32>
    %4 = vector.broadcast %3 : vector<1x256xf32> to vector<128x256xf32>
    %5 = arith.addf %2, %4 : vector<128x256xf32>
    %6 = vector.extract_strided_slice %5 {offsets = [0, 0], sizes = [128, 128], strides = [1, 1]} : vector<128x256xf32> to vector<128x128xf32>
    %7 = vector.shape_cast %6 : vector<128x128xf32> to vector<128x2x64xf32>
    %8 = vector.extract_strided_slice %5 {offsets = [0, 128], sizes = [128, 128], strides = [1, 1]} : vector<128x256xf32> to vector<128x128xf32>
    %9 = vector.shape_cast %8 : vector<128x128xf32> to vector<128x2x64xf32>
    %10 = tpu.transpose %7, [1, 0, 2] : vector<128x2x64xf32> -> vector<2x128x64xf32>
    %11 = tpu.transpose %10, [0, 2, 1] : vector<2x128x64xf32> -> vector<2x64x128xf32>
    %c0_5 = arith.constant 0 : index
    %c0_6 = arith.constant 0 : index
    %c0_7 = arith.constant 0 : index
    %12 = vector.load %arg4[%c0_5, %c0_6, %c0_7] : memref<2x64x128xf32, #tpu.memory_space<vmem>>, vector<2x64x128xf32>
    tpu.vector_store %arg4[%c0_5, %c0_6, %c0_7], %11 {strides = array<i32>} : memref<2x64x128xf32, #tpu.memory_space<vmem>>, vector<2x64x128xf32>,
    %13 = tpu.transpose %9, [1, 0, 2] : vector<128x2x64xf32> -> vector<2x128x64xf32>
    %c0_8 = arith.constant 0 : index
    %c0_9 = arith.constant 0 : index
    %c0_10 = arith.constant 0 : index
    %14 = vector.load %arg5[%c0_8, %c0_9, %c0_10] : memref<2x128x64xf32, #tpu.memory_space<vmem>>, vector<2x128x64xf32>
    tpu.vector_store %arg5[%c0_8, %c0_9, %c0_10], %13 {strides = array<i32>} : memref<2x128x64xf32, #tpu.memory_space<vmem>>, vector<2x128x64xf32>,
    return
  }
  func.func @transform_0(%arg0: i32) -> (i32, i32) {
    %c0_i32 = arith.constant 0 : i32
    %c0_i32_0 = arith.constant 0 : i32
    return %arg0, %c0_i32 : i32, i32
  }
  func.func @transform_1(%arg0: i32) -> (i32, i32) {
    %c0_i32 = arith.constant 0 : i32
    %c0_i32_0 = arith.constant 0 : i32
    %c0_i32_1 = arith.constant 0 : i32
    return %c0_i32, %c0_i32_0 : i32, i32
  }
  func.func @transform_2(%arg0: i32) -> (i32, i32) {
    %c0_i32 = arith.constant 0 : i32
    %c0_i32_0 = arith.constant 0 : i32
    %c0_i32_1 = arith.constant 0 : i32
    return %c0_i32, %c0_i32_0 : i32, i32
  }
  func.func @transform_3(%arg0: i32) -> (i32, i32, i32) {
    %c0_i32 = arith.constant 0 : i32
    %c0_i32_0 = arith.constant 0 : i32
    %c0_i32_1 = arith.constant 0 : i32
    return %c0_i32, %c0_i32_0, %arg0 : i32, i32, i32
  }
  func.func @transform_4(%arg0: i32) -> (i32, i32, i32) {
    %c0_i32 = arith.constant 0 : i32
    %c0_i32_0 = arith.constant 0 : i32
    %c0_i32_1 = arith.constant 0 : i32
    return %c0_i32, %arg0, %c0_i32_0 : i32, i32, i32
  }
}

module attributes {stable_mosaic.version = 11 : i64} {
  func.func @kv_proj_kernel(%arg0: i32, %arg1: memref<128x128xf32, #tpu.memory_space<vmem>>, %arg2: memref<128x256xf32, #tpu.memory_space<vmem>>, %arg3: memref<1x256xf32, #tpu.memory_space<vmem>>, %arg4: memref<2x64x128xf32, #tpu.memory_space<vmem>>, %arg5: memref<2x128x64xf32, #tpu.memory_space<vmem>>) attributes {dimension_semantics = [#tpu.dimension_semantics<parallel>], iteration_bounds = array<i64: 2>, scalar_prefetch = 0 : i64, scratch_operands = 0 : i64, tpu.core_type = #tpu.core_type<tc>, window_params = [{transform_indices = @transform_0, window_bounds = array<i64: 128, 128>}, {pipeline_mode = #tpu.pipeline_mode<synchronous>, transform_indices = @transform_1, window_bounds = array<i64: 128, 256>}, {pipeline_mode = #tpu.pipeline_mode<synchronous>, transform_indices = @transform_2, window_bounds = array<i64: 1, 256>}, {transform_indices = @transform_3, window_bounds = array<i64: 2, 64, 128>}, {transform_indices = @transform_4, window_bounds = array<i64: 2, 128, 64>}]} {
    %c0 = arith.constant 0 : index
    %c0_0 = arith.constant 0 : index
    %0 = vector.load %arg1[%c0, %c0_0] : memref<128x128xf32, #tpu.memory_space<vmem>>, vector<128x128xf32>
    %c0_1 = arith.constant 0 : index
    %c0_2 = arith.constant 0 : index
    %1 = vector.load %arg2[%c0_1, %c0_2] : memref<128x256xf32, #tpu.memory_space<vmem>>, vector<128x256xf32>
    %cst = arith.constant dense<0.000000e+00> : vector<128x256xf32>
    %2 = tpu.matmul %0, %1, %cst {dimension_numbers = #tpu.dot_dimension_numbers<[1], [0], [0], [1], [0, 0, 1, 1], [], []>} : vector<128x128xf32>, vector<128x256xf32>, vector<128x256xf32> -> vector<128x256xf32>
    %c0_3 = arith.constant 0 : index
    %c0_4 = arith.constant 0 : index
    %3 = vector.load %arg3[%c0_3, %c0_4] : memref<1x256xf32, #tpu.memory_space<vmem>>, vector<1x256xf32>
    %4 = vector.broadcast %3 : vector<1x256xf32> to vector<128x256xf32>
    %5 = arith.addf %2, %4 : vector<128x256xf32>
    %6 = vector.extract_strided_slice %5 {offsets = [0, 0], sizes = [128, 128], strides = [1, 1]} : vector<128x256xf32> to vector<128x128xf32>
    %7 = vector.shape_cast %6 : vector<128x128xf32> to vector<128x2x64xf32>
    %8 = vector.extract_strided_slice %5 {offsets = [0, 128], sizes = [128, 128], strides = [1, 1]} : vector<128x256xf32> to vector<128x128xf32>
    %9 = vector.shape_cast %8 : vector<128x128xf32> to vector<128x2x64xf32>
    %10 = tpu.transpose %7, [1, 0, 2] : vector<128x2x64xf32> -> vector<2x128x64xf32>
    %11 = tpu.transpose %10, [0, 2, 1] : vector<2x128x64xf32> -> vector<2x64x128xf32>
    %c0_5 = arith.constant 0 : index
    %c0_6 = arith.constant 0 : index
    %c0_7 = arith.constant 0 : index
    %12 = vector.load %arg4[%c0_5, %c0_6, %c0_7] : memref<2x64x128xf32, #tpu.memory_space<vmem>>, vector<2x64x128xf32>
    tpu.vector_store %arg4[%c0_5, %c0_6, %c0_7], %11 {strides = array<i32>} : memref<2x64x128xf32, #tpu.memory_space<vmem>>, vector<2x64x128xf32>,
    %13 = tpu.transpose %9, [1, 0, 2] : vector<128x2x64xf32> -> vector<2x128x64xf32>
    %c0_8 = arith.constant 0 : index
    %c0_9 = arith.constant 0 : index
    %c0_10 = arith.constant 0 : index
    %14 = vector.load %arg5[%c0_8, %c0_9, %c0_10] : memref<2x128x64xf32, #tpu.memory_space<vmem>>, vector<2x128x64xf32>
    tpu.vector_store %arg5[%c0_8, %c0_9, %c0_10], %13 {strides = array<i32>} : memref<2x128x64xf32, #tpu.memory_space<vmem>>, vector<2x128x64xf32>,
    return
  }
  func.func @transform_0(%arg0: i32) -> (i32, i32) {
    %c0_i32 = arith.constant 0 : i32
    %c0_i32_0 = arith.constant 0 : i32
    return %arg0, %c0_i32 : i32, i32
  }
  func.func @transform_1(%arg0: i32) -> (i32, i32) {
    %c0_i32 = arith.constant 0 : i32
    %c0_i32_0 = arith.constant 0 : i32
    %c0_i32_1 = arith.constant 0 : i32
    return %c0_i32, %c0_i32_0 : i32, i32
  }
  func.func @transform_2(%arg0: i32) -> (i32, i32) {
    %c0_i32 = arith.constant 0 : i32
    %c0_i32_0 = arith.constant 0 : i32
    %c0_i32_1 = arith.constant 0 : i32
    return %c0_i32, %c0_i32_0 : i32, i32
  }
  func.func @transform_3(%arg0: i32) -> (i32, i32, i32) {
    %c0_i32 = arith.constant 0 : i32
    %c0_i32_0 = arith.constant 0 : i32
    %c0_i32_1 = arith.constant 0 : i32
    return %c0_i32, %c0_i32_0, %arg0 : i32, i32, i32
  }
  func.func @transform_4(%arg0: i32) -> (i32, i32, i32) {
    %c0_i32 = arith.constant 0 : i32
    %c0_i32_0 = arith.constant 0 : i32
    %c0_i32_1 = arith.constant 0 : i32
    return %c0_i32, %arg0, %c0_i32_0 : i32, i32, i32
  }
}

</mosaic_0001>

<bundles_post_ra>
// kernel: tpu_custom_call.1
= control target key start
LH: loop header
LB: loop body
LE: loop exit
PB: predicated region body
PF: predicated region fallthrough
CT: control target
= control target key end

     0   :  { %10 = vsyncpa [#allocation3], 0  ;;  %s6828_s0 = inlined_call_operand.hbm [shape: f32[256,128], index: 0, kind: input, shape index: {}]   ;;  %s6829_s1 = inlined_call_operand.hbm [shape: f32[128,256], index: 1, kind: input, shape index: {}]   ;;  %s6830_s2 = inlined_call_operand.vmem [shape: f32[1,256], index: 2, kind: input, shape index: {}]   ;;  %s6831_s3 = inlined_call_operand.hbm [shape: f32[2,64,256], index: 3, kind: output, shape index: {0}]   ;;  %s6832_s4 = inlined_call_operand.vmem [shape: f32[2,256,64], index: 4, kind: output, shape index: {1}]  }
   0x1   :  { %12 = vsyncpa [#allocation3 + $0x1], 0 }
   0x2   :  { %13 = vsyncpa [#allocation6], 0 }
   0x3   :  { %14 = vsyncpa [#allocation4], 0 }
   0x4   :  { %16 = vsyncpa [#allocation4 + $0x1], 0  ;;  %s5053_s15 = smov 0   ;;  %s5055_s16 = smov 0  }
   0x5   :  { %s5057_s17 = smov 0   ;;  %s5059_s18 = smov 0  }
   0x6 LB: > { %s5074_s19 = sadd.s32 4294967295, %s5012_s18   ;;  %s4705_s20 = sadd.s32 4294967294, %s5012_s18   ;;  %s5012_s18 = sphi %s5059_s18, %s6982_s18   ;;  %s5008_s17 = sphi %s5057_s17, %s6981_s17   ;;  %s5004_s16 = sphi %s5055_s16, %s6980_s16   ;;  %s5000_s15 = sphi %s5053_s15, %s6979_s15  }
   0x7   : > { %p42_p0 = scmp.ne.s32.totalorder %s5004_s16, %s5000_s15  ;;  %p6833_p1 = scmp.eq.s32.totalorder %s5074_s19, 0 }
   0x8   : > { %p114_p3 = scmp.eq.s32.totalorder %s4705_s20, 1  ;;  %p4706_p5 = scmp.ge.s32.totalorder %s5012_s18, 1 }
   0x9   : > { %p5083_p4 = por %p6833_p1, %p42_p0  ;;  %p147_p7 = scmp.lt.s32.totalorder %s5012_s18, 3 }
   0xa   : > { %p5088_p6 = por %p114_p3, %p42_p0  ;;  %s5014_s24 = smov [#allocation5]  }
   0xb   : > { %s6873_s21 = scalar_select %p5083_p4, 1, 0 }
   0xc   : > { %s6874_s22 = scalar_select %p5088_p6, 1, 0 }
   0xd   : > { %p5093_p8 = pnand %p4706_p5, %p147_p7  ;;  %s159_s25 = sshll.u32 %s5014_s24, 4  ;;  %s160_s25 = int_to_ptr.vmem [resolvable:$true] %s159_s25 }
   0xe   : > { %s5107_s27 = sadd.s32 1, %s5012_s18   ;;  %s29_s28 = sadd.s32 1, %s5008_s17 }
   0xf   : > { %s6875_s23 = scalar_select %p5093_p8, 1, 0 }
  0x10   : > { %p4830_p9 = pneg %p5093_p8  ;;  %s26_s29 = ssub.s32 %s5012_s18, %s5107_s27 }
  0x11   : > { %s4901_s30 = scalar_lea.vmem %s160_s25, 4096  ;;  %p4909_p5 = scmp.lt.s32.totalorder %s160_s25, %s160_s25 }
  0x12   : > { %p5102_p11 = pnand %p4830_p9, %p6833_p1  ;;  %p4902_p13 = scmp.ne.s32.totalorder %s160_s25, %s4901_s30 }
  0x13   : > { %p4910_p7 = scmp.lt.s32.totalorder %s4901_s30, %s4901_s30 }
  0x14   : > { %p4892_p12 = pneg %p5102_p11 }
  0x15   : > { %p4911_p10 = por %p4910_p7, %p4909_p5 }
  0x16   : > { %p4904_p0 = pnand %p4902_p13, %p4892_p12 }
  0x18   : > { %p4905_p3 = pneg %p4904_p0 }
  0x1a   : > { %p4912_p2 = pnand %p4911_p10, %p4905_p3 }
  0x1c   : > { %4915 = shalt.err (!%p4912_p2)
}
  0x1d   : > { %s5015_s5 = smov 256   ;;  %s5016_s6 = smov 16  }
  0x1e   : > { %4833 = dma.hbm_to_vmem [thread:$0]  (!%p5102_p11), %s6829_s1, 4096, %s160_s25, [#allocation6], %s5015_s5, %s5015_s5, %s5016_s6  }
  0x1f   : > { %p27_p9 = scmp.eq.s32.totalorder %s26_s29, 0  ;;  %p36_p12 = scmp.ne.s32.totalorder %s5008_s17, %s5004_s16 }
  0x20   : > { %p37_p10 = scmp.eq.s32.totalorder %s5012_s18, 0  ;;  %p4843_p2 = scmp.lt.s32.totalorder %s5012_s18, 2 }
  0x21   : > { %s5124_s9 = scalar_select %p27_p9, %s5008_s17, %s29_s28  }
  0x22   : > { %p38_p13 = por %p37_p10, %p36_p12  ;;  %p6877_p0 = scmp.eq.s32.totalorder %s5074_s19, 1 }
  0x23   : > { %s176_s11 = sand.u32 1, %s5008_s17   ;;  %s4788_s12 = sshll.u32 %s5012_s18, 11 }
  0x24   : > { %p5128_p3 = por %p6877_p0, %p36_p12  ;;  %s4709_s13 = sshll.u32 %s176_s11, 7 }
  0x25   : > { %s5137_s24 = scalar_lea.hbm %s6828_s0, %s4788_s12  ;;  %s180_s25 = scalar_lea.vmem [#allocation2], %s4709_s13 }
  0x26   : > { %s6878_s10 = scalar_select %p5128_p3, 1, 0 }
  0x27   : > { %s187_s26 = sshll.u32 %s180_s25, 4  ;;  %p5139_p11 = pnand %p4843_p2, %p38_p13  ;;  %s5143_s26 = int_to_ptr.vmem [resolvable:$true] %s187_s26 }
  0x28   : > { %s5145_s29 = scalar_lea.sflag [#allocation3], %s176_s11  ;;  %s4916_s30 = scalar_lea.hbm %s5137_s24, 2048 }
  0x29   : > { %p4917_p5 = scmp.ne.s32.totalorder %s5137_s24, %s4916_s30  ;;  %p4918_p7 = pneg %p5139_p11 }
  0x2a   : > { %s4921_s7 = scalar_lea.hbm %s6828_s0, 4096  ;;  %p4922_p10 = scmp.lt.s32.totalorder %s5137_s24, %s6828_s0 }
  0x2b   : > { %p4919_p9 = pnand %p4918_p7, %p4917_p5  ;;  %p4923_p2 = scmp.lt.s32.totalorder %s4921_s7, %s4916_s30 }
  0x2d   : > { %p4920_p12 = pneg %p4919_p9  ;;  %p4924_p13 = por %p4923_p2, %p4922_p10 }
  0x2f   : > { %p4925_p0 = pnand %p4924_p13, %p4920_p12 }
  0x31   : > { %4928 = shalt.err (!%p4925_p0)
}
  0x32   : > { %s4929_s11 = scalar_lea.vmem %s5143_s26, 2048  ;;  %s5017_s13 = smov [#allocation2]  }
  0x33   : > { %p4930_p1 = scmp.ne.s32.totalorder %s5143_s26, %s4929_s11  ;;  %s4934_s14 = sshll.u32 %s5017_s13, 4  ;;  %s4935_s14 = int_to_ptr.vmem [resolvable:$false] %s4934_s14 }
  0x34   : > { %s4936_s20 = scalar_lea.vmem %s4935_s14, 4096  ;;  %p4937_p9 = scmp.lt.s32.totalorder %s5143_s26, %s4935_s14 }
  0x35   : > { %p4932_p6 = pnand %p4930_p1, %p4918_p7  ;;  %p4938_p3 = scmp.lt.s32.totalorder %s4936_s20, %s4929_s11 }
  0x37   : > { %p4933_p5 = pneg %p4932_p6  ;;  %p4939_p4 = por %p4938_p3, %p4937_p9 }
  0x39   : > { %p4940_p8 = pnand %p4939_p4, %p4933_p5 }
  0x3b   : > { %4943 = shalt.err (!%p4940_p8)
}
  0x3c   : > { %s5018_s25 = smov 128   ;;  %s5019_s30 = smov 8  }
  0x3d   : > { %4837 = dma.hbm_to_vmem [thread:$0]  (!%p5139_p11), %s5137_s24, 2048, %s5143_s26, %s5145_s29, %s5018_s25, %s5018_s25, %s5019_s30  }
  0x3e   : > { %p6880_p1 = scmp.ne.s32.totalorder %s6875_s23, 0 }
  0x40   : > { %199 = sbr.rel (%p6880_p1) target bundleno = 771 (0x303), region = 32 }
  0x45   : > { %s5169_s5 = sand.u32 1, %s5004_s16   ;;  %p6881_p4 = scmp.ne.s32.totalorder %s6873_s21, 0 }
  0x46   : > { %s4713_s6 = sshll.u32 %s5169_s5, 7  ;;  %s202_s7 = scalar_lea.sflag [#allocation3], %s5169_s5 }
  0x47   : > { %s5175_s8 = scalar_lea.vmem [#allocation2], %s4713_s6 }
  0x48   : > { %4987 = dma.done.wait (%p6881_p4), %s202_s7, 2048  }
  0x49   : > { %4989 = vsyncadd (%p6881_p4), %s202_s7, 4294965248  ;;  %p6882_p6 = scmp.eq.s32.totalorder %s5074_s19, 0 }
  0x4b   : > { %4991 = dma.done.wait (%p6882_p6), [#allocation6], 4096   ;;  %p6883_p8 = pmov %p6882_p6 }
  0x4c   : > { %v6842_v0 = vmov 0.0   ;;  %v287_v1 = vld [vmem:[#allocation5 + $0xf8] sm:$0xff]  ;;  %v286_v2 = vld [vmem:[#allocation5 + $0xf0] sm:$0xff]  ;;  %v285_v3 = vld [vmem:[#allocation5 + $0xe8] sm:$0xff]  ;;  %v290_v49 = vlaneseq  ;;  %s5021_s24 = smov 64   ;;  %vm4381_vm0 = vcmask 523264  }
  0x4d   : > { %4993 = vsyncadd (%p6883_p8), [#allocation6], 4294963200  ;;  %364 = vmatprep.mubr.f32.mxu0 %v6842_v0  ;;  %412 = vmatprep.mubr.f32.mxu1 %v6842_v0  ;;  %v284_v4 = vld [vmem:[#allocation5 + $0xe0] sm:$0xff]  ;;  %v283_v5 = vld [vmem:[#allocation5 + $0xd8] sm:$0xff]  ;;  %s4716_s26 = sshll.u32 %s5169_s5, 8  ;;  %s6685_s29 = scalar_lea.vmem [#allocation7], %s4713_s6 }
  0x4e   : > { %300 = vmatprep.subr.mxu0 %v287_v1  ;;  %4790 = vmatprep.subr.mxu1 %v287_v1  ;;  %v282_v6 = vld [vmem:[#allocation5 + $0xd0] sm:$0xff]  ;;  %v281_v7 = vld [vmem:[#allocation5 + $0xc8] sm:$0xff]  ;;  %v280_v8 = vld [vmem:[#allocation5 + $0xc0] sm:$0xff]  ;;  %v5217_v50 = vshrl.u32 %v290_v49, 7  ;;  %s5783_s28 = scalar_lea.vmem [#allocation8], %s4716_s26  ;;  %s4783_s12 = sshll.u32 %s5074_s19, 7 }
  0x4f   : > { %301 = vmatpush1.msra.mxu0 %v286_v2  ;;  %4806 = vmatpush1.msra.mxu1 %v286_v2  ;;  %v279_v9 = vld [vmem:[#allocation5 + $0xb8] sm:$0xff]  ;;  %v278_v10 = vld [vmem:[#allocation5 + $0xb0] sm:$0xff]  ;;  %v277_v11 = vld [vmem:[#allocation5 + $0xa8] sm:$0xff]  ;;  %s4431_s11 = sshll.u32 %s6685_s29, 4  ;;  %s6708_s20 = scalar_lea.hbm %s6831_s3, %s4783_s12  ;;  %s6710_s11 = int_to_ptr.vmem [resolvable:$true] %s4431_s11 }
  0x50   : > { %302 = vmatprep.subr.mxu0 %v285_v3  ;;  %4791 = vmatprep.subr.mxu1 %v285_v3  ;;  %v276_v12 = vld [vmem:[#allocation5 + $0xa0] sm:$0xff]  ;;  %v275_v13 = vld [vmem:[#allocation5 + $0x98] sm:$0xff]  ;;  %v274_v14 = vld [vmem:[#allocation5 + $0x90] sm:$0xff]  ;;  %v292_v51 = vsub.s32 0, %v5217_v50  ;;  %v296_v57 = vsub.s32 1, %v5217_v50  ;;  %s4415_s25 = scalar_lea.sflag [#allocation4], %s5169_s5 }
  0x51   : > { %303 = vmatpush1.msra.mxu0 %v284_v4  ;;  %4807 = vmatpush1.msra.mxu1 %v284_v4  ;;  %v273_v15 = vld [vmem:[#allocation5 + $0x88] sm:$0xff]  ;;  %v272_v16 = vld [vmem:[#allocation5 + $0x80] sm:$0xff]  ;;  %v271_v17 = vld [vmem:[#allocation5 + $0x78] sm:$0xff]  ;;  %s4944_s30 = scalar_lea.vmem %s6710_s11, 2048  ;;  %p6976_p11 = scmp.ne.s32.totalorder %s6878_s10, 0 }
  0x52   : > { %304 = vmatprep.subr.mxu0 %v283_v5  ;;  %4792 = vmatprep.subr.mxu1 %v283_v5  ;;  %v270_v18 = vld [vmem:[#allocation5 + $0x70] sm:$0xff]  ;;  %v269_v19 = vld [vmem:[#allocation5 + $0x68] sm:$0xff]  ;;  %v268_v20 = vld [vmem:[#allocation5 + $0x60] sm:$0xff]  ;;  %p4945_p3 = scmp.ne.s32.totalorder %s6710_s11, %s4944_s30  ;;  %s5024_s6 = smov [#allocation7]  }
  0x53   : > { %305 = vmatpush1.msra.mxu0 %v282_v6  ;;  %4808 = vmatpush1.msra.mxu1 %v282_v6  ;;  %v267_v21 = vld [vmem:[#allocation5 + $0x58] sm:$0xff]  ;;  %v266_v22 = vld [vmem:[#allocation5 + $0x50] sm:$0xff]  ;;  %v265_v23 = vld [vmem:[#allocation5 + $0x48] sm:$0xff]  ;;  %s4948_s7 = sshll.u32 %s5024_s6, 4  ;;  %s4949_s7 = int_to_ptr.vmem [resolvable:$false] %s4948_s7 }
  0x54   : > { %306 = vmatprep.subr.mxu0 %v281_v7  ;;  %4793 = vmatprep.subr.mxu1 %v281_v7  ;;  %v264_v24 = vld [vmem:[#allocation5 + $0x40] sm:$0xff]  ;;  %v263_v25 = vld [vmem:[#allocation5 + $0x38] sm:$0xff]  ;;  %v262_v26 = vld [vmem:[#allocation5 + $0x30] sm:$0xff]  ;;  %p4946_p7 = pnand %p4945_p3, %p6976_p11  ;;  %p4951_p10 = scmp.lt.s32.totalorder %s6710_s11, %s4949_s7 }
  0x55   : > { %307 = vmatpush1.msra.mxu0 %v280_v8  ;;  %4809 = vmatpush1.msra.mxu1 %v280_v8  ;;  %v261_v27 = vld [vmem:[#allocation5 + $0x28] sm:$0xff]  ;;  %v260_v28 = vld [vmem:[#allocation5 + $0x20] sm:$0xff]  ;;  %v259_v29 = vld [vmem:[#allocation5 + $0x18] sm:$0xff] }
  0x56   : > { %308 = vmatprep.subr.mxu0 %v279_v9  ;;  %4794 = vmatprep.subr.mxu1 %v279_v9  ;;  %v258_v30 = vld [vmem:[#allocation5 + $0x10] sm:$0xff]  ;;  %v257_v31 = vld [vmem:[#allocation5 + $0x8] sm:$0xff]  ;;  %v256_v32 = vld [vmem:[#allocation5] sm:$0xff]  ;;  %p4947_p12 = pneg %p4946_p7 }
  0x57   : > { %309 = vmatpush1.msra.mxu0 %v278_v10  ;;  %4810 = vmatpush1.msra.mxu1 %v278_v10  ;;  %v240_v33 = vld [vmem:[%s5175_s8] sm:$0xff]  ;;  %v241_v35 = vld [vmem:[%s5175_s8 + $0x8] sm:$0xff]  ;;  %v242_v37 = vld [vmem:[%s5175_s8 + $0x10] sm:$0xff] }
  0x58   : > { %310 = vmatprep.subr.mxu0 %v277_v11  ;;  %4795 = vmatprep.subr.mxu1 %v277_v11  ;;  %v248_v34 = vld [vmem:[%s5175_s8 + $0x40] sm:$0xff]  ;;  %v249_v36 = vld [vmem:[%s5175_s8 + $0x48] sm:$0xff]  ;;  %v250_v38 = vld [vmem:[%s5175_s8 + $0x50] sm:$0xff] }
  0x59   : > { %311 = vmatpush1.msra.mxu0 %v276_v12  ;;  %4811 = vmatpush1.msra.mxu1 %v276_v12  ;;  %v243_v39 = vld [vmem:[%s5175_s8 + $0x18] sm:$0xff]  ;;  %v244_v41 = vld [vmem:[%s5175_s8 + $0x20] sm:$0xff]  ;;  %v245_v43 = vld [vmem:[%s5175_s8 + $0x28] sm:$0xff] }
  0x5a   : > { %312 = vmatprep.subr.mxu0 %v275_v13  ;;  %4796 = vmatprep.subr.mxu1 %v275_v13  ;;  %v251_v40 = vld [vmem:[%s5175_s8 + $0x58] sm:$0xff]  ;;  %v252_v42 = vld [vmem:[%s5175_s8 + $0x60] sm:$0xff]  ;;  %v253_v44 = vld [vmem:[%s5175_s8 + $0x68] sm:$0xff] }
  0x5b   : > { %313 = vmatpush1.msra.mxu0 %v274_v14  ;;  %4812 = vmatpush1.msra.mxu1 %v274_v14  ;;  %v246_v45 = vld [vmem:[%s5175_s8 + $0x30] sm:$0xff]  ;;  %v247_v47 = vld [vmem:[%s5175_s8 + $0x38] sm:$0xff]  ;;  %v288_v52 = vld [vmem:[%s6830_s2] sm:$0x3] }
  0x5c   : > { %314 = vmatprep.subr.mxu0 %v273_v15  ;;  %4797 = vmatprep.subr.mxu1 %v273_v15  ;;  %v254_v46 = vld [vmem:[%s5175_s8 + $0x70] sm:$0xff]  ;;  %v255_v48 = vld [vmem:[%s5175_s8 + $0x78] sm:$0xff]  ;;  %v5223_v53 = vrot.slane %v288_v52, %v292_v51  ;;  %v5237_v1 = vrot.slane %v288_v52, %v296_v57  ;;  %s4950_s8 = scalar_lea.vmem %s4949_s7, 4096 }
  0x5d   : > { %315 = vmatpush1.msra.mxu0 %v272_v16  ;;  %4813 = vmatpush1.msra.mxu1 %v272_v16  ;;  %p4952_p2 = scmp.lt.s32.totalorder %s4950_s8, %s4944_s30 }
  0x5e   : > { %316 = vmatprep.subr.mxu0 %v271_v17  ;;  %4798 = vmatprep.subr.mxu1 %v271_v17 }
  0x5f   : > { %317 = vmatpush1.msra.mxu0 %v270_v18  ;;  %4814 = vmatpush1.msra.mxu1 %v270_v18  ;;  %p4953_p13 = por %p4952_p2, %p4951_p10 }
  0x60   : > { %318 = vmatprep.subr.mxu0 %v269_v19  ;;  %4799 = vmatprep.subr.mxu1 %v269_v19 }
  0x61   : > { %319 = vmatpush1.msra.mxu0 %v268_v20  ;;  %4815 = vmatpush1.msra.mxu1 %v268_v20  ;;  %p4954_p0 = pnand %p4953_p13, %p4947_p12 }
  0x62   : > { %320 = vmatprep.subr.mxu0 %v267_v21  ;;  %4800 = vmatprep.subr.mxu1 %v267_v21 }
  0x63   : > { %321 = vmatpush1.msra.mxu0 %v266_v22  ;;  %4816 = vmatpush1.msra.mxu1 %v266_v22 }
  0x64   : > { %322 = vmatprep.subr.mxu0 %v265_v23  ;;  %4801 = vmatprep.subr.mxu1 %v265_v23 }
  0x65   : > { %323 = vmatpush1.msra.mxu0 %v264_v24  ;;  %4817 = vmatpush1.msra.mxu1 %v264_v24 }
  0x66   : > { %324 = vmatprep.subr.mxu0 %v263_v25  ;;  %4802 = vmatprep.subr.mxu1 %v263_v25 }
  0x67   : > { %325 = vmatpush1.msra.mxu0 %v262_v26  ;;  %4818 = vmatpush1.msra.mxu1 %v262_v26 }
  0x68   : > { %326 = vmatprep.subr.mxu0 %v261_v27  ;;  %4803 = vmatprep.subr.mxu1 %v261_v27 }
  0x69   : > { %327 = vmatpush1.msra.mxu0 %v260_v28  ;;  %4819 = vmatpush1.msra.mxu1 %v260_v28 }
  0x6a   : > { %328 = vmatprep.subr.mxu0 %v259_v29  ;;  %4804 = vmatprep.subr.mxu1 %v259_v29 }
  0x6b   : > { %329 = vmatpush1.msra.mxu0 %v258_v30  ;;  %4820 = vmatpush1.msra.mxu1 %v258_v30 }
  0x6c   : > { %330 = vmatprep.subr.mxu0 %v257_v31  ;;  %4805 = vmatprep.subr.mxu1 %v257_v31 }
  0x6d   : > { %331 = vmatpush1.msra.mxu0 %v256_v32  ;;  %4821 = vmatpush1.msra.mxu1 %v256_v32 }
  0x6e   : > { %365 = vmatmul.mubr.f32.vlgmr.msra.gmra.mxu0 %v240_v33  ;;  %413 = vmatmul.mubr.f32.vlgmr.msra.gmra.mxu1 %v248_v34 }
  0x6f   : > { %370 = vmatprep.mubr.f32.mxu0 %v6842_v0  ;;  %418 = vmatprep.mubr.f32.mxu1 %v6842_v0 }
  0x72   : > { %371 = vmatmul.mubr.f32.gmra.mxu0 %v241_v35  ;;  %419 = vmatmul.mubr.f32.gmra.mxu1 %v249_v36 }
  0x73   : > { %376 = vmatprep.mubr.f32.mxu0 %v6842_v0  ;;  %424 = vmatprep.mubr.f32.mxu1 %v6842_v0 }
  0x76   : > { %377 = vmatmul.mubr.f32.gmra.mxu0 %v242_v37  ;;  %425 = vmatmul.mubr.f32.gmra.mxu1 %v250_v38 }
  0x77   : > { %382 = vmatprep.mubr.f32.mxu0 %v6842_v0  ;;  %430 = vmatprep.mubr.f32.mxu1 %v6842_v0 }
  0x7a   : > { %383 = vmatmul.mubr.f32.gmra.mxu0 %v243_v39  ;;  %431 = vmatmul.mubr.f32.gmra.mxu1 %v251_v40 }
  0x7b   : > { %388 = vmatprep.mubr.f32.mxu0 %v6842_v0  ;;  %436 = vmatprep.mubr.f32.mxu1 %v6842_v0 }
  0x7e   : > { %389 = vmatmul.mubr.f32.gmra.mxu0 %v244_v41  ;;  %437 = vmatmul.mubr.f32.gmra.mxu1 %v252_v42 }
  0x7f   : > { %394 = vmatprep.mubr.f32.mxu0 %v6842_v0  ;;  %442 = vmatprep.mubr.f32.mxu1 %v6842_v0 }
  0x82   : > { %395 = vmatmul.mubr.f32.gmra.mxu0 %v245_v43  ;;  %443 = vmatmul.mubr.f32.gmra.mxu1 %v253_v44 }
  0x83   : > { %400 = vmatprep.mubr.f32.mxu0 %v6842_v0  ;;  %448 = vmatprep.mubr.f32.mxu1 %v6842_v0 }
  0x86   : > { %401 = vmatmul.mubr.f32.gmra.mxu0 %v246_v45  ;;  %449 = vmatmul.mubr.f32.gmra.mxu1 %v254_v46 }
  0x87   : > { %406 = vmatprep.mubr.f32.mxu0 %v6842_v0  ;;  %454 = vmatprep.mubr.f32.mxu1 %v6842_v0 }
  0x8a   : > { %407 = vmatmul.mubr.f32.gmra.mxu0 %v247_v47  ;;  %455 = vmatmul.mubr.f32.gmra.mxu1 %v255_v48 }
 0x12e   : > { %v366_v54 = vpop.f32.mrf.mxu0  ;;  %v414_v55 = vpop.f32.mrf.mxu1 }
 0x12f   : > { %v5226_v56 = vadd.f32 %v366_v54, %v5223_v53  ;;  %v5235_v63 = vadd.f32 %v414_v55, %v5223_v53 }
 0x130   : > { %v368_v58 = vpop.f32.mrf.mxu0  ;;  %v416_v59 = vpop.f32.mrf.mxu1 }
 0x131   : > { %477 = vrot.lane.b32.xlu0 %v5226_v56, %s5021_s24  ;;  %v5247_v4 = vadd.f32 %v368_v58, %v5237_v1  ;;  %v5257_v8 = vadd.f32 %v416_v59, %v5237_v1  ;;  %v5022_v59 = vmov 1983009808  }
 0x132   : > { %v372_v60 = vpop.f32.mrf.mxu0  ;;  %v420_v61 = vpop.f32.mrf.mxu1 }
 0x133   : > { %v5232_v62 = vadd.f32 %v420_v61, %v5223_v53  ;;  %v5267_v12 = vadd.f32 %v372_v60, %v5223_v53  ;;  %v527_v60 = vunpack.c.l.s4 %v5022_v59 }
 0x134   : > { %v374_v2 = vpop.f32.mrf.mxu0  ;;  %v422_v5 = vpop.f32.mrf.mxu1 }
 0x135   : > { %495 = vrot.lane.b32.xlu1 %v5232_v62, %s5021_s24  ;;  %493 = vrot.lane.b32.xlu0 %v5235_v63, %s5021_s24  ;;  %v5244_v3 = vadd.f32 %v374_v2, %v5237_v1  ;;  %v5254_v7 = vadd.f32 %v422_v5, %v5237_v1  ;;  %v528_v61 = vunpack.c.0.s8 %v527_v60  ;;  %v5023_v2 = vmov 1934713408  }
 0x136   : > { %v378_v6 = vpop.f32.mrf.mxu0  ;;  %v426_v10 = vpop.f32.mrf.mxu1  ;;  %v558_v5 = vunpack.c.l.s4 %v5023_v2 }
 0x137   : > { %v5260_v11 = vadd.f32 %v378_v6, %v5223_v53  ;;  %v5275_v16 = vadd.f32 %v426_v10, %v5223_v53  ;;  %v5389_v6 = vsub.s32 %v528_v61, %v5217_v50  ;;  %v525_v10 = vcombine.high %v5226_v56, %v6842_v0 }
 0x138   : > { %v380_v9 = vpop.f32.mrf.mxu0  ;;  %v428_v14 = vpop.f32.mrf.mxu1 }
 0x139   : > { %1599 = vrot.lane.b32.xlu1 %v5244_v3, %s5021_s24  ;;  %1597 = vrot.lane.b32.xlu0 %v5247_v4, %s5021_s24  ;;  %v5287_v20 = vadd.f32 %v380_v9, %v5237_v1  ;;  %v5297_v24 = vadd.f32 %v428_v14, %v5237_v1  ;;  %v559_v9 = vunpack.c.0.s8 %v558_v5  ;;  %v2173_v14 = vcombine.high %v5257_v8, %v6842_v0 }
 0x13a   : > { %v384_v13 = vpop.f32.mrf.mxu0  ;;  %v432_v17 = vpop.f32.mrf.mxu1 }
 0x13b   : > { %v5270_v15 = vadd.f32 %v384_v13, %v5223_v53  ;;  %v5280_v18 = vadd.f32 %v432_v17, %v5223_v53  ;;  %v1645_v13 = vcombine.high %v5247_v4, %v6842_v0  ;;  %v5401_v17 = vrot.slane %v5226_v56, %v5389_v6 }
 0x13c   : > { %v386_v19 = vpop.f32.mrf.mxu0  ;;  %v434_v22 = vpop.f32.mrf.mxu1  ;;  %v5426_v56 = vrot.slane %v5257_v8, %v5389_v6 }
 0x13d   : > { %1615 = vrot.lane.b32.xlu1 %v5254_v7, %s5021_s24  ;;  %1613 = vrot.lane.b32.xlu0 %v5257_v8, %s5021_s24  ;;  %v5294_v23 = vadd.f32 %v386_v19, %v5237_v1  ;;  %v5307_v28 = vadd.f32 %v434_v22, %v5237_v1  ;;  %v5404_v19 = vsub.s32 %v559_v9, %v5217_v50 }
 0x13e   : > { %v390_v21 = vpop.f32.mrf.mxu0  ;;  %v438_v26 = vpop.f32.mrf.mxu1  ;;  %v1119_v22 = vcombine.high %v5232_v62, %v6842_v0  ;;  %v5422_v50 = vrot.slane %v5247_v4, %v5389_v6  ;;  %v5440_v4 = vrot.slane %v2173_v14, %v5389_v6  ;;  %v5444_v8 = vrot.slane %v5232_v62, %v5389_v6 }
 0x13f   : > { %v5302_v27 = vadd.f32 %v390_v21, %v5223_v53  ;;  %v5315_v32 = vadd.f32 %v438_v26, %v5223_v53  ;;  %v591_v21 = vcombine.high %v5267_v12, %v6842_v0  ;;  %v5415_v26 = vrot.slane %v5235_v63, %v5389_v6 }
 0x140   : > { %v392_v25 = vpop.f32.mrf.mxu0  ;;  %v440_v30 = vpop.f32.mrf.mxu1  ;;  %v5464_v62 = vrot.slane %v5254_v7, %v5389_v6  ;;  %v1843_v60 = vcombine.high %v5294_v23, %v6842_v0  ;;  %v1251_v61 = vcombine.high %v5280_v18, %v6842_v0  ;;  %v5509_v9 = vrot.slane %v5270_v15, %v5389_v6 }
 0x141   : > { %481 = vrot.lane.b32.xlu1 %v5260_v11, %s5021_s24  ;;  %479 = vrot.lane.b32.xlu0 %v5267_v12, %s5021_s24  ;;  %v5327_v36 = vadd.f32 %v392_v25, %v5237_v1  ;;  %v5337_v41 = vadd.f32 %v440_v30, %v5237_v1  ;;  %v5411_v25 = vrot.slane %v525_v10, %v5389_v6 }
 0x142   : > { %v396_v29 = vpop.f32.mrf.mxu0  ;;  %v444_v33 = vpop.f32.mrf.mxu1  ;;  %v5430_v30 = vrot.slane %v5267_v12, %v5389_v6  ;;  %v657_v12 = vcombine.high %v5260_v11, %v6842_v0  ;;  %v5525_v14 = vrot.slane %v5294_v23, %v5389_v6 }
 0x143   : > { %v5310_v31 = vadd.f32 %v396_v29, %v5223_v53  ;;  %v5320_v34 = vadd.f32 %v444_v33, %v5223_v53  ;;  %v1711_v33 = vcombine.high %v5244_v3, %v6842_v0 }
 0x144   : > { %v398_v35 = vpop.f32.mrf.mxu0  ;;  %v446_v37 = vpop.f32.mrf.mxu1  ;;  %v5485_v59 = vrot.slane %v657_v12, %v5389_v6  ;;  %v5548_v12 = vrot.slane %v5302_v27, %v5389_v6 }
 0x145   : > { %483 = vrot.lane.b32.xlu1 %v5270_v15, %s5021_s24  ;;  %497 = vrot.lane.b32.xlu0 %v5275_v16, %s5021_s24  ;;  %v5334_v40 = vadd.f32 %v398_v35, %v5237_v1  ;;  %v5347_v45 = vadd.f32 %v446_v37, %v5237_v1  ;;  %v5437_v35 = vrot.slane %v1645_v13, %v5389_v6 }
 0x146   : > { %v402_v38 = vpop.f32.mrf.mxu0  ;;  %v450_v39 = vpop.f32.mrf.mxu1  ;;  %v5449_v37 = vrot.slane %v591_v21, %v5389_v6  ;;  %v789_v13 = vcombine.high %v5302_v27, %v6842_v0  ;;  %v1317_v21 = vcombine.high %v5315_v32, %v6842_v0 }
 0x147   : > { %v5342_v43 = vadd.f32 %v402_v38, %v5223_v53  ;;  %v5357_v48 = vadd.f32 %v450_v39, %v5223_v53  ;;  %v5452_v38 = vrot.slane %v1119_v22, %v5389_v6  ;;  %v1777_v39 = vcombine.high %v5287_v20, %v6842_v0 }
 0x148   : > { %v404_v42 = vpop.f32.mrf.mxu0  ;;  %v452_v44 = vpop.f32.mrf.mxu1  ;;  %v5532_v22 = vrot.slane %v1843_v60, %v5389_v6 }
 0x149   : > { %499 = vrot.lane.b32.xlu1 %v5280_v18, %s5021_s24  ;;  %1601 = vrot.lane.b32.xlu0 %v5287_v20, %s5021_s24  ;;  %v5367_v52 = vadd.f32 %v404_v42, %v5237_v1  ;;  %v5372_v55 = vadd.f32 %v452_v44, %v5237_v1  ;;  %v1185_v42 = vcombine.high %v5275_v16, %v6842_v0 }
 0x14a   : > { %v408_v46 = vpop.f32.mrf.mxu0  ;;  %v456_v49 = vpop.f32.mrf.mxu1  ;;  %v5460_v44 = vrot.slane %v5244_v3, %v5389_v6  ;;  %v723_v3 = vcombine.high %v5270_v15, %v6842_v0  ;;  %v5496_v2 = vrot.slane %v1777_v39, %v5389_v6  ;;  %v1909_v15 = vcombine.high %v5327_v36, %v6842_v0 }
 0x14b   : > { %v5350_v47 = vadd.f32 %v408_v46, %v5223_v53  ;;  %v5362_v51 = vadd.f32 %v456_v49, %v5223_v53  ;;  %v5468_v46 = vrot.slane %v5260_v11, %v5389_v6  ;;  %v2305_v49 = vcombine.high %v5297_v24, %v6842_v0 }
 0x14c   : > { %v410_v54 = vpop.f32.mrf.mxu0  ;;  %v458_v57 = vpop.f32.mrf.mxu1  ;;  %v5489_v11 = vrot.slane %v5287_v20, %v5389_v6  ;;  %v5499_v5 = vrot.slane %v1185_v42, %v5389_v6  ;;  %v2371_v20 = vcombine.high %v5307_v28, %v6842_v0  ;;  %v855_v39 = vcombine.high %v5310_v31, %v6842_v0 }
 0x14d   : > { %1603 = vrot.lane.b32.xlu1 %v5294_v23, %s5021_s24  ;;  %1617 = vrot.lane.b32.xlu0 %v5297_v24, %s5021_s24  ;;  %v5377_v53 = vadd.f32 %v410_v54, %v5237_v1  ;;  %v5382_v58 = vadd.f32 %v458_v57, %v5237_v1  ;;  %v1053_v1 = vcombine.high %v5235_v63, %v6842_v0 }
 0x14e   : > { %v2239_v63 = vcombine.high %v5254_v7, %v6842_v0  ;;  %v5473_v54 = vrot.slane %v1711_v33, %v5389_v6  ;;  %v5482_v7 = vrot.slane %v5275_v16, %v5389_v6  ;;  %v5503_v16 = vrot.slane %v5297_v24, %v5389_v6 }
 0x14f   : > { %v5418_v29 = vrot.slane %v1053_v1, %v5389_v6  ;;  %v5512_v10 = vrot.slane %v2305_v49, %v5389_v6  ;;  %v5516_v1 = vrot.slane %v5280_v18, %v5389_v6  ;;  %v5521_v24 = vrot.slane %v723_v3, %v5389_v6 }
 0x150   : > { %v5476_v57 = vrot.slane %v2239_v63, %v5389_v6  ;;  %v5535_v18 = vrot.slane %v1251_v61, %v5389_v6  ;;  %v5539_v33 = vrot.slane %v5307_v28, %v5389_v6  ;;  %v2437_v23 = vcombine.high %v5337_v41, %v6842_v0 }
 0x151   : > { %1619 = vrot.lane.b32.xlu1 %v5307_v28, %s5021_s24  ;;  %485 = vrot.lane.b32.xlu0 %v5302_v27, %s5021_s24  ;;  %v5544_v63 = vrot.slane %v2371_v20, %v5389_v6  ;;  %v5554_v42 = vrot.slane %v5315_v32, %v5389_v6  ;;  %v5557_v28 = vrot.slane %v789_v13, %v5389_v6 }
 0x152   : > { %v5561_v49 = vrot.slane %v5327_v36, %v5389_v6  ;;  %v1975_v3 = vcombine.high %v5334_v40, %v6842_v0  ;;  %v1383_v27 = vcombine.high %v5320_v34, %v6842_v0  ;;  %v5568_v60 = vrot.slane %v1909_v15, %v5389_v6 }
 0x153   : > { %6884 = vst [vmem:[#allocation12_spill] sm:$0xff] %v5554_v42  ;;  %6885 = vst [vmem:[#allocation13_spill] sm:$0xff] %v5557_v28  ;;  %v5571_v61 = vrot.slane %v1317_v21, %v5389_v6  ;;  %v5581_v20 = vrot.slane %v5310_v31, %v5389_v6  ;;  %v5584_v13 = vrot.slane %v2437_v23, %v5389_v6 }
 0x154   : > { %6886 = vst [vmem:[#allocation14_spill] sm:$0xff] %v5561_v49  ;;  %6887 = vst [vmem:[#allocation15_spill] sm:$0xff] %v5568_v60  ;;  %v921_v15 = vcombine.high %v5342_v43, %v6842_v0  ;;  %v1449_v21 = vcombine.high %v5357_v48, %v6842_v0  ;;  %v2569_v23 = vcombine.high %v5372_v55, %v6842_v0  ;;  %v6900_v49 = vmov 0.0  }
 0x155   : > { %487 = vrot.lane.b32.xlu1 %v5310_v31, %s5021_s24  ;;  %501 = vrot.lane.b32.xlu0 %v5315_v32, %s5021_s24  ;;  %6888 = vst [vmem:[#allocation16_spill] sm:$0xff] %v5571_v61  ;;  %v5575_v32 = vrot.slane %v5337_v41, %v5389_v6  ;;  %6890 = vst [vmem:[#allocation18_spill] sm:$0xff] %v5581_v20  ;;  %v2041_v31 = vcombine.high %v5367_v52, %v6842_v0 }
 0x156   : > { %6891 = vst [vmem:[#allocation19_spill] sm:$0xff] %v5584_v13  ;;  %v5603_v13 = vrot.slane %v5334_v40, %v5389_v6  ;;  %v5606_v20 = vrot.slane %v1975_v3, %v5389_v6  ;;  %v5626_v3 = vrot.slane %v5357_v48, %v5389_v6 }
 0x157   : > { %6889 = vst [vmem:[#allocation17_spill] sm:$0xff] %v5575_v32  ;;  %v5595_v32 = vrot.slane %v5320_v34, %v5389_v6 }
 0x158   : > { %6894 = vst [vmem:[#allocation22_spill] sm:$0xff] %v5603_v13  ;;  %6895 = vst [vmem:[#allocation23_spill] sm:$0xff] %v5606_v20 }
 0x159   : > { %503 = vrot.lane.b32.xlu1 %v5320_v34, %s5021_s24  ;;  %1605 = vrot.lane.b32.xlu0 %v5327_v36, %s5021_s24  ;;  %v2503_v36 = vcombine.high %v5347_v45, %v6842_v0  ;;  %6893 = vst [vmem:[#allocation21_spill] sm:$0xff] %v5595_v32  ;;  %v5613_v34 = vrot.slane %v5347_v45, %v5389_v6  ;;  %6901 = vst [vmem:[#allocation28_spill] sm:$0xff] %v5626_v3 }
 0x15a   : > { %v5620_v0 = vrot.slane %v5342_v43, %v5389_v6 }
 0x15b   : > { %6897 = vst [vmem:[#allocation25_spill] sm:$0xff] %v5613_v34 }
 0x15c   : > { %6899 = vst [vmem:[#allocation27_spill] sm:$0xff] %v5620_v0 }
 0x15d   : > { %1607 = vrot.lane.b32.xlu1 %v5334_v40, %s5021_s24  ;;  %1621 = vrot.lane.b32.xlu0 %v5337_v41, %s5021_s24  ;;  %v5591_v41 = vrot.slane %v855_v39, %v5389_v6  ;;  %v5609_v39 = vrot.slane %v1383_v27, %v5389_v6  ;;  %v987_v40 = vcombine.high %v5350_v47, %v6900_v49 }
 0x15e   : > { %v5629_v27 = vrot.slane %v921_v15, %v5389_v6  ;;  %v5650_v15 = vrot.slane %v2569_v23, %v5389_v6 }
 0x15f   : > { %6892 = vst [vmem:[#allocation20_spill] sm:$0xff] %v5591_v41  ;;  %6896 = vst [vmem:[#allocation24_spill] sm:$0xff] %v5609_v39  ;;  %v5616_v41 = vrot.slane %v2503_v36, %v5389_v6  ;;  %v5636_v36 = vrot.slane %v1449_v21, %v5389_v6 }
 0x160   : > { %6902 = vst [vmem:[#allocation29_spill] sm:$0xff] %v5629_v27  ;;  %6908 = vst [vmem:[#allocation35_spill] sm:$0xff] %v5650_v15 }
 0x161   : > { %1623 = vrot.lane.b32.xlu1 %v5347_v45, %s5021_s24  ;;  %489 = vrot.lane.b32.xlu0 %v5342_v43, %s5021_s24  ;;  %6898 = vst [vmem:[#allocation26_spill] sm:$0xff] %v5616_v41  ;;  %v5633_v45 = vrot.slane %v5367_v52, %v5389_v6  ;;  %6904 = vst [vmem:[#allocation31_spill] sm:$0xff] %v5636_v36  ;;  %v5640_v43 = vrot.slane %v5372_v55, %v5389_v6 }
 0x162   : > { %v5643_v41 = vrot.slane %v2041_v31, %v5389_v6 }
 0x163   : > { %6903 = vst [vmem:[#allocation30_spill] sm:$0xff] %v5633_v45  ;;  %6905 = vst [vmem:[#allocation32_spill] sm:$0xff] %v5640_v43 }
 0x164   : > { %6906 = vst [vmem:[#allocation33_spill] sm:$0xff] %v5643_v41  ;;  %v5661_v41 = vrot.slane %v987_v40, %v5389_v6 }
 0x165   : > { %491 = vrot.lane.b32.xlu1 %v5350_v47, %s5021_s24  ;;  %505 = vrot.lane.b32.xlu0 %v5357_v48, %s5021_s24  ;;  %v5647_v48 = vrot.slane %v5350_v47, %v5389_v6  ;;  %v5665_v47 = vrot.slane %v5362_v51, %v5389_v6 }
 0x166   : > { %6909 = vst [vmem:[#allocation36_spill] sm:$0xff] %v5661_v41 }
 0x167   : > { %6907 = vst [vmem:[#allocation34_spill] sm:$0xff] %v5647_v48  ;;  %6910 = vst [vmem:[#allocation37_spill] sm:$0xff] %v5665_v47 }
 0x169   : > { %507 = vrot.lane.b32.xlu1 %v5362_v51, %s5021_s24  ;;  %1609 = vrot.lane.b32.xlu0 %v5367_v52, %s5021_s24  ;;  %v5654_v52 = vcombine.high %v5362_v51, %v6900_v49 }
 0x16d   : > { %1611 = vrot.lane.b32.xlu1 %v5377_v53, %s5021_s24  ;;  %1625 = vrot.lane.b32.xlu0 %v5372_v55, %s5021_s24 }
 0x171   : > { %1627 = vrot.lane.b32.xlu1 %v5382_v58, %s5021_s24 }
 0x1a3   : > { %v478_v60 = vpop.permute.xlu0 %477 }
 0x1a4   : > { %v540_v23 = vcombine.high %v478_v60, %v6900_v49  ;;  %v5669_v15 = vrot.slane %v478_v60, %v5389_v6 }
 0x1a7   : > { %v496_v0 = vpop.permute.xlu1 %495  ;;  %v494_v21 = vpop.permute.xlu0 %493 }
 0x1a8   : > { %v1134_v45 = vcombine.high %v496_v0, %v6900_v49  ;;  %v1141_v55 = vrot.slane %v496_v0, %v5389_v6  ;;  %v1068_v43 = vcombine.high %v494_v21, %v6900_v49  ;;  %v1075_v31 = vrot.slane %v494_v21, %v5389_v6 }
 0x1aa   : > { %v1148_v36 = vrot.slane %v1134_v45, %v5389_v6  ;;  %v1149_v0 = vcombine.low %v5444_v8, %v1141_v55  ;;  %v1150_v3 = vcombine.high %v5444_v8, %v1141_v55  ;;  %v1082_v21 = vrot.slane %v1068_v43, %v5389_v6 }
 0x1ab   : > { %v1600_v48 = vpop.permute.xlu1 %1599  ;;  %v1083_v40 = vcombine.low %v5415_v26, %v1075_v31  ;;  %v1084_v41 = vcombine.high %v5415_v26, %v1075_v31  ;;  %v1598_v27 = vpop.permute.xlu0 %1597 }
 0x1ac   : > { %v1726_v51 = vcombine.high %v1600_v48, %v6900_v49  ;;  %v1733_v47 = vrot.slane %v1600_v48, %v5389_v6  ;;  %v5680_v60 = vrot.slane %v1149_v0, %v5404_v19  ;;  %v5683_v45 = vrot.slane %v1150_v3, %v5404_v19 }
 0x1ad   : > { %v1165_v8 = vcombine.low %v5452_v38, %v1148_v36  ;;  %v1166_v43 = vcombine.high %v5452_v38, %v1148_v36  ;;  %v5688_v55 = vrot.slane %v1083_v40, %v5404_v19  ;;  %v5691_v26 = vrot.slane %v1084_v41, %v5404_v19 }
 0x1ae   : > { %v1099_v31 = vcombine.low %v5418_v29, %v1082_v21  ;;  %v1100_v48 = vcombine.high %v5418_v29, %v1082_v21  ;;  %v5717_v40 = vcombine.high %v5377_v53, %v6900_v49  ;;  %v1740_v20 = vrot.slane %v1726_v51, %v5389_v6 }
 0x1af   : > { %v5696_v0 = vrot.slane %v1165_v8, %v5404_v19  ;;  %v5699_v3 = vrot.slane %v1166_v43, %v5404_v19  ;;  %v5720_v8 = vrot.slane %v540_v23, %v5389_v6  ;;  %v1614_v38 = vpop.permute.xlu0 %1613  ;;  %v1741_v43 = vcombine.low %v5460_v44, %v1733_v47 }
 0x1b0   : > { %v5706_v36 = vrot.slane %v1099_v31, %v5404_v19  ;;  %v5709_v41 = vrot.slane %v1100_v48, %v5404_v19  ;;  %v1616_v48 = vpop.permute.xlu1 %1615  ;;  %v1742_v31 = vcombine.high %v5460_v44, %v1733_v47  ;;  %v2188_v13 = vcombine.high %v1614_v38, %v6900_v49 }
 0x1b1   : > { %6911 = vst [vmem:[#allocation38_spill] sm:$0xff] %v5696_v0  ;;  %6912 = vst [vmem:[#allocation39_spill] sm:$0xff] %v5699_v3  ;;  %v1660_v3 = vcombine.high %v1598_v27, %v6900_v49  ;;  %v1667_v0 = vrot.slane %v1598_v27, %v5389_v6  ;;  %v2254_v29 = vcombine.high %v1616_v48, %v6900_v49 }
 0x1b2   : > { %6913 = vst [vmem:[#allocation40_spill] sm:$0xff] %v5706_v36  ;;  %6914 = vst [vmem:[#allocation41_spill] sm:$0xff] %v5709_v41  ;;  %v2261_v21 = vrot.slane %v1616_v48, %v5389_v6  ;;  %v1749_v34 = vrot.slane %v1741_v43, %v5404_v19  ;;  %v1756_v23 = vrot.slane %v1742_v31, %v5404_v19 }
 0x1b3   : > { %v1757_v51 = vcombine.low %v5473_v54, %v1740_v20  ;;  %v1758_v41 = vcombine.high %v5473_v54, %v1740_v20  ;;  %v1674_v44 = vrot.slane %v1660_v3, %v5389_v6  ;;  %v1675_v47 = vcombine.low %v5422_v50, %v1667_v0 }
 0x1b4   : > { %v1676_v27 = vcombine.high %v5422_v50, %v1667_v0  ;;  %v2268_v36 = vrot.slane %v2254_v29, %v5389_v6  ;;  %v3631_v32 = vcombine.low %v1749_v34, %v1756_v23  ;;  %v4751_v43 = vcombine.high %v1749_v34, %v1756_v23 }
 0x1b5   : > { %v1765_v48 = vrot.slane %v1757_v51, %v5404_v19  ;;  %v1772_v39 = vrot.slane %v1758_v41, %v5404_v19  ;;  %v1683_v31 = vrot.slane %v1675_v47, %v5404_v19  ;;  %v1691_v54 = vcombine.low %v5437_v35, %v1674_v44 }
 0x1b6   : > { %v1690_v61 = vrot.slane %v1676_v27, %v5404_v19  ;;  %v1692_v20 = vcombine.high %v5437_v35, %v1674_v44  ;;  %v3638_v3 = vrot.slane %v3631_v32, %v5389_v6  ;;  %v3646_v50 = vrot.slane %v4751_v43, %v5389_v6 }
 0x1b7   : > { %v3647_v0 = vcombine.low %v1765_v48, %v1772_v39  ;;  %v4752_v29 = vcombine.high %v1765_v48, %v1772_v39  ;;  %v1699_v41 = vrot.slane %v1691_v54, %v5404_v19  ;;  %v2269_v35 = vcombine.low %v5464_v62, %v2261_v21 }
 0x1b8   : > { %v1706_v34 = vrot.slane %v1692_v20, %v5404_v19  ;;  %v3581_v23 = vcombine.low %v1683_v31, %v1690_v61  ;;  %v4749_v51 = vcombine.high %v1683_v31, %v1690_v61  ;;  %v3663_v42 = vcombine.low %v3638_v3, %v3646_v50 }
 0x1b9   : > { %v3654_v47 = vrot.slane %v3647_v0, %v5389_v6  ;;  %v3662_v27 = vrot.slane %v4752_v29, %v5389_v6  ;;  %v2270_v54 = vcombine.high %v5464_v62, %v2261_v21  ;;  %v2277_v61 = vrot.slane %v2269_v35, %v5404_v19 }
 0x1ba   : > { %v3588_v32 = vrot.slane %v3581_v23, %v5389_v6  ;;  %v3596_v44 = vrot.slane %v4749_v51, %v5389_v6  ;;  %v3597_v43 = vcombine.low %v1699_v41, %v1706_v34  ;;  %v4750_v28 = vcombine.high %v1699_v41, %v1706_v34 }
 0x1bb   : > { %v3670_v39 = vrot.slane %v3663_v42, %v5404_v19  ;;  %v3671_v48 = vcombine.low %v3654_v47, %v3662_v27  ;;  %v2285_v50 = vcombine.low %v5476_v57, %v2268_v36  ;;  %v2284_v29 = vrot.slane %v2270_v54, %v5404_v19 }
 0x1bc   : > { %v3604_v31 = vrot.slane %v3597_v43, %v5389_v6  ;;  %v3612_v20 = vrot.slane %v4750_v28, %v5389_v6  ;;  %v3613_v3 = vcombine.low %v3588_v32, %v3596_v44  ;;  %v2286_v41 = vcombine.high %v5476_v57, %v2268_v36 }
 0x1bd   : > { %v3678_v0 = vrot.slane %v3671_v48, %v5404_v19  ;;  %v2195_v42 = vrot.slane %v1614_v38, %v5389_v6  ;;  %v2293_v21 = vrot.slane %v2285_v50, %v5404_v19  ;;  %v2202_v23 = vrot.slane %v2188_v13, %v5389_v6 }
 0x1be   : > { %v3620_v34 = vrot.slane %v3613_v3, %v5404_v19  ;;  %v3621_v62 = vcombine.low %v3604_v31, %v3612_v20  ;;  %v2300_v47 = vrot.slane %v2286_v41, %v5404_v19  ;;  %v4031_v27 = vcombine.low %v2277_v61, %v2284_v29 }
 0x1bf   : > { %v3679_v51 = vcombine.low %v3670_v39, %v3678_v0  ;;  %v3680_v28 = vcombine.high %v3670_v39, %v3678_v0  ;;  %v4767_v32 = vcombine.high %v2277_v61, %v2284_v29  ;;  %v2203_v44 = vcombine.low %v5426_v56, %v2195_v42  ;;  %v482_v39 = vpop.permute.xlu1 %481 }
 0x1c0   : > { %v3628_v35 = vrot.slane %v3621_v62, %v5404_v19  ;;  %v2204_v57 = vcombine.high %v5426_v56, %v2195_v42  ;;  %v4038_v13 = vrot.slane %v4031_v27, %v5389_v6  ;;  %v4047_v38 = vcombine.low %v2293_v21, %v2300_v47 }
 0x1c1   : > { %4383 = vst.msk [vmem:[%s5783_s28 + $0x8] sm:$0xff] %vm4381_vm0, %v3679_v51  ;;  %4399 = vst.msk [vmem:[%s5783_s28 + $0x88] sm:$0xff] %vm4381_vm0, %v3680_v28  ;;  %v4768_v36 = vcombine.high %v2293_v21, %v2300_v47  ;;  %v2219_v43 = vcombine.low %v5440_v4, %v2202_v23  ;;  %v4046_v56 = vrot.slane %v4767_v32, %v5389_v6 }
 0x1c2   : > { %v3629_v48 = vcombine.low %v3620_v34, %v3628_v35  ;;  %v3630_v54 = vcombine.high %v3620_v34, %v3628_v35  ;;  %v2211_v61 = vrot.slane %v2203_v44, %v5404_v19  ;;  %v4054_v31 = vrot.slane %v4047_v38, %v5389_v6 }
 0x1c3   : > { %v4062_v20 = vrot.slane %v4768_v36, %v5389_v6  ;;  %v2218_v3 = vrot.slane %v2204_v57, %v5404_v19  ;;  %v2220_v50 = vcombine.high %v5440_v4, %v2202_v23  ;;  %v6915_v0 = vcombine.low %v5401_v17, %v5669_v15 }
 0x1c4   : > { %4382 = vst.msk [vmem:[%s5783_s28] sm:$0xff] %vm4381_vm0, %v3629_v48  ;;  %4398 = vst.msk [vmem:[%s5783_s28 + $0x80] sm:$0xff] %vm4381_vm0, %v3630_v54  ;;  %v4063_v41 = vcombine.low %v4038_v13, %v4046_v56  ;;  %v2227_v42 = vrot.slane %v2219_v43, %v5404_v19  ;;  %v679_v34 = vrot.slane %v482_v39, %v5389_v6  ;;  %v480_v43 = vpop.permute.xlu0 %479 }
 0x1c5   : > { %v563_v29 = vrot.slane %v6915_v0, %v5404_v19  ;;  %v4071_v62 = vcombine.low %v4054_v31, %v4062_v20  ;;  %v2234_v21 = vrot.slane %v2220_v50, %v5404_v19  ;;  %v3981_v51 = vcombine.low %v2211_v61, %v2218_v3 }
 0x1c6   : > { %v4765_v28 = vcombine.high %v2211_v61, %v2218_v3  ;;  %v6916_v4 = vcombine.high %v5401_v17, %v5669_v15  ;;  %v571_v47 = vcombine.low %v5411_v25, %v5720_v8  ;;  %v4070_v27 = vrot.slane %v4063_v41, %v5404_v19 }
 0x1c7   : > { %v672_v35 = vcombine.high %v482_v39, %v6900_v49  ;;  %v4078_v32 = vrot.slane %v4071_v62, %v5404_v19  ;;  %v3988_v44 = vrot.slane %v3981_v51, %v5389_v6  ;;  %v3997_v13 = vcombine.low %v2227_v42, %v2234_v21 }
 0x1c8   : > { %v570_v23 = vrot.slane %v6916_v4, %v5404_v19  ;;  %v3996_v57 = vrot.slane %v4765_v28, %v5389_v6  ;;  %v572_v17 = vcombine.high %v5411_v25, %v5720_v8  ;;  %v4766_v15 = vcombine.high %v2227_v42, %v2234_v21 }
 0x1c9   : > { %v687_v38 = vcombine.low %v5468_v46, %v679_v34  ;;  %v688_v36 = vcombine.high %v5468_v46, %v679_v34  ;;  %v4079_v48 = vcombine.low %v4070_v27, %v4078_v32  ;;  %v4080_v39 = vcombine.high %v4070_v27, %v4078_v32 }
 0x1ca   : > { %v4004_v54 = vrot.slane %v3997_v13, %v5389_v6  ;;  %v4013_v56 = vcombine.low %v3988_v44, %v3996_v57  ;;  %v5826_v61 = vrot.slane %v5377_v53, %v5389_v6  ;;  %v2701_v31 = vcombine.low %v563_v29, %v570_v23  ;;  %v484_v13 = vpop.permute.xlu1 %483 }
 0x1cb   : > { %v4717_v20 = vcombine.high %v563_v29, %v570_v23  ;;  %v4012_v3 = vrot.slane %v4766_v15, %v5389_v6  ;;  %v5831_v25 = vrot.slane %v5654_v52, %v5389_v6  ;;  %4391 = vst.msk [vmem:[%s5783_s28 + $0x48] sm:$0xff] %vm4381_vm0, %v4079_v48  ;;  %4407 = vst.msk [vmem:[%s5783_s28 + $0xc8] sm:$0xff] %vm4381_vm0, %v4080_v39  ;;  %v498_v39 = vpop.permute.xlu0 %497 }
 0x1cc   : > { %v686_v46 = vrot.slane %v672_v35, %v5389_v6  ;;  %v606_v8 = vcombine.high %v480_v43, %v6900_v49  ;;  %v613_v50 = vrot.slane %v480_v43, %v5389_v6  ;;  %v2635_v53 = vcombine.high %v5382_v58, %v6900_v49 }
 0x1cd   : > { %v579_v0 = vrot.slane %v571_v47, %v5404_v19  ;;  %v586_v29 = vrot.slane %v572_v17, %v5404_v19  ;;  %v4021_v41 = vcombine.low %v4004_v54, %v4012_v3  ;;  %v4020_v52 = vrot.slane %v4013_v56, %v5404_v19 }
 0x1ce   : > { %v695_v42 = vrot.slane %v687_v38, %v5404_v19  ;;  %v702_v34 = vrot.slane %v688_v36, %v5404_v19  ;;  %v621_v62 = vcombine.low %v5430_v30, %v613_v50  ;;  %v622_v51 = vcombine.high %v5430_v30, %v613_v50 }
 0x1cf   : > { %v4028_v21 = vrot.slane %v4021_v41, %v5404_v19  ;;  %v2708_v28 = vrot.slane %v2701_v31, %v5389_v6  ;;  %v2716_v4 = vrot.slane %v4717_v20, %v5389_v6  ;;  %v5854_v23 = vrot.slane %v5717_v40, %v5389_v6 }
 0x1d0   : > { %v5858_v47 = vrot.slane %v5382_v58, %v5389_v6  ;;  %v703_v27 = vcombine.low %v5485_v59, %v686_v46  ;;  %v620_v35 = vrot.slane %v606_v8, %v5389_v6  ;;  %v2717_v44 = vcombine.low %v579_v0, %v586_v29 }
 0x1d1   : > { %v4029_v32 = vcombine.low %v4020_v52, %v4028_v21  ;;  %v4030_v30 = vcombine.high %v4020_v52, %v4028_v21  ;;  %v4718_v57 = vcombine.high %v579_v0, %v586_v29  ;;  %v5863_v17 = vrot.slane %v2635_v53, %v5389_v6 }
 0x1d2   : > { %v704_v15 = vcombine.high %v5485_v59, %v686_v46  ;;  %v2801_v40 = vcombine.low %v695_v42, %v702_v34  ;;  %v629_v38 = vrot.slane %v621_v62, %v5404_v19  ;;  %v636_v58 = vrot.slane %v622_v51, %v5404_v19  ;;  %v500_v51 = vpop.permute.xlu1 %499 }
 0x1d3   : > { %4390 = vst.msk [vmem:[%s5783_s28 + $0x40] sm:$0xff] %vm4381_vm0, %v4029_v32  ;;  %4406 = vst.msk [vmem:[%s5783_s28 + $0xc0] sm:$0xff] %vm4381_vm0, %v4030_v30  ;;  %v2724_v36 = vrot.slane %v2717_v44, %v5389_v6  ;;  %v2732_v43 = vrot.slane %v4718_v57, %v5389_v6  ;;  %v2733_v48 = vcombine.low %v2708_v28, %v2716_v4 }
 0x1d4   : > { %v6917_v54 = vcombine.low %v5680_v60, %v5683_v45  ;;  %v6918_v56 = vcombine.high %v5680_v60, %v5683_v45  ;;  %v6919_v20 = vcombine.low %v5688_v55, %v5691_v26  ;;  %v6920_v46 = vcombine.high %v5688_v55, %v5691_v26 }
 0x1d5   : > { %v5899_v50 = vrot.slane %v703_v27, %v5404_v19  ;;  %v637_v53 = vcombine.low %v5449_v37, %v620_v35  ;;  %v638_v60 = vcombine.high %v5449_v37, %v620_v35  ;;  %v2741_v45 = vcombine.low %v2724_v36, %v2732_v43 }
 0x1d6   : > { %v5878_v59 = vrot.slane %v6917_v54, %v5389_v6  ;;  %v5884_v31 = vrot.slane %v6918_v56, %v5389_v6  ;;  %v5890_v3 = vrot.slane %v6919_v20, %v5389_v6  ;;  %v5896_v8 = vrot.slane %v6920_v46, %v5389_v6 }
 0x1d7   : > { %v5904_v0 = vrot.slane %v704_v15, %v5404_v19  ;;  %v4721_v29 = vcombine.high %v695_v42, %v702_v34  ;;  %v1200_v41 = vcombine.high %v498_v39, %v6900_v49  ;;  %v1207_v52 = vrot.slane %v498_v39, %v5389_v6  ;;  %v1602_v39 = vpop.permute.xlu0 %1601 }
 0x1d8   : > { %v5909_v55 = vrot.slane %v2801_v40, %v5389_v6  ;;  %v2751_v26 = vcombine.low %v629_v38, %v636_v58  ;;  %v2740_v62 = vrot.slane %v2733_v48, %v5404_v19  ;;  %v2748_v21 = vrot.slane %v2741_v45, %v5404_v19 }
 0x1d9   : > { %v4719_v28 = vcombine.high %v629_v38, %v636_v58  ;;  %v1214_v37 = vrot.slane %v1200_v41, %v5389_v6  ;;  %v1215_v4 = vcombine.low %v5482_v7, %v1207_v52  ;;  %v1216_v42 = vcombine.high %v5482_v7, %v1207_v52 }
 0x1da   : > { %v5917_v34 = vrot.slane %v637_v53, %v5404_v19  ;;  %v5920_v27 = vrot.slane %v638_v60, %v5404_v19  ;;  %v2750_v35 = vcombine.high %v2740_v62, %v2748_v21  ;;  %v2749_v32 = vcombine.low %v2740_v62, %v2748_v21  ;;  %v1604_v62 = vpop.permute.xlu1 %1603 }
 0x1db   : > { %v5923_v30 = vrot.slane %v1215_v4, %v5404_v19  ;;  %v5926_v44 = vrot.slane %v1216_v42, %v5404_v19  ;;  %v1266_v57 = vcombine.high %v500_v51, %v6900_v49  ;;  %v1273_v15 = vrot.slane %v500_v51, %v5389_v6 }
 0x1dc   : > { %v5931_v7 = vrot.slane %v4721_v29, %v5389_v6  ;;  %3533 = vxpose.xlu1.b32.start [1/16] (narrow) %v2750_v35, 64  ;;  %3501 = vxpose.xlu0.b32.start [1/16] (narrow) %v2749_v32, 64  ;;  %v738_v40 = vcombine.high %v484_v13, %v6900_v49  ;;  %v1231_v38 = vcombine.low %v5499_v5, %v1214_v37 }
 0x1dd   : > { %v5936_v58 = vrot.slane %v2751_v26, %v5389_v6  ;;  %v5939_v36 = vrot.slane %v4719_v28, %v5389_v6  ;;  %v1232_v43 = vcombine.high %v5499_v5, %v1214_v37  ;;  %v2767_v54 = vcombine.low %v5917_v34, %v5920_v27 }
 0x1de   : > { %v4720_v56 = vcombine.high %v5917_v34, %v5920_v27  ;;  %v5949_v20 = vrot.slane %v1231_v38, %v5404_v19  ;;  %v5954_v53 = vrot.slane %v484_v13, %v5389_v6  ;;  %v1280_v60 = vrot.slane %v1266_v57, %v5389_v6  ;;  %v1618_v13 = vpop.permute.xlu0 %1617 }
 0x1df   : > { %v5957_v5 = vrot.slane %v1232_v43, %v5404_v19  ;;  %v1281_v45 = vcombine.low %v5516_v1, %v1273_v15  ;;  %v5962_v29 = vrot.slane %v738_v40, %v5389_v6  ;;  %v1282_v41 = vcombine.high %v5516_v1, %v1273_v15 }
 0x1e0   : > { %v1792_v52 = vcombine.high %v1602_v39, %v6900_v49  ;;  %v1799_v26 = vrot.slane %v1602_v39, %v5389_v6  ;;  %v1297_v28 = vcombine.low %v5535_v18, %v1280_v60  ;;  %v1298_v1 = vcombine.high %v5535_v18, %v1280_v60 }
 0x1e1   : > { %v5972_v51 = vrot.slane %v1281_v45, %v5404_v19  ;;  %v5976_v37 = vrot.slane %v1282_v41, %v5404_v19  ;;  %v1858_v57 = vcombine.high %v1604_v62, %v6900_v49  ;;  %v1865_v15 = vrot.slane %v1604_v62, %v5389_v6 }
 0x1e2   : > { %v1806_v4 = vrot.slane %v1792_v52, %v5389_v6  ;;  %v1807_v42 = vcombine.low %v5489_v11, %v1799_v26  ;;  %v5982_v35 = vrot.slane %v1297_v28, %v5404_v19  ;;  %v1808_v32 = vcombine.high %v5489_v11, %v1799_v26 }
 0x1e3   : > { %v5988_v40 = vrot.slane %v1298_v1, %v5404_v19  ;;  %v1872_v45 = vrot.slane %v1858_v57, %v5389_v6  ;;  %v753_v41 = vcombine.low %v5509_v9, %v5954_v53  ;;  %v754_v52 = vcombine.high %v5509_v9, %v5954_v53 }
 0x1e4   : > { %v1815_v43 = vrot.slane %v1807_v42, %v5404_v19  ;;  %v1822_v39 = vrot.slane %v1808_v32, %v5404_v19  ;;  %v1823_v60 = vcombine.low %v5496_v2, %v1806_v4  ;;  %v1824_v11 = vcombine.high %v5496_v2, %v1806_v4 }
 0x1e5   : > { %v1873_v4 = vcombine.low %v5525_v14, %v1865_v15  ;;  %v1874_v32 = vcombine.high %v5525_v14, %v1865_v15  ;;  %v1889_v57 = vcombine.low %v5532_v22, %v1872_v45  ;;  %v1890_v21 = vcombine.high %v5532_v22, %v1872_v45 }
 0x1e6   : > { %v1831_v28 = vrot.slane %v1823_v60, %v5404_v19  ;;  %v1838_v1 = vrot.slane %v1824_v11, %v5404_v19  ;;  %v3681_v42 = vcombine.low %v1815_v43, %v1822_v39  ;;  %v4753_v2 = vcombine.high %v1815_v43, %v1822_v39 }
 0x1e7   : > { %v1881_v60 = vrot.slane %v1873_v4, %v5404_v19  ;;  %v1888_v11 = vrot.slane %v1874_v32, %v5404_v19  ;;  %v1897_v43 = vrot.slane %v1889_v57, %v5404_v19  ;;  %v1904_v39 = vrot.slane %v1890_v21, %v5404_v19  ;;  %v1620_v57 = vpop.permute.xlu1 %1619 }
 0x1e8   : > { %v3688_v26 = vrot.slane %v3681_v42, %v5389_v6  ;;  %v3696_v18 = vrot.slane %v4753_v2, %v5389_v6  ;;  %v3697_v62 = vcombine.low %v1831_v28, %v1838_v1  ;;  %v4754_v38 = vcombine.high %v1831_v28, %v1838_v1 }
 0x1e9   : > { %v2320_v45 = vcombine.high %v1618_v13, %v6900_v49  ;;  %v3731_v42 = vcombine.low %v1881_v60, %v1888_v11  ;;  %v4755_v46 = vcombine.high %v1881_v60, %v1888_v11  ;;  %v3747_v2 = vcombine.low %v1897_v43, %v1904_v39 }
 0x1ea   : > { %v3704_v14 = vrot.slane %v3697_v62, %v5389_v6  ;;  %v3712_v15 = vrot.slane %v4754_v38, %v5389_v6  ;;  %v3713_v22 = vcombine.low %v3688_v26, %v3696_v18  ;;  %v4756_v48 = vcombine.high %v1897_v43, %v1904_v39 }
 0x1eb   : > { %v2327_v4 = vrot.slane %v1618_v13, %v5389_v6  ;;  %v2334_v32 = vrot.slane %v2320_v45, %v5389_v6  ;;  %v3738_v21 = vrot.slane %v3731_v42, %v5389_v6  ;;  %v3746_v62 = vrot.slane %v4755_v46, %v5389_v6 }
 0x1ec   : > { %v3720_v28 = vrot.slane %v3713_v22, %v5404_v19  ;;  %v3721_v1 = vcombine.low %v3704_v14, %v3712_v15  ;;  %v3754_v38 = vrot.slane %v3747_v2, %v5389_v6  ;;  %v3762_v18 = vrot.slane %v4756_v48, %v5389_v6 }
 0x1ed   : > { %v2335_v60 = vcombine.low %v5503_v16, %v2327_v4  ;;  %v2336_v11 = vcombine.high %v5503_v16, %v2327_v4  ;;  %v2351_v13 = vcombine.low %v5512_v10, %v2334_v32  ;;  %v3763_v43 = vcombine.low %v3738_v21, %v3746_v62 }
 0x1ee   : > { %v3728_v26 = vrot.slane %v3721_v1, %v5404_v19  ;;  %v3771_v39 = vcombine.low %v3754_v38, %v3762_v18  ;;  %v2352_v14 = vcombine.high %v5512_v10, %v2334_v32  ;;  %v2386_v46 = vcombine.high %v1620_v57, %v6900_v49 }
 0x1ef   : > { %v2343_v48 = vrot.slane %v2335_v60, %v5404_v19  ;;  %v2350_v45 = vrot.slane %v2336_v11, %v5404_v19  ;;  %v3770_v42 = vrot.slane %v3763_v43, %v5404_v19  ;;  %v2359_v16 = vrot.slane %v2351_v13, %v5404_v19 }
 0x1f0   : > { %v3729_v15 = vcombine.low %v3720_v28, %v3728_v26  ;;  %v3730_v22 = vcombine.high %v3720_v28, %v3728_v26  ;;  %v3778_v2 = vrot.slane %v3771_v39, %v5404_v19  ;;  %v2366_v1 = vrot.slane %v2352_v14, %v5404_v19 }
 0x1f1   : > { %v4081_v10 = vcombine.low %v2343_v48, %v2350_v45  ;;  %v4769_v28 = vcombine.high %v2343_v48, %v2350_v45  ;;  %v2393_v4 = vrot.slane %v1620_v57, %v5389_v6  ;;  %v2400_v32 = vrot.slane %v2386_v46, %v5389_v6  ;;  %v486_v46 = vpop.permute.xlu0 %485 }
 0x1f2   : > { %4384 = vst.msk [vmem:[%s5783_s28 + $0x10] sm:$0xff] %vm4381_vm0, %v3729_v15  ;;  %4400 = vst.msk [vmem:[%s5783_s28 + $0x90] sm:$0xff] %vm4381_vm0, %v3730_v22  ;;  %v3779_v21 = vcombine.low %v3770_v42, %v3778_v2  ;;  %v3780_v62 = vcombine.high %v3770_v42, %v3778_v2  ;;  %v4097_v38 = vcombine.low %v2359_v16, %v2366_v1 }
 0x1f3   : > { %v4770_v18 = vcombine.high %v2359_v16, %v2366_v1  ;;  %v4088_v26 = vrot.slane %v4081_v10, %v5389_v6  ;;  %v4096_v60 = vrot.slane %v4769_v28, %v5389_v6  ;;  %v2401_v11 = vcombine.low %v5539_v33, %v2393_v4 }
 0x1f4   : > { %v2402_v13 = vcombine.high %v5539_v33, %v2393_v4  ;;  %4385 = vst.msk [vmem:[%s5783_s28 + $0x18] sm:$0xff] %vm4381_vm0, %v3779_v21  ;;  %4401 = vst.msk [vmem:[%s5783_s28 + $0x98] sm:$0xff] %vm4381_vm0, %v3780_v62  ;;  %v4104_v57 = vrot.slane %v4097_v38, %v5389_v6  ;;  %v2417_v39 = vcombine.low %v5544_v63, %v2400_v32 }
 0x1f5   : > { %v4112_v43 = vrot.slane %v4770_v18, %v5389_v6  ;;  %v2418_v14 = vcombine.high %v5544_v63, %v2400_v32  ;;  %v769_v15 = vcombine.low %v5521_v24, %v5962_v29  ;;  %v4113_v22 = vcombine.low %v4088_v26, %v4096_v60  ;;  %v502_v34 = vpop.permute.xlu0 %501 }
 0x1f6   : > { %v2409_v48 = vrot.slane %v2401_v11, %v5404_v19  ;;  %v2416_v33 = vrot.slane %v2402_v13, %v5404_v19  ;;  %v770_v45 = vcombine.high %v5521_v24, %v5962_v29  ;;  %v2425_v2 = vrot.slane %v2417_v39, %v5404_v19 }
 0x1f7   : > { %v4121_v42 = vcombine.low %v4104_v57, %v4112_v43  ;;  %v2432_v16 = vrot.slane %v2418_v14, %v5404_v19  ;;  %v804_v63 = vcombine.high %v486_v46, %v6900_v49  ;;  %v811_v28 = vrot.slane %v486_v46, %v5389_v6 }
 0x1f8   : > { %v4131_v1 = vcombine.low %v2409_v48, %v2416_v33  ;;  %v4771_v10 = vcombine.high %v2409_v48, %v2416_v33  ;;  %v4120_v4 = vrot.slane %v4113_v22, %v5404_v19  ;;  %v761_v24 = vrot.slane %v753_v41, %v5404_v19 }
 0x1f9   : > { %v4128_v32 = vrot.slane %v4121_v42, %v5404_v19  ;;  %v4147_v21 = vcombine.low %v2425_v2, %v2432_v16  ;;  %v4772_v62 = vcombine.high %v2425_v2, %v2432_v16  ;;  %v768_v29 = vrot.slane %v754_v52, %v5404_v19 }
 0x1fa   : > { %v4138_v38 = vrot.slane %v4131_v1, %v5389_v6  ;;  %v4146_v18 = vrot.slane %v4771_v10, %v5389_v6  ;;  %v818_v43 = vrot.slane %v804_v63, %v5389_v6  ;;  %v819_v41 = vcombine.low %v5548_v12, %v811_v28 }
 0x1fb   : > { %v4129_v26 = vcombine.low %v4120_v4, %v4128_v32  ;;  %v4130_v60 = vcombine.high %v4120_v4, %v4128_v32  ;;  %v4154_v11 = vrot.slane %v4147_v21, %v5389_v6  ;;  %v4162_v13 = vrot.slane %v4772_v62, %v5389_v6 }
 0x1fc   : > { %v4163_v57 = vcombine.low %v4138_v38, %v4146_v18  ;;  %v820_v39 = vcombine.high %v5548_v12, %v811_v28  ;;  %v2817_v9 = vcombine.low %v5899_v50, %v5904_v0  ;;  %v2774_v52 = vrot.slane %v2767_v54, %v5389_v6 }
 0x1fd   : > { %4392 = vst.msk [vmem:[%s5783_s28 + $0x50] sm:$0xff] %vm4381_vm0, %v4129_v26  ;;  %4408 = vst.msk [vmem:[%s5783_s28 + $0xd0] sm:$0xff] %vm4381_vm0, %v4130_v60  ;;  %v4171_v53 = vcombine.low %v4154_v11, %v4162_v13  ;;  %v2782_v14 = vrot.slane %v4720_v56, %v5389_v6  ;;  %v4722_v12 = vcombine.high %v5899_v50, %v5904_v0  ;;  %v6921_v56 = vld [vmem:[#allocation13_spill] sm:$0xff]  ;;  %v6922_v11 = vld [vmem:[#allocation12_spill] sm:$0xff] }
 0x1fe   : > { %v6103_v46 = vrot.slane %v769_v15, %v5404_v19  ;;  %v6106_v22 = vrot.slane %v770_v45, %v5404_v19  ;;  %v2851_v48 = vcombine.low %v761_v24, %v768_v29  ;;  %v4170_v33 = vrot.slane %v4163_v57, %v5404_v19 }
 0x1ff   : > { %v4178_v42 = vrot.slane %v4171_v53, %v5404_v19  ;;  %v2783_v54 = vcombine.low %v5936_v58, %v5939_v36  ;;  %v2791_v2 = vcombine.low %v2774_v52, %v2782_v14  ;;  %v4723_v27 = vcombine.high %v761_v24, %v768_v29  ;;  %v488_v24 = vpop.permute.xlu1 %487 }
 0x200   : > { %v827_v50 = vrot.slane %v819_v41, %v5404_v19  ;;  %v834_v0 = vrot.slane %v820_v39, %v5404_v19  ;;  %v835_v15 = vcombine.low %v6921_v56, %v818_v43  ;;  %v2867_v58 = vcombine.low %v6103_v46, %v6106_v22 }
 0x201   : > { %v4179_v45 = vcombine.low %v4170_v33, %v4178_v42  ;;  %v4180_v16 = vcombine.high %v4170_v33, %v4178_v42  ;;  %v2790_v1 = vrot.slane %v2783_v54, %v5404_v19  ;;  %v2798_v10 = vrot.slane %v2791_v2, %v5404_v19 }
 0x202   : > { %v836_v36 = vcombine.high %v6921_v56, %v818_v43  ;;  %v1332_v63 = vcombine.high %v502_v34, %v6900_v49  ;;  %v1339_v28 = vrot.slane %v502_v34, %v5389_v6  ;;  %v6123_v4 = vrot.slane %v2851_v48, %v5389_v6 }
 0x203   : > { %v4724_v32 = vcombine.high %v6103_v46, %v6106_v22  ;;  %4393 = vst.msk [vmem:[%s5783_s28 + $0x58] sm:$0xff] %vm4381_vm0, %v4179_v45  ;;  %4409 = vst.msk [vmem:[%s5783_s28 + $0xd8] sm:$0xff] %vm4381_vm0, %v4180_v16  ;;  %v2800_v21 = vcombine.high %v2790_v1, %v2798_v10  ;;  %v2799_v62 = vcombine.low %v2790_v1, %v2798_v10  ;;  %v6923_v46 = vld [vmem:[#allocation16_spill] sm:$0xff]  ;;  %v1606_v16 = vpop.permute.xlu0 %1605 }
 0x204   : > { %v6132_v29 = vrot.slane %v4723_v27, %v5389_v6  ;;  %v6135_v38 = vrot.slane %v835_v15, %v5404_v19  ;;  %v2901_v18 = vcombine.low %v827_v50, %v834_v0  ;;  %v4725_v26 = vcombine.high %v827_v50, %v834_v0 }
 0x205   : > { %3534 = vxpose.xlu1.b32.cont [2/16] (narrow) %v2800_v21, 64  ;;  %3502 = vxpose.xlu0.b32.cont [2/16] (narrow) %v2799_v62, 64  ;;  %v1346_v60 = vrot.slane %v1332_v63, %v5389_v6  ;;  %v1347_v13 = vcombine.low %v6922_v11, %v1339_v28  ;;  %v1348_v57 = vcombine.high %v6922_v11, %v1339_v28 }
 0x206   : > { %v6141_v43 = vrot.slane %v836_v36, %v5404_v19  ;;  %v870_v41 = vcombine.high %v488_v24, %v6900_v49  ;;  %v2824_v39 = vrot.slane %v2817_v9, %v5389_v6  ;;  %v2832_v53 = vrot.slane %v4722_v12, %v5389_v6 }
 0x207   : > { %v6147_v52 = vrot.slane %v1347_v13, %v5404_v19  ;;  %v6150_v14 = vrot.slane %v1348_v57, %v5404_v19  ;;  %v1363_v22 = vcombine.low %v6923_v46, %v1346_v60  ;;  %v1364_v48 = vcombine.high %v6923_v46, %v1346_v60  ;;  %v6926_v57 = vld [vmem:[#allocation21_spill] sm:$0xff]  ;;  %v6927_v46 = vld [vmem:[#allocation14_spill] sm:$0xff] }
 0x208   : > { %v6924_v33 = vcombine.low %v5923_v30, %v5926_v44  ;;  %v6925_v9 = vcombine.high %v5923_v30, %v5926_v44  ;;  %v6167_v54 = vrot.slane %v2901_v18, %v5389_v6  ;;  %v6170_v2 = vrot.slane %v4725_v26, %v5389_v6  ;;  %v504_v44 = vpop.permute.xlu1 %503 }
 0x209   : > { %v6173_v34 = vrot.slane %v1363_v22, %v5404_v19  ;;  %v6176_v27 = vrot.slane %v1364_v48, %v5404_v19  ;;  %v3301_v50 = vcombine.low %v6147_v52, %v6150_v14  ;;  %v2917_v0 = vcombine.low %v6135_v38, %v6141_v43 }
 0x20a   : > { %v6158_v42 = vrot.slane %v6924_v33, %v5389_v6  ;;  %v6164_v12 = vrot.slane %v6925_v9, %v5389_v6  ;;  %v4726_v56 = vcombine.high %v6135_v38, %v6141_v43  ;;  %v2833_v15 = vcombine.low %v5909_v55, %v5931_v7 }
 0x20b   : > { %v2841_v45 = vcombine.low %v2824_v39, %v2832_v53  ;;  %v6189_v1 = vrot.slane %v488_v24, %v5389_v6  ;;  %v6192_v10 = vrot.slane %v870_v41, %v5389_v6  ;;  %v1398_v55 = vcombine.high %v504_v44, %v6900_v49 }
 0x20c   : > { %v2840_v28 = vrot.slane %v2833_v15, %v5404_v19  ;;  %v1405_v7 = vrot.slane %v504_v44, %v5389_v6  ;;  %v1924_v62 = vcombine.high %v1606_v16, %v6900_v49  ;;  %v1931_v24 = vrot.slane %v1606_v16, %v5389_v6  ;;  %v6929_v16 = vld [vmem:[#allocation15_spill] sm:$0xff] }
 0x20d   : > { %v2848_v21 = vrot.slane %v2841_v45, %v5404_v19  ;;  %v2874_v18 = vrot.slane %v2867_v58, %v5389_v6  ;;  %v2882_v26 = vrot.slane %v4724_v32, %v5389_v6  ;;  %v1412_v13 = vrot.slane %v1398_v55, %v5389_v6  ;;  %v6928_v32 = vld [vmem:[#allocation24_spill] sm:$0xff] }
 0x20e   : > { %v1413_v41 = vcombine.low %v6926_v57, %v1405_v7  ;;  %v1414_v39 = vcombine.high %v6926_v57, %v1405_v7  ;;  %v1938_v53 = vrot.slane %v1924_v62, %v5389_v6  ;;  %v1939_v22 = vcombine.low %v6927_v46, %v1931_v24 }
 0x20f   : > { %v2850_v60 = vcombine.high %v2840_v28, %v2848_v21  ;;  %v2849_v11 = vcombine.low %v2840_v28, %v2848_v21  ;;  %v1940_v48 = vcombine.high %v6927_v46, %v1931_v24  ;;  %v1429_v33 = vcombine.low %v6928_v32, %v1412_v13  ;;  %v1608_v46 = vpop.permute.xlu1 %1607 }
 0x210   : > { %v6213_v58 = vrot.slane %v1413_v41, %v5404_v19  ;;  %v1430_v9 = vcombine.high %v6928_v32, %v1412_v13  ;;  %v6218_v44 = vrot.slane %v1414_v39, %v5404_v19  ;;  %v1947_v15 = vrot.slane %v1939_v22, %v5404_v19 }
 0x211   : > { %3535 = vxpose.xlu1.b32.cont [3/16] (narrow) %v2850_v60, 64  ;;  %3503 = vxpose.xlu0.b32.cont [3/16] (narrow) %v2849_v11, 64  ;;  %v1954_v45 = vrot.slane %v1940_v48, %v5404_v19  ;;  %v1955_v28 = vcombine.low %v6929_v16, %v1938_v53  ;;  %v6224_v21 = vrot.slane %v1429_v33, %v5404_v19  ;;  %v6931_v60 = vld [vmem:[#allocation22_spill] sm:$0xff] }
 0x212   : > { %v6227_v55 = vrot.slane %v1430_v9, %v5404_v19  ;;  %v1956_v7 = vcombine.high %v6929_v16, %v1938_v53  ;;  %v2883_v62 = vcombine.low %v6123_v4, %v6132_v29  ;;  %v1622_v4 = vpop.permute.xlu0 %1621  ;;  %v6930_v29 = vld [vmem:[#allocation18_spill] sm:$0xff]  ;;  %v2891_v41 = vcombine.low %v2874_v18, %v2882_v26 }
 0x213   : > { %v1963_v11 = vrot.slane %v1955_v28, %v5404_v19  ;;  %v3781_v13 = vcombine.low %v1947_v15, %v1954_v45  ;;  %v4757_v53 = vcombine.high %v1947_v15, %v1954_v45  ;;  %v885_v22 = vcombine.low %v6930_v29, %v6189_v1 }
 0x214   : > { %v1970_v39 = vrot.slane %v1956_v7, %v5404_v19  ;;  %v886_v48 = vcombine.high %v6930_v29, %v6189_v1  ;;  %v2890_v33 = vrot.slane %v2883_v62, %v5404_v19  ;;  %v1990_v7 = vcombine.high %v1608_v46, %v6900_v49 }
 0x215   : > { %v3788_v32 = vrot.slane %v3781_v13, %v5389_v6  ;;  %v3796_v9 = vrot.slane %v4757_v53, %v5389_v6  ;;  %v1997_v15 = vrot.slane %v1608_v46, %v5389_v6  ;;  %v2452_v45 = vcombine.high %v1622_v4, %v6900_v49 }
 0x216   : > { %v3797_v16 = vcombine.low %v1963_v11, %v1970_v39  ;;  %v4758_v28 = vcombine.high %v1963_v11, %v1970_v39  ;;  %v2459_v57 = vrot.slane %v1622_v4, %v5389_v6  ;;  %v2898_v62 = vrot.slane %v2891_v41, %v5404_v19 }
 0x217   : > { %v3813_v13 = vcombine.low %v3788_v32, %v3796_v9  ;;  %v2004_v53 = vrot.slane %v1990_v7, %v5389_v6  ;;  %v2005_v11 = vcombine.low %v6931_v60, %v1997_v15  ;;  %v2006_v18 = vcombine.high %v6931_v60, %v1997_v15  ;;  %v6932_v32 = vld [vmem:[#allocation23_spill] sm:$0xff]  ;;  %v6933_v60 = vld [vmem:[#allocation17_spill] sm:$0xff] }
 0x218   : > { %v3804_v63 = vrot.slane %v3797_v16, %v5389_v6  ;;  %v3812_v36 = vrot.slane %v4758_v28, %v5389_v6  ;;  %v2466_v26 = vrot.slane %v2452_v45, %v5389_v6  ;;  %v2900_v24 = vcombine.high %v2890_v33, %v2898_v62 }
 0x219   : > { %v3820_v39 = vrot.slane %v3813_v13, %v5404_v19  ;;  %v2899_v4 = vcombine.low %v2890_v33, %v2898_v62  ;;  %v2013_v16 = vrot.slane %v2005_v11, %v5404_v19  ;;  %v2020_v28 = vrot.slane %v2006_v18, %v5404_v19 }
 0x21a   : > { %v3821_v46 = vcombine.low %v3804_v63, %v3812_v36  ;;  %v2021_v9 = vcombine.low %v6932_v32, %v2004_v53  ;;  %v2022_v41 = vcombine.high %v6932_v32, %v2004_v53  ;;  %3536 = vxpose.xlu1.b32.cont [4/16] (narrow) %v2900_v24, 64  ;;  %v2467_v15 = vcombine.low %v6933_v60, %v2459_v57  ;;  %v1624_v24 = vpop.permute.xlu1 %1623 }
 0x21b   : > { %3504 = vxpose.xlu0.b32.cont [4/16] (narrow) %v2899_v4, 64  ;;  %v2468_v36 = vcombine.high %v6933_v60, %v2459_v57  ;;  %v3831_v45 = vcombine.low %v2013_v16, %v2020_v28  ;;  %v4759_v13 = vcombine.high %v2013_v16, %v2020_v28  ;;  %v6934_v57 = vld [vmem:[#allocation19_spill] sm:$0xff] }
 0x21c   : > { %v3828_v7 = vrot.slane %v3821_v46, %v5404_v19  ;;  %v2029_v63 = vrot.slane %v2021_v9, %v5404_v19  ;;  %v2036_v33 = vrot.slane %v2022_v41, %v5404_v19  ;;  %v2475_v53 = vrot.slane %v2467_v15, %v5404_v19 }
 0x21d   : > { %v2482_v18 = vrot.slane %v2468_v36, %v5404_v19  ;;  %v3838_v46 = vrot.slane %v3831_v45, %v5389_v6  ;;  %v3846_v4 = vrot.slane %v4759_v13, %v5389_v6  ;;  %v2483_v9 = vcombine.low %v6934_v57, %v2466_v26  ;;  %v6935_v13 = vld [vmem:[#allocation20_spill] sm:$0xff] }
 0x21e   : > { %v3829_v62 = vcombine.low %v3820_v39, %v3828_v7  ;;  %v3830_v11 = vcombine.high %v3820_v39, %v3828_v7  ;;  %v3847_v32 = vcombine.low %v2029_v63, %v2036_v33  ;;  %v4760_v30 = vcombine.high %v2029_v63, %v2036_v33 }
 0x21f   : > { %v2484_v16 = vcombine.high %v6934_v57, %v2466_v26  ;;  %v4181_v39 = vcombine.low %v2475_v53, %v2482_v18  ;;  %v4773_v28 = vcombine.high %v2475_v53, %v2482_v18  ;;  %v3863_v60 = vcombine.low %v3838_v46, %v3846_v4  ;;  %v6936_v57 = vld [vmem:[#allocation25_spill] sm:$0xff] }
 0x220   : > { %4386 = vst.msk [vmem:[%s5783_s28 + $0x20] sm:$0xff] %vm4381_vm0, %v3829_v62  ;;  %4402 = vst.msk [vmem:[%s5783_s28 + $0xa0] sm:$0xff] %vm4381_vm0, %v3830_v11  ;;  %v3854_v41 = vrot.slane %v3847_v32, %v5389_v6  ;;  %v3862_v7 = vrot.slane %v4760_v30, %v5389_v6  ;;  %v2518_v15 = vcombine.high %v1624_v24, %v6900_v49 }
 0x221   : > { %v2491_v36 = vrot.slane %v2483_v9, %v5404_v19  ;;  %v2498_v63 = vrot.slane %v2484_v16, %v5404_v19  ;;  %v4188_v33 = vrot.slane %v4181_v39, %v5389_v6  ;;  %v4196_v45 = vrot.slane %v4773_v28, %v5389_v6  ;;  %v6937_v39 = vld [vmem:[#allocation26_spill] sm:$0xff] }
 0x222   : > { %v901_v26 = vcombine.low %v6935_v13, %v6192_v10  ;;  %v3871_v62 = vcombine.low %v3854_v41, %v3862_v7  ;;  %v2525_v11 = vrot.slane %v1624_v24, %v5389_v6  ;;  %v2532_v53 = vrot.slane %v2518_v15, %v5389_v6 }
 0x223   : > { %v902_v30 = vcombine.high %v6935_v13, %v6192_v10  ;;  %v3870_v18 = vrot.slane %v3863_v60, %v5404_v19  ;;  %v4197_v46 = vcombine.low %v2491_v36, %v2498_v63  ;;  %v4774_v4 = vcombine.high %v2491_v36, %v2498_v63  ;;  %v490_v60 = vpop.permute.xlu0 %489 }
 0x224   : > { %v3878_v32 = vrot.slane %v3871_v62, %v5404_v19  ;;  %v2533_v9 = vcombine.low %v6936_v57, %v2525_v11  ;;  %v2534_v16 = vcombine.high %v6936_v57, %v2525_v11  ;;  %v2549_v28 = vcombine.low %v6937_v39, %v2532_v53 }
 0x225   : > { %v4204_v24 = vrot.slane %v4197_v46, %v5389_v6  ;;  %v4212_v41 = vrot.slane %v4774_v4, %v5389_v6  ;;  %v4213_v7 = vcombine.low %v4188_v33, %v4196_v45  ;;  %v2550_v10 = vcombine.high %v6937_v39, %v2532_v53 }
 0x226   : > { %v3879_v15 = vcombine.low %v3870_v18, %v3878_v32  ;;  %v3880_v36 = vcombine.high %v3870_v18, %v3878_v32  ;;  %v2541_v63 = vrot.slane %v2533_v9, %v5404_v19  ;;  %v2548_v13 = vrot.slane %v2534_v16, %v5404_v19 }
 0x227   : > { %v893_v62 = vrot.slane %v885_v22, %v5404_v19  ;;  %v4221_v11 = vcombine.low %v4204_v24, %v4212_v41  ;;  %v2557_v46 = vrot.slane %v2549_v28, %v5404_v19  ;;  %v2564_v4 = vrot.slane %v2550_v10, %v5404_v19 }
 0x228   : > { %v900_v33 = vrot.slane %v886_v48, %v5404_v19  ;;  %4387 = vst.msk [vmem:[%s5783_s28 + $0x28] sm:$0xff] %vm4381_vm0, %v3879_v15  ;;  %4403 = vst.msk [vmem:[%s5783_s28 + $0xa8] sm:$0xff] %vm4381_vm0, %v3880_v36  ;;  %v4231_v45 = vcombine.low %v2541_v63, %v2548_v13  ;;  %v4775_v53 = vcombine.high %v2541_v63, %v2548_v13  ;;  %v6939_v36 = vld [vmem:[#allocation27_spill] sm:$0xff]  ;;  %v492_v13 = vpop.permute.xlu1 %491 }
 0x229   : > { %v943_v18 = vrot.slane %v490_v60, %v5389_v6  ;;  %v4220_v22 = vrot.slane %v4213_v7, %v5404_v19  ;;  %v4228_v32 = vrot.slane %v4221_v11, %v5404_v19  ;;  %v4247_v57 = vcombine.low %v2557_v46, %v2564_v4 }
 0x22a   : > { %v4776_v9 = vcombine.high %v2557_v46, %v2564_v4  ;;  %v4238_v16 = vrot.slane %v4231_v45, %v5389_v6  ;;  %v4246_v1 = vrot.slane %v4775_v53, %v5389_v6  ;;  %v936_v29 = vcombine.high %v490_v60, %v6900_v49 }
 0x22b   : > { %v2924_v48 = vrot.slane %v2917_v0, %v5389_v6  ;;  %v4229_v39 = vcombine.low %v4220_v22, %v4228_v32  ;;  %v4230_v28 = vcombine.high %v4220_v22, %v4228_v32  ;;  %v4254_v24 = vrot.slane %v4247_v57, %v5389_v6 }
 0x22c   : > { %v4262_v41 = vrot.slane %v4776_v9, %v5389_v6  ;;  %v6938_v7 = vcombine.low %v5972_v51, %v5976_v37  ;;  %v4263_v15 = vcombine.low %v4238_v16, %v4246_v1  ;;  %v951_v60 = vcombine.low %v6939_v36, %v943_v18  ;;  %v506_v1 = vpop.permute.xlu0 %505 }
 0x22d   : > { %v952_v63 = vcombine.high %v6939_v36, %v943_v18  ;;  %v6940_v0 = vcombine.high %v5972_v51, %v5976_v37  ;;  %4394 = vst.msk [vmem:[%s5783_s28 + $0x60] sm:$0xff] %vm4381_vm0, %v4229_v39  ;;  %4410 = vst.msk [vmem:[%s5783_s28 + $0xe0] sm:$0xff] %vm4381_vm0, %v4230_v28  ;;  %v2932_v4 = vrot.slane %v4726_v56, %v5389_v6  ;;  %v6941_v39 = vld [vmem:[#allocation29_spill] sm:$0xff] }
 0x22e   : > { %v6333_v10 = vrot.slane %v6938_v7, %v5389_v6  ;;  %v4271_v46 = vcombine.low %v4254_v24, %v4262_v41  ;;  %v2933_v45 = vcombine.low %v6167_v54, %v6170_v2  ;;  %v909_v53 = vrot.slane %v901_v26, %v5404_v19 }
 0x22f   : > { %v6341_v11 = vrot.slane %v6940_v0, %v5389_v6  ;;  %v916_v18 = vrot.slane %v902_v30, %v5404_v19  ;;  %v2951_v51 = vcombine.low %v893_v62, %v900_v33  ;;  %v950_v37 = vrot.slane %v936_v29, %v5389_v6  ;;  %v6942_v0 = vld [vmem:[#allocation34_spill] sm:$0xff] }
 0x230   : > { %v4270_v22 = vrot.slane %v4263_v15, %v5404_v19  ;;  %v4278_v32 = vrot.slane %v4271_v46, %v5404_v19  ;;  %v2941_v57 = vcombine.low %v2924_v48, %v2932_v4  ;;  %v1002_v9 = vcombine.high %v492_v13, %v6900_v49 }
 0x231   : > { %v4727_v38 = vcombine.high %v893_v62, %v900_v33  ;;  %v959_v43 = vrot.slane %v951_v60, %v5404_v19  ;;  %v966_v54 = vrot.slane %v952_v63, %v5404_v19  ;;  %v2940_v2 = vrot.slane %v2933_v45, %v5404_v19 }
 0x232   : > { %v4279_v56 = vcombine.low %v4270_v22, %v4278_v32  ;;  %v4280_v26 = vcombine.high %v4270_v22, %v4278_v32  ;;  %v2948_v30 = vrot.slane %v2941_v57, %v5404_v19  ;;  %v1009_v16 = vrot.slane %v492_v13, %v5389_v6 }
 0x233   : > { %v2967_v29 = vcombine.low %v909_v53, %v916_v18  ;;  %v4728_v48 = vcombine.high %v909_v53, %v916_v18  ;;  %v967_v28 = vcombine.low %v6941_v39, %v950_v37  ;;  %v968_v24 = vcombine.high %v6941_v39, %v950_v37  ;;  %v508_v37 = vpop.permute.xlu1 %507 }
 0x234   : > { %v2958_v62 = vrot.slane %v2951_v51, %v5389_v6  ;;  %4395 = vst.msk [vmem:[%s5783_s28 + $0x68] sm:$0xff] %vm4381_vm0, %v4279_v56  ;;  %4411 = vst.msk [vmem:[%s5783_s28 + $0xe8] sm:$0xff] %vm4381_vm0, %v4280_v26  ;;  %v2950_v33 = vcombine.high %v2940_v2, %v2948_v30  ;;  %v2949_v41 = vcombine.low %v2940_v2, %v2948_v30 }
 0x235   : > { %v1016_v7 = vrot.slane %v1002_v9, %v5389_v6  ;;  %v2966_v15 = vrot.slane %v4727_v38, %v5389_v6  ;;  %v3001_v36 = vcombine.low %v959_v43, %v966_v54  ;;  %v1464_v60 = vcombine.high %v506_v1, %v6900_v49  ;;  %v6945_v9 = vld [vmem:[#allocation36_spill] sm:$0xff] }
 0x236   : > { %v1471_v63 = vrot.slane %v506_v1, %v5389_v6  ;;  %v4729_v13 = vcombine.high %v959_v43, %v966_v54  ;;  %3537 = vxpose.xlu1.b32.cont [5/16] (narrow) %v2950_v33, 64  ;;  %3505 = vxpose.xlu0.b32.cont [5/16] (narrow) %v2949_v41, 64  ;;  %v1017_v46 = vcombine.low %v6942_v0, %v1009_v16 }
 0x237   : > { %v1018_v4 = vcombine.high %v6942_v0, %v1009_v16  ;;  %v6381_v45 = vrot.slane %v3301_v50, %v5389_v6  ;;  %v6384_v53 = vrot.slane %v967_v28, %v5404_v19  ;;  %v6387_v18 = vrot.slane %v968_v24, %v5404_v19  ;;  %v1610_v24 = vpop.permute.xlu0 %1609 }
 0x238   : > { %v2974_v51 = vrot.slane %v2967_v29, %v5389_v6  ;;  %v6943_v22 = vcombine.high %v6147_v52, %v6150_v14  ;;  %v6944_v50 = vcombine.low %v6213_v58, %v6218_v44  ;;  %v1033_v38 = vcombine.low %v6945_v9, %v1016_v7  ;;  %v6947_v14 = vld [vmem:[#allocation28_spill] sm:$0xff] }
 0x239   : > { %v1034_v43 = vcombine.high %v6945_v9, %v1016_v7  ;;  %v6946_v54 = vcombine.high %v6213_v58, %v6218_v44  ;;  %v1478_v52 = vrot.slane %v1464_v60, %v5389_v6  ;;  %v1479_v56 = vcombine.low %v6947_v14, %v1471_v63  ;;  %v6948_v60 = vld [vmem:[#allocation31_spill] sm:$0xff]  ;;  %v6951_v58 = vld [vmem:[#allocation32_spill] sm:$0xff] }
 0x23a   : > { %v6394_v32 = vrot.slane %v6943_v22, %v5389_v6  ;;  %v6400_v57 = vrot.slane %v6944_v50, %v5389_v6  ;;  %v2982_v26 = vrot.slane %v4728_v48, %v5389_v6  ;;  %v6414_v30 = vrot.slane %v3001_v36, %v5389_v6 }
 0x23b   : > { %v6408_v2 = vrot.slane %v6946_v54, %v5389_v6  ;;  %v6417_v16 = vrot.slane %v4729_v13, %v5389_v6  ;;  %v1025_v1 = vrot.slane %v1017_v46, %v5404_v19  ;;  %v1032_v29 = vrot.slane %v1018_v4, %v5404_v19 }
 0x23c   : > { %v1480_v44 = vcombine.high %v6947_v14, %v1471_v63  ;;  %v2983_v39 = vcombine.low %v2958_v62, %v2966_v15  ;;  %v2991_v28 = vcombine.low %v2974_v51, %v2982_v26  ;;  %v6427_v33 = vrot.slane %v1033_v38, %v5404_v19  ;;  %v1612_v63 = vpop.permute.xlu1 %1611 }
 0x23d   : > { %v6430_v41 = vrot.slane %v1034_v43, %v5404_v19  ;;  %v1530_v7 = vcombine.high %v508_v37, %v6900_v49  ;;  %v6434_v36 = vrot.slane %v1479_v56, %v5404_v19  ;;  %v1495_v13 = vcombine.low %v6948_v60, %v1478_v52  ;;  %v6949_v56 = vld [vmem:[#allocation30_spill] sm:$0xff] }
 0x23e   : > { %v2990_v62 = vrot.slane %v2983_v39, %v5404_v19  ;;  %v2998_v15 = vrot.slane %v2991_v28, %v5404_v19  ;;  %v3051_v0 = vcombine.low %v1025_v1, %v1032_v29  ;;  %v4731_v46 = vcombine.high %v1025_v1, %v1032_v29 }
 0x23f   : > { %v2056_v4 = vcombine.high %v1610_v24, %v6900_v49  ;;  %v2063_v51 = vrot.slane %v1610_v24, %v5389_v6  ;;  %v6442_v22 = vrot.slane %v1480_v44, %v5404_v19  ;;  %v1496_v50 = vcombine.high %v6948_v60, %v1478_v52  ;;  %v6950_v24 = vld [vmem:[#allocation33_spill] sm:$0xff] }
 0x240   : > { %v3000_v9 = vcombine.high %v2990_v62, %v2998_v15  ;;  %v2999_v38 = vcombine.low %v2990_v62, %v2998_v15  ;;  %v6448_v54 = vrot.slane %v1530_v7, %v5389_v6  ;;  %v6455_v29 = vrot.slane %v1495_v13, %v5404_v19 }
 0x241   : > { %v2070_v14 = vrot.slane %v2056_v4, %v5389_v6  ;;  %v2071_v26 = vcombine.low %v6949_v56, %v2063_v51  ;;  %v2072_v52 = vcombine.high %v6949_v56, %v2063_v51  ;;  %v6459_v44 = vrot.slane %v3051_v0, %v5389_v6  ;;  %v1626_v4 = vpop.permute.xlu0 %1625  ;;  %v1628_v0 = vpop.permute.xlu1 %1627 }
 0x242   : > { %3538 = vxpose.xlu1.b32.cont [6/16] (narrow) %v3000_v9, 64  ;;  %3506 = vxpose.xlu0.b32.cont [6/16] (narrow) %v2999_v38, 64  ;;  %v6462_v39 = vrot.slane %v4731_v46, %v5389_v6  ;;  %v6467_v60 = vrot.slane %v1496_v50, %v5404_v19  ;;  %v6470_v13 = vrot.slane %v508_v37, %v5389_v6 }
 0x243   : > { %v2079_v28 = vrot.slane %v2071_v26, %v5404_v19  ;;  %v2087_v7 = vcombine.low %v6950_v24, %v2070_v14  ;;  %v2086_v62 = vrot.slane %v2072_v52, %v5404_v19  ;;  %v2088_v15 = vcombine.high %v6950_v24, %v2070_v14 }
 0x244   : > { %v2122_v50 = vcombine.high %v1612_v63, %v6900_v49  ;;  %v2129_v26 = vrot.slane %v1612_v63, %v5389_v6  ;;  %v2584_v52 = vcombine.high %v1626_v4, %v6900_v49  ;;  %v2591_v24 = vrot.slane %v1626_v4, %v5389_v6 }
 0x245   : > { %v2095_v9 = vrot.slane %v2087_v7, %v5404_v19  ;;  %v2102_v38 = vrot.slane %v2088_v15, %v5404_v19  ;;  %v3881_v37 = vcombine.low %v2079_v28, %v2086_v62  ;;  %v4761_v56 = vcombine.high %v2079_v28, %v2086_v62 }
 0x246   : > { %v2136_v14 = vrot.slane %v2122_v50, %v5389_v6  ;;  %v2650_v46 = vcombine.high %v1628_v0, %v6900_v49  ;;  %v2137_v15 = vcombine.low %v5826_v61, %v2129_v26  ;;  %v2138_v28 = vcombine.high %v5826_v61, %v2129_v26 }
 0x247   : > { %v3888_v51 = vrot.slane %v3881_v37, %v5389_v6  ;;  %v3896_v7 = vrot.slane %v4761_v56, %v5389_v6  ;;  %v3897_v1 = vcombine.low %v2095_v9, %v2102_v38  ;;  %v4762_v43 = vcombine.high %v2095_v9, %v2102_v38 }
 0x248   : > { %v2153_v63 = vcombine.low %v5854_v23, %v2136_v14  ;;  %v2154_v62 = vcombine.high %v5854_v23, %v2136_v14  ;;  %v2598_v49 = vrot.slane %v2584_v52, %v5389_v6  ;;  %v2145_v37 = vrot.slane %v2137_v15, %v5404_v19 }
 0x249   : > { %v3904_v50 = vrot.slane %v3897_v1, %v5389_v6  ;;  %v3912_v4 = vrot.slane %v4762_v43, %v5389_v6  ;;  %v3913_v48 = vcombine.low %v3888_v51, %v3896_v7  ;;  %v2152_v56 = vrot.slane %v2138_v28, %v5404_v19 }
 0x24a   : > { %v2161_v9 = vrot.slane %v2153_v63, %v5404_v19  ;;  %v2168_v38 = vrot.slane %v2154_v62, %v5404_v19  ;;  %v2599_v23 = vcombine.low %v6951_v58, %v2591_v24  ;;  %v2600_v1 = vcombine.high %v6951_v58, %v2591_v24  ;;  %v6952_v63 = vld [vmem:[#allocation35_spill] sm:$0xff] }
 0x24b   : > { %v3920_v61 = vrot.slane %v3913_v48, %v5404_v19  ;;  %v3921_v26 = vcombine.low %v3904_v50, %v3912_v4  ;;  %v3931_v14 = vcombine.low %v2145_v37, %v2152_v56  ;;  %v4763_v43 = vcombine.high %v2145_v37, %v2152_v56 }
 0x24c   : > { %v3947_v51 = vcombine.low %v2161_v9, %v2168_v38  ;;  %v4764_v7 = vcombine.high %v2161_v9, %v2168_v38  ;;  %v2607_v15 = vrot.slane %v2599_v23, %v5404_v19  ;;  %v2614_v28 = vrot.slane %v2600_v1, %v5404_v19 }
 0x24d   : > { %v3928_v52 = vrot.slane %v3921_v26, %v5404_v19  ;;  %v2615_v62 = vcombine.low %v6952_v63, %v2598_v49  ;;  %v3938_v48 = vrot.slane %v3931_v14, %v5389_v6  ;;  %v3946_v50 = vrot.slane %v4763_v43, %v5389_v6 }
 0x24e   : > { %v3954_v58 = vrot.slane %v3947_v51, %v5389_v6  ;;  %v3962_v24 = vrot.slane %v4764_v7, %v5389_v6  ;;  %v2616_v56 = vcombine.high %v6952_v63, %v2598_v49  ;;  %v4281_v23 = vcombine.low %v2607_v15, %v2614_v28 }
 0x24f   : > { %v3929_v4 = vcombine.low %v3920_v61, %v3928_v52  ;;  %v3930_v37 = vcombine.high %v3920_v61, %v3928_v52  ;;  %v2623_v9 = vrot.slane %v2615_v62, %v5404_v19  ;;  %v3963_v38 = vcombine.low %v3938_v48, %v3946_v50 }
 0x250   : > { %v3971_v26 = vcombine.low %v3954_v58, %v3962_v24  ;;  %v4777_v1 = vcombine.high %v2607_v15, %v2614_v28  ;;  %v2630_v14 = vrot.slane %v2616_v56, %v5404_v19  ;;  %v2657_v43 = vrot.slane %v1628_v0, %v5389_v6 }
 0x251   : > { %4388 = vst.msk [vmem:[%s5783_s28 + $0x30] sm:$0xff] %vm4381_vm0, %v3929_v4  ;;  %4404 = vst.msk [vmem:[%s5783_s28 + $0xb0] sm:$0xff] %vm4381_vm0, %v3930_v37  ;;  %v2664_v51 = vrot.slane %v2650_v46, %v5389_v6  ;;  %v6953_v49 = vcombine.low %v6384_v53, %v6387_v18  ;;  %v3970_v7 = vrot.slane %v3963_v38, %v5404_v19 }
 0x252   : > { %v3978_v52 = vrot.slane %v3971_v26, %v5404_v19  ;;  %v4288_v15 = vrot.slane %v4281_v23, %v5389_v6  ;;  %v4296_v28 = vrot.slane %v4777_v1, %v5389_v6  ;;  %v4297_v63 = vcombine.low %v2623_v9, %v2630_v14 }
 0x253   : > { %v3024_v61 = vrot.slane %v6953_v49, %v5389_v6  ;;  %v4778_v62 = vcombine.high %v2623_v9, %v2630_v14  ;;  %v2665_v0 = vcombine.low %v5858_v47, %v2657_v43  ;;  %v2666_v46 = vcombine.high %v5858_v47, %v2657_v43 }
 0x254   : > { %v3979_v48 = vcombine.low %v3970_v7, %v3978_v52  ;;  %v3980_v50 = vcombine.high %v3970_v7, %v3978_v52  ;;  %v4313_v58 = vcombine.low %v4288_v15, %v4296_v28  ;;  %v2681_v24 = vcombine.low %v5863_v17, %v2664_v51 }
 0x255   : > { %v4304_v4 = vrot.slane %v4297_v63, %v5389_v6  ;;  %v4312_v37 = vrot.slane %v4778_v62, %v5389_v6  ;;  %v2673_v56 = vrot.slane %v2665_v0, %v5404_v19  ;;  %v2680_v38 = vrot.slane %v2666_v46, %v5404_v19 }
 0x256   : > { %4389 = vst.msk [vmem:[%s5783_s28 + $0x38] sm:$0xff] %vm4381_vm0, %v3979_v48  ;;  %4405 = vst.msk [vmem:[%s5783_s28 + $0xb8] sm:$0xff] %vm4381_vm0, %v3980_v50  ;;  %v4320_v9 = vrot.slane %v4313_v58, %v5404_v19  ;;  %v2682_v47 = vcombine.high %v5863_v17, %v2664_v51  ;;  %v2689_v26 = vrot.slane %v2681_v24, %v5404_v19 }
 0x257   : > { %v6954_v23 = vcombine.high %v6384_v53, %v6387_v18  ;;  %v4321_v14 = vcombine.low %v4304_v4, %v4312_v37  ;;  %v4331_v43 = vcombine.low %v2673_v56, %v2680_v38  ;;  %v4779_v49 = vcombine.high %v2673_v56, %v2680_v38 }
 0x258   : > { %v3033_v7 = vcombine.low %v6414_v30, %v6417_v16  ;;  %v2696_v52 = vrot.slane %v2682_v47, %v5404_v19  ;;  %v6955_v17 = vcombine.low %v6427_v33, %v6430_v41  ;;  %v6956_v28 = vcombine.high %v6427_v33, %v6430_v41 }
 0x259   : > { %v3032_v1 = vrot.slane %v6954_v23, %v5389_v6  ;;  %v4328_v18 = vrot.slane %v4321_v14, %v5404_v19  ;;  %v4338_v63 = vrot.slane %v4331_v43, %v5389_v6  ;;  %v4346_v30 = vrot.slane %v4779_v49, %v5389_v6 }
 0x25a   : > { %v3074_v51 = vrot.slane %v6955_v17, %v5389_v6  ;;  %v3082_v53 = vrot.slane %v6956_v28, %v5389_v6  ;;  %v3040_v16 = vrot.slane %v3033_v7, %v5404_v19  ;;  %v4780_v62 = vcombine.high %v2689_v26, %v2696_v52 }
 0x25b   : > { %v3041_v15 = vcombine.low %v3024_v61, %v3032_v1  ;;  %v4347_v61 = vcombine.low %v2689_v26, %v2696_v52  ;;  %v3083_v46 = vcombine.low %v6459_v44, %v6462_v39  ;;  %v4329_v48 = vcombine.low %v4320_v9, %v4328_v18  ;;  %v6957_v39 = vld [vmem:[#allocation40_spill] sm:$0xff]  ;;  %v6961_v52 = vld [vmem:[#allocation38_spill] sm:$0xff] }
 0x25c   : > { %v4330_v33 = vcombine.high %v4320_v9, %v4328_v18  ;;  %v4363_v41 = vcombine.low %v4338_v63, %v4346_v30  ;;  %v3091_v50 = vcombine.low %v3074_v51, %v3082_v53  ;;  %v4362_v24 = vrot.slane %v4780_v62, %v5389_v6  ;;  %v6958_v9 = vld [vmem:[#allocation41_spill] sm:$0xff] }
 0x25d   : > { %v3048_v0 = vrot.slane %v3041_v15, %v5404_v19  ;;  %v4354_v58 = vrot.slane %v4347_v61, %v5389_v6  ;;  %4396 = vst.msk [vmem:[%s5783_s28 + $0x70] sm:$0xff] %vm4381_vm0, %v4329_v48  ;;  %v3090_v38 = vrot.slane %v3083_v46, %v5404_v19  ;;  %v6959_v47 = vcombine.low %v6957_v39, %v6958_v9  ;;  %v6962_v15 = vld [vmem:[#allocation39_spill] sm:$0xff] }
 0x25e   : > { %4412 = vst.msk [vmem:[%s5783_s28 + $0xf0] sm:$0xff] %vm4381_vm0, %v4330_v33  ;;  %v4370_v56 = vrot.slane %v4363_v41, %v5404_v19  ;;  %v3098_v44 = vrot.slane %v3091_v50, %v5404_v19  ;;  %v6960_v1 = vcombine.high %v6957_v39, %v6958_v9  ;;  %v3133_v43 = vcombine.low %v5890_v3, %v5896_v8 }
 0x25f   : > { %v3050_v4 = vcombine.high %v3040_v16, %v3048_v0  ;;  %v3049_v37 = vcombine.low %v3040_v16, %v3048_v0  ;;  %v3124_v26 = vrot.slane %v6959_v47, %v5389_v6  ;;  %v4371_v23 = vcombine.low %v4354_v58, %v4362_v24 }
 0x260   : > { %v3132_v14 = vrot.slane %v6960_v1, %v5389_v6  ;;  %v3100_v49 = vcombine.high %v3090_v38, %v3098_v44  ;;  %v3099_v7 = vcombine.low %v3090_v38, %v3098_v44  ;;  %v6963_v17 = vcombine.low %v6961_v52, %v6962_v15 }
 0x261   : > { %3539 = vxpose.xlu1.b32.cont [7/16] (narrow) %v3050_v4, 64  ;;  %3507 = vxpose.xlu0.b32.cont [7/16] (narrow) %v3049_v37, 64  ;;  %v6964_v28 = vcombine.high %v6961_v52, %v6962_v15  ;;  %v4378_v18 = vrot.slane %v4371_v23, %v5404_v19  ;;  %v3140_v63 = vrot.slane %v3133_v43, %v5404_v19 }
 0x262   : > { %v3174_v51 = vrot.slane %v6963_v17, %v5389_v6  ;;  %v3141_v30 = vcombine.low %v3124_v26, %v3132_v14  ;;  %v3183_v3 = vcombine.low %v5878_v59, %v5884_v31  ;;  %v6965_v16 = vcombine.low %v5949_v20, %v5957_v5 }
 0x263   : > { %v3182_v53 = vrot.slane %v6964_v28, %v5389_v6  ;;  %v6966_v62 = vcombine.high %v5949_v20, %v5957_v5  ;;  %v3233_v46 = vcombine.low %v6158_v42, %v6164_v12  ;;  %v4379_v48 = vcombine.low %v4370_v56, %v4378_v18 }
 0x264   : > { %v3224_v61 = vrot.slane %v6965_v16, %v5389_v6  ;;  %v4380_v33 = vcombine.high %v4370_v56, %v4378_v18  ;;  %v3148_v59 = vrot.slane %v3141_v30, %v5404_v19  ;;  %v3190_v31 = vrot.slane %v3183_v3, %v5404_v19 }
 0x265   : > { %v3191_v8 = vcombine.low %v3174_v51, %v3182_v53  ;;  %v3232_v0 = vrot.slane %v6966_v62, %v5389_v6  ;;  %3540 = vxpose.xlu1.b32.cont [8/16] (narrow) %v3100_v49, 64  ;;  %3508 = vxpose.xlu0.b32.cont [8/16] (narrow) %v3099_v7, 64  ;;  %v3240_v50 = vrot.slane %v3233_v46, %v5404_v19  ;;  %v6973_v7 = vld [vmem:[#allocation37_spill] sm:$0xff] }
 0x266   : > { %4397 = vst.msk [vmem:[%s5783_s28 + $0x78] sm:$0xff] %vm4381_vm0, %v4379_v48  ;;  %4413 = vst.msk [vmem:[%s5783_s28 + $0xf8] sm:$0xff] %vm4381_vm0, %v4380_v33  ;;  %v3150_v20 = vcombine.high %v3140_v63, %v3148_v59  ;;  %v3149_v5 = vcombine.low %v3140_v63, %v3148_v59  ;;  %v6967_v42 = vcombine.low %v5982_v35, %v5988_v40 }
 0x267   : > { %v3198_v41 = vrot.slane %v3191_v8, %v5404_v19  ;;  %v3241_v58 = vcombine.low %v3224_v61, %v3232_v0  ;;  %v6968_v24 = vcombine.high %v5982_v35, %v5988_v40  ;;  %v3283_v44 = vcombine.low %v6333_v10, %v6341_v11 }
 0x268   : > { %v3274_v12 = vrot.slane %v6967_v42, %v5389_v6  ;;  %v6969_v9 = vcombine.low %v6173_v34, %v6176_v27  ;;  %v6970_v35 = vcombine.high %v6173_v34, %v6176_v27  ;;  %v3333_v10 = vcombine.low %v6381_v45, %v6394_v32 }
 0x269   : > { %v3282_v4 = vrot.slane %v6968_v24, %v5389_v6  ;;  %v3200_v37 = vcombine.high %v3190_v31, %v3198_v41  ;;  %v3199_v56 = vcombine.low %v3190_v31, %v3198_v41  ;;  %v3248_v38 = vrot.slane %v3241_v58, %v5404_v19  ;;  %3541 = vxpose.xlu1.b32.cont [9/16] (narrow) %v3150_v20, 64 }
 0x26a   : > { %3509 = vxpose.xlu0.b32.cont [9/16] (narrow) %v3149_v5, 64  ;;  %v3324_v47 = vrot.slane %v6969_v9, %v5389_v6  ;;  %v3332_v40 = vrot.slane %v6970_v35, %v5389_v6  ;;  %v3290_v1 = vrot.slane %v3283_v44, %v5404_v19  ;;  %v6971_v43 = vcombine.low %v6224_v21, %v6227_v55 }
 0x26b   : > { %v3291_v39 = vcombine.low %v3274_v12, %v3282_v4  ;;  %v3250_v26 = vcombine.high %v3240_v50, %v3248_v38  ;;  %v3249_v23 = vcombine.low %v3240_v50, %v3248_v38  ;;  %v6972_v34 = vcombine.high %v6224_v21, %v6227_v55 }
 0x26c   : > { %v3341_v14 = vcombine.low %v3324_v47, %v3332_v40  ;;  %v3374_v49 = vrot.slane %v6971_v43, %v5389_v6  ;;  %v1545_v52 = vcombine.low %v6973_v7, %v6470_v13  ;;  %v1546_v15 = vcombine.high %v6973_v7, %v6470_v13 }
 0x26d   : > { %v3298_v11 = vrot.slane %v3291_v39, %v5404_v19  ;;  %v3382_v27 = vrot.slane %v6972_v34, %v5389_v6  ;;  %v3340_v45 = vrot.slane %v3333_v10, %v5404_v19  ;;  %v3383_v32 = vcombine.low %v6400_v57, %v6408_v2  ;;  %3542 = vxpose.xlu1.b32.cont [10/16] (narrow) %v3200_v37, 64 }
 0x26e   : > { %3510 = vxpose.xlu0.b32.cont [10/16] (narrow) %v3199_v56, 64  ;;  %v3348_v28 = vrot.slane %v3341_v14, %v5404_v19  ;;  %v3417_v21 = vcombine.low %v6455_v29, %v6467_v60  ;;  %v4746_v55 = vcombine.high %v6455_v29, %v6467_v60  ;;  %v6974_v13 = vcombine.low %v5831_v25, %v6448_v54 }
 0x26f   : > { %v3300_v17 = vcombine.high %v3290_v1, %v3298_v11  ;;  %v3299_v51 = vcombine.low %v3290_v1, %v3298_v11  ;;  %v3391_v53 = vcombine.low %v3374_v49, %v3382_v27  ;;  %v6975_v57 = vcombine.high %v5831_v25, %v6448_v54 }
 0x270   : > { %v1569_v18 = vrot.slane %v6974_v13, %v5404_v19  ;;  %v3350_v63 = vcombine.high %v3340_v45, %v3348_v28  ;;  %v3349_v30 = vcombine.low %v3340_v45, %v3348_v28  ;;  %v3401_v3 = vcombine.low %v6434_v36, %v6442_v22 }
 0x271   : > { %v1576_v2 = vrot.slane %v6975_v57, %v5404_v19  ;;  %v3390_v8 = vrot.slane %v3383_v32, %v5404_v19  ;;  %v3398_v29 = vrot.slane %v3391_v53, %v5404_v19  ;;  %v4745_v60 = vcombine.high %v6434_v36, %v6442_v22  ;;  %3543 = vxpose.xlu1.b32.cont [11/16] (narrow) %v3250_v26, 64 }
 0x272   : > { %v1553_v16 = vrot.slane %v1545_v52, %v5404_v19  ;;  %v1560_v61 = vrot.slane %v1546_v15, %v5404_v19  ;;  %3511 = vxpose.xlu0.b32.cont [11/16] (narrow) %v3249_v23, 64  ;;  %v3424_v46 = vrot.slane %v3417_v21, %v5389_v6  ;;  %v3432_v48 = vrot.slane %v4746_v55, %v5389_v6 }
 0x273   : > { %v3400_v25 = vcombine.high %v3390_v8, %v3398_v29  ;;  %v3399_v54 = vcombine.low %v3390_v8, %v3398_v29  ;;  %v3467_v62 = vcombine.low %v1569_v18, %v1576_v2  ;;  %v4748_v0 = vcombine.high %v1569_v18, %v1576_v2 }
 0x274   : > { %v3408_v33 = vrot.slane %v3401_v3, %v5389_v6  ;;  %v3416_v59 = vrot.slane %v4745_v60, %v5389_v6  ;;  %v3451_v31 = vcombine.low %v1553_v16, %v1560_v61  ;;  %v4747_v36 = vcombine.high %v1553_v16, %v1560_v61 }
 0x275   : > { %3544 = vxpose.xlu1.b32.cont [12/16] (narrow) %v3300_v17, 64  ;;  %v3441_v22 = vcombine.low %v3424_v46, %v3432_v48  ;;  %v3474_v41 = vrot.slane %v3467_v62, %v5389_v6  ;;  %v3482_v50 = vrot.slane %v4748_v0, %v5389_v6 }
 0x276   : > { %3512 = vxpose.xlu0.b32.cont [12/16] (narrow) %v3299_v51, 64  ;;  %v3458_v58 = vrot.slane %v3451_v31, %v5389_v6  ;;  %v3466_v20 = vrot.slane %v4747_v36, %v5389_v6  ;;  %v3433_v5 = vcombine.low %v3408_v33, %v3416_v59 }
 0x277   : > { %v3448_v42 = vrot.slane %v3441_v22, %v5404_v19  ;;  %v3491_v12 = vcombine.low %v3474_v41, %v3482_v50 }
 0x278   : > { %v3440_v24 = vrot.slane %v3433_v5, %v5404_v19  ;;  %v3483_v4 = vcombine.low %v3458_v58, %v3466_v20 }
 0x279   : > { %3545 = vxpose.xlu1.b32.cont [13/16] (narrow) %v3350_v63, 64  ;;  %v3498_v38 = vrot.slane %v3491_v12, %v5404_v19 }
 0x27a   : > { %3513 = vxpose.xlu0.b32.cont [13/16] (narrow) %v3349_v30, 64  ;;  %v3450_v37 = vcombine.high %v3440_v24, %v3448_v42  ;;  %v3449_v56 = vcombine.low %v3440_v24, %v3448_v42  ;;  %v3490_v6 = vrot.slane %v3483_v4, %v5404_v19 }
 0x27c   : > { %v3500_v44 = vcombine.high %v3490_v6, %v3498_v38  ;;  %v3499_v39 = vcombine.low %v3490_v6, %v3498_v38 }
 0x27d   : > { %3546 = vxpose.xlu1.b32.cont [14/16] (narrow) %v3400_v25, 64 }
 0x27e   : > { %3514 = vxpose.xlu0.b32.cont [14/16] (narrow) %v3399_v54, 64 }
 0x281   : > { %3547 = vxpose.xlu1.b32.cont [15/16] (narrow) %v3450_v37, 64 }
 0x282   : > { %3515 = vxpose.xlu0.b32.cont [15/16] (narrow) %v3449_v56, 64 }
 0x285   : > { %3548 = vxpose.xlu1.b32.end [16/16] (narrow) %v3500_v44, 64 }
 0x286   : > { %3516 = vxpose.xlu0.b32.end [16/16] (narrow) %v3499_v39, 64 }
 0x2c5   : > { %v3549_v9 = vpop.trf.xlu1 }
 0x2c6   : > { %v3517_v47 = vpop.trf.xlu0  ;;  %3573 = vst [vmem:[%s6685_s29 + $0x40] sm:$0xff] %v3549_v9 }
 0x2c7   : > { %3565 = vst [vmem:[%s6685_s29] sm:$0xff] %v3517_v47 }
 0x2c9   : > { %v3550_v19 = vpop.trf.xlu1 }
 0x2ca   : > { %v3518_v35 = vpop.trf.xlu0  ;;  %3574 = vst [vmem:[%s6685_s29 + $0x48] sm:$0xff] %v3550_v19 }
 0x2cb   : > { %3566 = vst [vmem:[%s6685_s29 + $0x8] sm:$0xff] %v3518_v35 }
 0x2cd   : > { %v3551_v40 = vpop.trf.xlu1 }
 0x2ce   : > { %v3519_v26 = vpop.trf.xlu0  ;;  %3575 = vst [vmem:[%s6685_s29 + $0x50] sm:$0xff] %v3551_v40 }
 0x2cf   : > { %3567 = vst [vmem:[%s6685_s29 + $0x10] sm:$0xff] %v3519_v26 }
 0x2d1   : > { %v3552_v23 = vpop.trf.xlu1 }
 0x2d2   : > { %v3520_v1 = vpop.trf.xlu0  ;;  %3576 = vst [vmem:[%s6685_s29 + $0x58] sm:$0xff] %v3552_v23 }
 0x2d3   : > { %3568 = vst [vmem:[%s6685_s29 + $0x18] sm:$0xff] %v3520_v1 }
 0x2d5   : > { %v3553_v10 = vpop.trf.xlu1 }
 0x2d6   : > { %v3521_v11 = vpop.trf.xlu0  ;;  %3577 = vst [vmem:[%s6685_s29 + $0x60] sm:$0xff] %v3553_v10 }
 0x2d7   : > { %3569 = vst [vmem:[%s6685_s29 + $0x20] sm:$0xff] %v3521_v11 }
 0x2d9   : > { %v3554_v14 = vpop.trf.xlu1 }
 0x2da   : > { %v3522_v43 = vpop.trf.xlu0  ;;  %3578 = vst [vmem:[%s6685_s29 + $0x68] sm:$0xff] %v3554_v14 }
 0x2db   : > { %3570 = vst [vmem:[%s6685_s29 + $0x28] sm:$0xff] %v3522_v43 }
 0x2dd   : > { %v3555_v49 = vpop.trf.xlu1 }
 0x2de   : > { %v3523_v34 = vpop.trf.xlu0  ;;  %3579 = vst [vmem:[%s6685_s29 + $0x70] sm:$0xff] %v3555_v49 }
 0x2df   : > { %3571 = vst [vmem:[%s6685_s29 + $0x30] sm:$0xff] %v3523_v34 }
 0x2e1   : > { %v3556_v27 = vpop.trf.xlu1 }
 0x2e2   : > { %v3524_v7 = vpop.trf.xlu0  ;;  %3580 = vst [vmem:[%s6685_s29 + $0x78] sm:$0xff] %v3556_v27 }
 0x2e3   : > { %3572 = vst [vmem:[%s6685_s29 + $0x38] sm:$0xff] %v3524_v7 }
 0x2e4   : > { %4957 = shalt.err (!%p4954_p0)
}
 0x2e5   : > { %s4958_s21 = scalar_lea.hbm %s6708_s20, 2048  ;;  %s4962_s26 = scalar_lea.hbm %s6831_s3, 4096 }
 0x2e6   : > { %p4959_p5 = scmp.ne.s32.totalorder %s6708_s20, %s4958_s21  ;;  %p4963_p4 = scmp.lt.s32.totalorder %s6708_s20, %s6831_s3 }
 0x2e7   : > { %p4964_p6 = scmp.lt.s32.totalorder %s4962_s26, %s4958_s21 }
 0x2e8   : > { %p4960_p9 = pnand %p4959_p5, %p6976_p11 }
 0x2e9   : > { %p4965_p8 = por %p4964_p6, %p4963_p4 }
 0x2ea   : > { %p4961_p1 = pneg %p4960_p9 }
 0x2ec   : > { %p4966_p3 = pnand %p4965_p8, %p4961_p1 }
 0x2ee   : > { %4969 = shalt.err (!%p4966_p3)
}
 0x2ef   : > { %s5025_s14 = smov 128   ;;  %s5026_s30 = smov 256   ;;  %v4534_v52 = vld [vmem:[%s5783_s28] sm:$0xff] (%p6976_p11)  ;;  %v4536_v15 = vld [vmem:[%s5783_s28 + $0x8] sm:$0xff] (%p6976_p11)  ;;  %v4538_v45 = vld [vmem:[%s5783_s28 + $0x10] sm:$0xff] (%p6976_p11) }
 0x2f0   : > { %s5027_s6 = smov 8   ;;  %4440 = sbr.rel (!%p6976_p11) target bundleno = 771 (0x303), region = 48  ;;  %v4540_v32 = vld [vmem:[%s5783_s28 + $0x18] sm:$0xff] (%p6976_p11)  ;;  %v4542_v17 = vld [vmem:[%s5783_s28 + $0x20] sm:$0xff] (%p6976_p11)  ;;  %v4544_v51 = vld [vmem:[%s5783_s28 + $0x28] sm:$0xff] (%p6976_p11) }
 0x2f1   : > { %4828 = dma.vmem_to_hbm [thread:$0]  (%p6976_p11), %s6710_s11, 2048, %s6708_s20, %s4415_s25, %s5025_s14, %s5026_s30, %s5027_s6  }
 0x2f2   : > { %s6744_s21 = scalar_lea.vmem (%p6976_p11), %s6832_s4, %s4783_s12  ;;  %v4546_v28 = vld [vmem:[%s5783_s28 + $0x30] sm:$0xff] (%p6976_p11)  ;;  %v4548_v21 = vld [vmem:[%s5783_s28 + $0x38] sm:$0xff] (%p6976_p11)  ;;  %v4550_v55 = vld [vmem:[%s5783_s28 + $0x40] sm:$0xff] (%p6976_p11) }
 0x2f3   : > { %4535 = vst [vmem:[%s6744_s21] sm:$0xff] (%p6976_p11), %v4534_v52  ;;  %4537 = vst [vmem:[%s6744_s21 + $0x8] sm:$0xff] (%p6976_p11), %v4536_v15  ;;  %v4552_v53 = vld [vmem:[%s5783_s28 + $0x48] sm:$0xff] (%p6976_p11)  ;;  %v4554_v13 = vld [vmem:[%s5783_s28 + $0x50] sm:$0xff] (%p6976_p11) }
 0x2f4   : > { %4539 = vst [vmem:[%s6744_s21 + $0x10] sm:$0xff] (%p6976_p11), %v4538_v45  ;;  %4541 = vst [vmem:[%s6744_s21 + $0x18] sm:$0xff] (%p6976_p11), %v4540_v32  ;;  %v4556_v18 = vld [vmem:[%s5783_s28 + $0x58] sm:$0xff] (%p6976_p11)  ;;  %v4558_v57 = vld [vmem:[%s5783_s28 + $0x60] sm:$0xff] (%p6976_p11) }
 0x2f5   : > { %4543 = vst [vmem:[%s6744_s21 + $0x20] sm:$0xff] %v4542_v17  ;;  %4545 = vst [vmem:[%s6744_s21 + $0x28] sm:$0xff] %v4544_v51  ;;  %v4560_v2 = vld [vmem:[%s5783_s28 + $0x68] sm:$0xff]  ;;  %v4562_v63 = vld [vmem:[%s5783_s28 + $0x70] sm:$0xff] }
 0x2f6   : > { %4547 = vst [vmem:[%s6744_s21 + $0x30] sm:$0xff] %v4546_v28  ;;  %4549 = vst [vmem:[%s6744_s21 + $0x38] sm:$0xff] %v4548_v21  ;;  %v4564_v30 = vld [vmem:[%s5783_s28 + $0x78] sm:$0xff]  ;;  %v4566_v3 = vld [vmem:[%s5783_s28 + $0x80] sm:$0xff] }
 0x2f7   : > { %4551 = vst [vmem:[%s6744_s21 + $0x40] sm:$0xff] %v4550_v55  ;;  %4553 = vst [vmem:[%s6744_s21 + $0x48] sm:$0xff] %v4552_v53  ;;  %v4568_v8 = vld [vmem:[%s5783_s28 + $0x88] sm:$0xff]  ;;  %v4570_v29 = vld [vmem:[%s5783_s28 + $0x90] sm:$0xff] }
 0x2f8   : > { %4555 = vst [vmem:[%s6744_s21 + $0x50] sm:$0xff] %v4554_v13  ;;  %4557 = vst [vmem:[%s6744_s21 + $0x58] sm:$0xff] %v4556_v18  ;;  %v4572_v60 = vld [vmem:[%s5783_s28 + $0x98] sm:$0xff]  ;;  %v4574_v16 = vld [vmem:[%s5783_s28 + $0xa0] sm:$0xff] }
 0x2f9   : > { %4559 = vst [vmem:[%s6744_s21 + $0x60] sm:$0xff] %v4558_v57  ;;  %4561 = vst [vmem:[%s6744_s21 + $0x68] sm:$0xff] %v4560_v2  ;;  %v4576_v61 = vld [vmem:[%s5783_s28 + $0xa8] sm:$0xff]  ;;  %v4578_v25 = vld [vmem:[%s5783_s28 + $0xb0] sm:$0xff] }
 0x2fa   : > { %4563 = vst [vmem:[%s6744_s21 + $0x70] sm:$0xff] %v4562_v63  ;;  %4565 = vst [vmem:[%s6744_s21 + $0x78] sm:$0xff] %v4564_v30  ;;  %v4580_v54 = vld [vmem:[%s5783_s28 + $0xb8] sm:$0xff]  ;;  %v4582_v62 = vld [vmem:[%s5783_s28 + $0xc0] sm:$0xff] }
 0x2fb   : > { %4567 = vst [vmem:[%s6744_s21 + $0x100] sm:$0xff] %v4566_v3  ;;  %4569 = vst [vmem:[%s6744_s21 + $0x108] sm:$0xff] %v4568_v8  ;;  %v4584_v0 = vld [vmem:[%s5783_s28 + $0xc8] sm:$0xff]  ;;  %v4586_v46 = vld [vmem:[%s5783_s28 + $0xd0] sm:$0xff] }
 0x2fc   : > { %4571 = vst [vmem:[%s6744_s21 + $0x110] sm:$0xff] %v4570_v29  ;;  %4573 = vst [vmem:[%s6744_s21 + $0x118] sm:$0xff] %v4572_v60  ;;  %v4588_v48 = vld [vmem:[%s5783_s28 + $0xd8] sm:$0xff]  ;;  %v4590_v33 = vld [vmem:[%s5783_s28 + $0xe0] sm:$0xff] }
 0x2fd   : > { %4575 = vst [vmem:[%s6744_s21 + $0x120] sm:$0xff] %v4574_v16  ;;  %4577 = vst [vmem:[%s6744_s21 + $0x128] sm:$0xff] %v4576_v61  ;;  %v4592_v59 = vld [vmem:[%s5783_s28 + $0xe8] sm:$0xff]  ;;  %v4594_v31 = vld [vmem:[%s5783_s28 + $0xf0] sm:$0xff] }
 0x2fe   : > { %4579 = vst [vmem:[%s6744_s21 + $0x130] sm:$0xff] %v4578_v25  ;;  %4581 = vst [vmem:[%s6744_s21 + $0x138] sm:$0xff] %v4580_v54  ;;  %v4596_v36 = vld [vmem:[%s5783_s28 + $0xf8] sm:$0xff] }
 0x2ff   : > { %4583 = vst [vmem:[%s6744_s21 + $0x140] sm:$0xff] %v4582_v62  ;;  %4585 = vst [vmem:[%s6744_s21 + $0x148] sm:$0xff] %v4584_v0 }
 0x300   : > { %4587 = vst [vmem:[%s6744_s21 + $0x150] sm:$0xff] %v4586_v46  ;;  %4589 = vst [vmem:[%s6744_s21 + $0x158] sm:$0xff] %v4588_v48 }
 0x301   : > { %4591 = vst [vmem:[%s6744_s21 + $0x160] sm:$0xff] %v4590_v33  ;;  %4593 = vst [vmem:[%s6744_s21 + $0x168] sm:$0xff] %v4592_v59 }
 0x302   : > { %4595 = vst [vmem:[%s6744_s21 + $0x170] sm:$0xff] %v4594_v31  ;;  %4597 = vst [vmem:[%s6744_s21 + $0x178] sm:$0xff] %v4596_v36 }
 0x303 PF: > { %s4609_s19 = sand.u32 1, %s5000_s15   ;;  %p6977_p11 = scmp.ne.s32.totalorder %s6874_s22, 0 }
 0x304   : > { %p6978_p7 = scmp.ge.s32.totalorder %s5012_s18, 2  ;;  %s4610_s10 = scalar_lea.sflag [#allocation4], %s4609_s19 }
 0x306   : > { %p4839_p12 = pnand %p6978_p7, %p6977_p11 }
 0x308   : > { %p4840_p10 = pneg %p4839_p12 }
 0x30a   : > { %4995 = dma.done.wait (%p4840_p10), %s4610_s10, 2048  }
 0x30b   : > { %4997 = vsyncadd (%p4840_p10), %s4610_s10, 4294965248  ;;  %p19_p2 = scmp.ge.s32.totalorder %s5107_s27, 4   ;;  %s6979_s15 = smov %s5004_s16 }
 0x30c   : > { %s6980_s16 = smov %s5008_s17  ;;  %s6981_s17 = smov %s5124_s9 }
 0x30d   : > { %s6982_s18 = smov %s5107_s27  ;;  %21 = sbr.rel (!%p19_p2) target bundleno = 6 (0x6), region = 131 }
 0x312   :  { %4622 = vsyncpa [#allocation3], 1 }
 0x313   :  { %4624 = vsyncpa [#allocation3 + $0x1], 1 }
 0x314   :  { %4625 = vsyncpa [#allocation6], 1 }
 0x315   :  { %4626 = vsyncpa [#allocation4], 1 }
 0x316   :  { %4628 = vsyncpa [#allocation4 + $0x1], 1 }

// kernel: tpu_custom_call.1
= control target key start
LH: loop header
LB: loop body
LE: loop exit
PB: predicated region body
PF: predicated region fallthrough
CT: control target
= control target key end

     0   :  { %10 = vsyncpa [#allocation3], 0  ;;  %s6828_s0 = inlined_call_operand.hbm [shape: f32[256,128], index: 0, kind: input, shape index: {}]   ;;  %s6829_s1 = inlined_call_operand.hbm [shape: f32[128,256], index: 1, kind: input, shape index: {}]   ;;  %s6830_s2 = inlined_call_operand.vmem [shape: f32[1,256], index: 2, kind: input, shape index: {}]   ;;  %s6831_s3 = inlined_call_operand.hbm [shape: f32[2,64,256], index: 3, kind: output, shape index: {0}]   ;;  %s6832_s4 = inlined_call_operand.vmem [shape: f32[2,256,64], index: 4, kind: output, shape index: {1}]  }
   0x1   :  { %12 = vsyncpa [#allocation3 + $0x1], 0 }
   0x2   :  { %13 = vsyncpa [#allocation6], 0 }
   0x3   :  { %14 = vsyncpa [#allocation4], 0 }
   0x4   :  { %16 = vsyncpa [#allocation4 + $0x1], 0  ;;  %s5053_s15 = smov 0   ;;  %s5055_s16 = smov 0  }
   0x5   :  { %s5057_s17 = smov 0   ;;  %s5059_s18 = smov 0  }
   0x6 LB: > { %s5074_s19 = sadd.s32 4294967295, %s5012_s18   ;;  %s4705_s20 = sadd.s32 4294967294, %s5012_s18   ;;  %s5012_s18 = sphi %s5059_s18, %s6982_s18   ;;  %s5008_s17 = sphi %s5057_s17, %s6981_s17   ;;  %s5004_s16 = sphi %s5055_s16, %s6980_s16   ;;  %s5000_s15 = sphi %s5053_s15, %s6979_s15  }
   0x7   : > { %p42_p0 = scmp.ne.s32.totalorder %s5004_s16, %s5000_s15  ;;  %p6833_p1 = scmp.eq.s32.totalorder %s5074_s19, 0 }
   0x8   : > { %p114_p3 = scmp.eq.s32.totalorder %s4705_s20, 1  ;;  %p4706_p5 = scmp.ge.s32.totalorder %s5012_s18, 1 }
   0x9   : > { %p5083_p4 = por %p6833_p1, %p42_p0  ;;  %p147_p7 = scmp.lt.s32.totalorder %s5012_s18, 3 }
   0xa   : > { %p5088_p6 = por %p114_p3, %p42_p0  ;;  %s5014_s24 = smov [#allocation5]  }
   0xb   : > { %s6873_s21 = scalar_select %p5083_p4, 1, 0 }
   0xc   : > { %s6874_s22 = scalar_select %p5088_p6, 1, 0 }
   0xd   : > { %p5093_p8 = pnand %p4706_p5, %p147_p7  ;;  %s159_s25 = sshll.u32 %s5014_s24, 4  ;;  %s160_s25 = int_to_ptr.vmem [resolvable:$true] %s159_s25 }
   0xe   : > { %s5107_s27 = sadd.s32 1, %s5012_s18   ;;  %s29_s28 = sadd.s32 1, %s5008_s17 }
   0xf   : > { %s6875_s23 = scalar_select %p5093_p8, 1, 0 }
  0x10   : > { %p4830_p9 = pneg %p5093_p8  ;;  %s26_s29 = ssub.s32 %s5012_s18, %s5107_s27 }
  0x11   : > { %s4901_s30 = scalar_lea.vmem %s160_s25, 4096  ;;  %p4909_p5 = scmp.lt.s32.totalorder %s160_s25, %s160_s25 }
  0x12   : > { %p5102_p11 = pnand %p4830_p9, %p6833_p1  ;;  %p4902_p13 = scmp.ne.s32.totalorder %s160_s25, %s4901_s30 }
  0x13   : > { %p4910_p7 = scmp.lt.s32.totalorder %s4901_s30, %s4901_s30 }
  0x14   : > { %p4892_p12 = pneg %p5102_p11 }
  0x15   : > { %p4911_p10 = por %p4910_p7, %p4909_p5 }
  0x16   : > { %p4904_p0 = pnand %p4902_p13, %p4892_p12 }
  0x18   : > { %p4905_p3 = pneg %p4904_p0 }
  0x1a   : > { %p4912_p2 = pnand %p4911_p10, %p4905_p3 }
  0x1c   : > { %4915 = shalt.err (!%p4912_p2)
}
  0x1d   : > { %s5015_s5 = smov 256   ;;  %s5016_s6 = smov 16  }
  0x1e   : > { %4833 = dma.hbm_to_vmem [thread:$0]  (!%p5102_p11), %s6829_s1, 4096, %s160_s25, [#allocation6], %s5015_s5, %s5015_s5, %s5016_s6  }
  0x1f   : > { %p27_p9 = scmp.eq.s32.totalorder %s26_s29, 0  ;;  %p36_p12 = scmp.ne.s32.totalorder %s5008_s17, %s5004_s16 }
  0x20   : > { %p37_p10 = scmp.eq.s32.totalorder %s5012_s18, 0  ;;  %p4843_p2 = scmp.lt.s32.totalorder %s5012_s18, 2 }
  0x21   : > { %s5124_s9 = scalar_select %p27_p9, %s5008_s17, %s29_s28  }
  0x22   : > { %p38_p13 = por %p37_p10, %p36_p12  ;;  %p6877_p0 = scmp.eq.s32.totalorder %s5074_s19, 1 }
  0x23   : > { %s176_s11 = sand.u32 1, %s5008_s17   ;;  %s4788_s12 = sshll.u32 %s5012_s18, 11 }
  0x24   : > { %p5128_p3 = por %p6877_p0, %p36_p12  ;;  %s4709_s13 = sshll.u32 %s176_s11, 7 }
  0x25   : > { %s5137_s24 = scalar_lea.hbm %s6828_s0, %s4788_s12  ;;  %s180_s25 = scalar_lea.vmem [#allocation2], %s4709_s13 }
  0x26   : > { %s6878_s10 = scalar_select %p5128_p3, 1, 0 }
  0x27   : > { %s187_s26 = sshll.u32 %s180_s25, 4  ;;  %p5139_p11 = pnand %p4843_p2, %p38_p13  ;;  %s5143_s26 = int_to_ptr.vmem [resolvable:$true] %s187_s26 }
  0x28   : > { %s5145_s29 = scalar_lea.sflag [#allocation3], %s176_s11  ;;  %s4916_s30 = scalar_lea.hbm %s5137_s24, 2048 }
  0x29   : > { %p4917_p5 = scmp.ne.s32.totalorder %s5137_s24, %s4916_s30  ;;  %p4918_p7 = pneg %p5139_p11 }
  0x2a   : > { %s4921_s7 = scalar_lea.hbm %s6828_s0, 4096  ;;  %p4922_p10 = scmp.lt.s32.totalorder %s5137_s24, %s6828_s0 }
  0x2b   : > { %p4919_p9 = pnand %p4918_p7, %p4917_p5  ;;  %p4923_p2 = scmp.lt.s32.totalorder %s4921_s7, %s4916_s30 }
  0x2d   : > { %p4920_p12 = pneg %p4919_p9  ;;  %p4924_p13 = por %p4923_p2, %p4922_p10 }
  0x2f   : > { %p4925_p0 = pnand %p4924_p13, %p4920_p12 }
  0x31   : > { %4928 = shalt.err (!%p4925_p0)
}
  0x32   : > { %s4929_s11 = scalar_lea.vmem %s5143_s26, 2048  ;;  %s5017_s13 = smov [#allocation2]  }
  0x33   : > { %p4930_p1 = scmp.ne.s32.totalorder %s5143_s26, %s4929_s11  ;;  %s4934_s14 = sshll.u32 %s5017_s13, 4  ;;  %s4935_s14 = int_to_ptr.vmem [resolvable:$false] %s4934_s14 }
  0x34   : > { %s4936_s20 = scalar_lea.vmem %s4935_s14, 4096  ;;  %p4937_p9 = scmp.lt.s32.totalorder %s5143_s26, %s4935_s14 }
  0x35   : > { %p4932_p6 = pnand %p4930_p1, %p4918_p7  ;;  %p4938_p3 = scmp.lt.s32.totalorder %s4936_s20, %s4929_s11 }
  0x37   : > { %p4933_p5 = pneg %p4932_p6  ;;  %p4939_p4 = por %p4938_p3, %p4937_p9 }
  0x39   : > { %p4940_p8 = pnand %p4939_p4, %p4933_p5 }
  0x3b   : > { %4943 = shalt.err (!%p4940_p8)
}
  0x3c   : > { %s5018_s25 = smov 128   ;;  %s5019_s30 = smov 8  }
  0x3d   : > { %4837 = dma.hbm_to_vmem [thread:$0]  (!%p5139_p11), %s5137_s24, 2048, %s5143_s26, %s5145_s29, %s5018_s25, %s5018_s25, %s5019_s30  }
  0x3e   : > { %p6880_p1 = scmp.ne.s32.totalorder %s6875_s23, 0 }
  0x40   : > { %199 = sbr.rel (%p6880_p1) target bundleno = 771 (0x303), region = 32 }
  0x45   : > { %s5169_s5 = sand.u32 1, %s5004_s16   ;;  %p6881_p4 = scmp.ne.s32.totalorder %s6873_s21, 0 }
  0x46   : > { %s4713_s6 = sshll.u32 %s5169_s5, 7  ;;  %s202_s7 = scalar_lea.sflag [#allocation3], %s5169_s5 }
  0x47   : > { %s5175_s8 = scalar_lea.vmem [#allocation2], %s4713_s6 }
  0x48   : > { %4987 = dma.done.wait (%p6881_p4), %s202_s7, 2048  }
  0x49   : > { %4989 = vsyncadd (%p6881_p4), %s202_s7, 4294965248  ;;  %p6882_p6 = scmp.eq.s32.totalorder %s5074_s19, 0 }
  0x4b   : > { %4991 = dma.done.wait (%p6882_p6), [#allocation6], 4096   ;;  %p6883_p8 = pmov %p6882_p6 }
  0x4c   : > { %v6842_v0 = vmov 0.0   ;;  %v287_v1 = vld [vmem:[#allocation5 + $0xf8] sm:$0xff]  ;;  %v286_v2 = vld [vmem:[#allocation5 + $0xf0] sm:$0xff]  ;;  %v285_v3 = vld [vmem:[#allocation5 + $0xe8] sm:$0xff]  ;;  %v290_v49 = vlaneseq  ;;  %s5021_s24 = smov 64   ;;  %vm4381_vm0 = vcmask 523264  }
  0x4d   : > { %4993 = vsyncadd (%p6883_p8), [#allocation6], 4294963200  ;;  %364 = vmatprep.mubr.f32.mxu0 %v6842_v0  ;;  %412 = vmatprep.mubr.f32.mxu1 %v6842_v0  ;;  %v284_v4 = vld [vmem:[#allocation5 + $0xe0] sm:$0xff]  ;;  %v283_v5 = vld [vmem:[#allocation5 + $0xd8] sm:$0xff]  ;;  %s4716_s26 = sshll.u32 %s5169_s5, 8  ;;  %s6685_s29 = scalar_lea.vmem [#allocation7], %s4713_s6 }
  0x4e   : > { %300 = vmatprep.subr.mxu0 %v287_v1  ;;  %4790 = vmatprep.subr.mxu1 %v287_v1  ;;  %v282_v6 = vld [vmem:[#allocation5 + $0xd0] sm:$0xff]  ;;  %v281_v7 = vld [vmem:[#allocation5 + $0xc8] sm:$0xff]  ;;  %v280_v8 = vld [vmem:[#allocation5 + $0xc0] sm:$0xff]  ;;  %v5217_v50 = vshrl.u32 %v290_v49, 7  ;;  %s5783_s28 = scalar_lea.vmem [#allocation8], %s4716_s26  ;;  %s4783_s12 = sshll.u32 %s5074_s19, 7 }
  0x4f   : > { %301 = vmatpush1.msra.mxu0 %v286_v2  ;;  %4806 = vmatpush1.msra.mxu1 %v286_v2  ;;  %v279_v9 = vld [vmem:[#allocation5 + $0xb8] sm:$0xff]  ;;  %v278_v10 = vld [vmem:[#allocation5 + $0xb0] sm:$0xff]  ;;  %v277_v11 = vld [vmem:[#allocation5 + $0xa8] sm:$0xff]  ;;  %s4431_s11 = sshll.u32 %s6685_s29, 4  ;;  %s6708_s20 = scalar_lea.hbm %s6831_s3, %s4783_s12  ;;  %s6710_s11 = int_to_ptr.vmem [resolvable:$true] %s4431_s11 }
  0x50   : > { %302 = vmatprep.subr.mxu0 %v285_v3  ;;  %4791 = vmatprep.subr.mxu1 %v285_v3  ;;  %v276_v12 = vld [vmem:[#allocation5 + $0xa0] sm:$0xff]  ;;  %v275_v13 = vld [vmem:[#allocation5 + $0x98] sm:$0xff]  ;;  %v274_v14 = vld [vmem:[#allocation5 + $0x90] sm:$0xff]  ;;  %v292_v51 = vsub.s32 0, %v5217_v50  ;;  %v296_v57 = vsub.s32 1, %v5217_v50  ;;  %s4415_s25 = scalar_lea.sflag [#allocation4], %s5169_s5 }
  0x51   : > { %303 = vmatpush1.msra.mxu0 %v284_v4  ;;  %4807 = vmatpush1.msra.mxu1 %v284_v4  ;;  %v273_v15 = vld [vmem:[#allocation5 + $0x88] sm:$0xff]  ;;  %v272_v16 = vld [vmem:[#allocation5 + $0x80] sm:$0xff]  ;;  %v271_v17 = vld [vmem:[#allocation5 + $0x78] sm:$0xff]  ;;  %s4944_s30 = scalar_lea.vmem %s6710_s11, 2048  ;;  %p6976_p11 = scmp.ne.s32.totalorder %s6878_s10, 0 }
  0x52   : > { %304 = vmatprep.subr.mxu0 %v283_v5  ;;  %4792 = vmatprep.subr.mxu1 %v283_v5  ;;  %v270_v18 = vld [vmem:[#allocation5 + $0x70] sm:$0xff]  ;;  %v269_v19 = vld [vmem:[#allocation5 + $0x68] sm:$0xff]  ;;  %v268_v20 = vld [vmem:[#allocation5 + $0x60] sm:$0xff]  ;;  %p4945_p3 = scmp.ne.s32.totalorder %s6710_s11, %s4944_s30  ;;  %s5024_s6 = smov [#allocation7]  }
  0x53   : > { %305 = vmatpush1.msra.mxu0 %v282_v6  ;;  %4808 = vmatpush1.msra.mxu1 %v282_v6  ;;  %v267_v21 = vld [vmem:[#allocation5 + $0x58] sm:$0xff]  ;;  %v266_v22 = vld [vmem:[#allocation5 + $0x50] sm:$0xff]  ;;  %v265_v23 = vld [vmem:[#allocation5 + $0x48] sm:$0xff]  ;;  %s4948_s7 = sshll.u32 %s5024_s6, 4  ;;  %s4949_s7 = int_to_ptr.vmem [resolvable:$false] %s4948_s7 }
  0x54   : > { %306 = vmatprep.subr.mxu0 %v281_v7  ;;  %4793 = vmatprep.subr.mxu1 %v281_v7  ;;  %v264_v24 = vld [vmem:[#allocation5 + $0x40] sm:$0xff]  ;;  %v263_v25 = vld [vmem:[#allocation5 + $0x38] sm:$0xff]  ;;  %v262_v26 = vld [vmem:[#allocation5 + $0x30] sm:$0xff]  ;;  %p4946_p7 = pnand %p4945_p3, %p6976_p11  ;;  %p4951_p10 = scmp.lt.s32.totalorder %s6710_s11, %s4949_s7 }
  0x55   : > { %307 = vmatpush1.msra.mxu0 %v280_v8  ;;  %4809 = vmatpush1.msra.mxu1 %v280_v8  ;;  %v261_v27 = vld [vmem:[#allocation5 + $0x28] sm:$0xff]  ;;  %v260_v28 = vld [vmem:[#allocation5 + $0x20] sm:$0xff]  ;;  %v259_v29 = vld [vmem:[#allocation5 + $0x18] sm:$0xff] }
  0x56   : > { %308 = vmatprep.subr.mxu0 %v279_v9  ;;  %4794 = vmatprep.subr.mxu1 %v279_v9  ;;  %v258_v30 = vld [vmem:[#allocation5 + $0x10] sm:$0xff]  ;;  %v257_v31 = vld [vmem:[#allocation5 + $0x8] sm:$0xff]  ;;  %v256_v32 = vld [vmem:[#allocation5] sm:$0xff]  ;;  %p4947_p12 = pneg %p4946_p7 }
  0x57   : > { %309 = vmatpush1.msra.mxu0 %v278_v10  ;;  %4810 = vmatpush1.msra.mxu1 %v278_v10  ;;  %v240_v33 = vld [vmem:[%s5175_s8] sm:$0xff]  ;;  %v241_v35 = vld [vmem:[%s5175_s8 + $0x8] sm:$0xff]  ;;  %v242_v37 = vld [vmem:[%s5175_s8 + $0x10] sm:$0xff] }
  0x58   : > { %310 = vmatprep.subr.mxu0 %v277_v11  ;;  %4795 = vmatprep.subr.mxu1 %v277_v11  ;;  %v248_v34 = vld [vmem:[%s5175_s8 + $0x40] sm:$0xff]  ;;  %v249_v36 = vld [vmem:[%s5175_s8 + $0x48] sm:$0xff]  ;;  %v250_v38 = vld [vmem:[%s5175_s8 + $0x50] sm:$0xff] }
  0x59   : > { %311 = vmatpush1.msra.mxu0 %v276_v12  ;;  %4811 = vmatpush1.msra.mxu1 %v276_v12  ;;  %v243_v39 = vld [vmem:[%s5175_s8 + $0x18] sm:$0xff]  ;;  %v244_v41 = vld [vmem:[%s5175_s8 + $0x20] sm:$0xff]  ;;  %v245_v43 = vld [vmem:[%s5175_s8 + $0x28] sm:$0xff] }
  0x5a   : > { %312 = vmatprep.subr.mxu0 %v275_v13  ;;  %4796 = vmatprep.subr.mxu1 %v275_v13  ;;  %v251_v40 = vld [vmem:[%s5175_s8 + $0x58] sm:$0xff]  ;;  %v252_v42 = vld [vmem:[%s5175_s8 + $0x60] sm:$0xff]  ;;  %v253_v44 = vld [vmem:[%s5175_s8 + $0x68] sm:$0xff] }
  0x5b   : > { %313 = vmatpush1.msra.mxu0 %v274_v14  ;;  %4812 = vmatpush1.msra.mxu1 %v274_v14  ;;  %v246_v45 = vld [vmem:[%s5175_s8 + $0x30] sm:$0xff]  ;;  %v247_v47 = vld [vmem:[%s5175_s8 + $0x38] sm:$0xff]  ;;  %v288_v52 = vld [vmem:[%s6830_s2] sm:$0x3] }
  0x5c   : > { %314 = vmatprep.subr.mxu0 %v273_v15  ;;  %4797 = vmatprep.subr.mxu1 %v273_v15  ;;  %v254_v46 = vld [vmem:[%s5175_s8 + $0x70] sm:$0xff]  ;;  %v255_v48 = vld [vmem:[%s5175_s8 + $0x78] sm:$0xff]  ;;  %v5223_v53 = vrot.slane %v288_v52, %v292_v51  ;;  %v5237_v1 = vrot.slane %v288_v52, %v296_v57  ;;  %s4950_s8 = scalar_lea.vmem %s4949_s7, 4096 }
  0x5d   : > { %315 = vmatpush1.msra.mxu0 %v272_v16  ;;  %4813 = vmatpush1.msra.mxu1 %v272_v16  ;;  %p4952_p2 = scmp.lt.s32.totalorder %s4950_s8, %s4944_s30 }
  0x5e   : > { %316 = vmatprep.subr.mxu0 %v271_v17  ;;  %4798 = vmatprep.subr.mxu1 %v271_v17 }
  0x5f   : > { %317 = vmatpush1.msra.mxu0 %v270_v18  ;;  %4814 = vmatpush1.msra.mxu1 %v270_v18  ;;  %p4953_p13 = por %p4952_p2, %p4951_p10 }
  0x60   : > { %318 = vmatprep.subr.mxu0 %v269_v19  ;;  %4799 = vmatprep.subr.mxu1 %v269_v19 }
  0x61   : > { %319 = vmatpush1.msra.mxu0 %v268_v20  ;;  %4815 = vmatpush1.msra.mxu1 %v268_v20  ;;  %p4954_p0 = pnand %p4953_p13, %p4947_p12 }
  0x62   : > { %320 = vmatprep.subr.mxu0 %v267_v21  ;;  %4800 = vmatprep.subr.mxu1 %v267_v21 }
  0x63   : > { %321 = vmatpush1.msra.mxu0 %v266_v22  ;;  %4816 = vmatpush1.msra.mxu1 %v266_v22 }
  0x64   : > { %322 = vmatprep.subr.mxu0 %v265_v23  ;;  %4801 = vmatprep.subr.mxu1 %v265_v23 }
  0x65   : > { %323 = vmatpush1.msra.mxu0 %v264_v24  ;;  %4817 = vmatpush1.msra.mxu1 %v264_v24 }
  0x66   : > { %324 = vmatprep.subr.mxu0 %v263_v25  ;;  %4802 = vmatprep.subr.mxu1 %v263_v25 }
  0x67   : > { %325 = vmatpush1.msra.mxu0 %v262_v26  ;;  %4818 = vmatpush1.msra.mxu1 %v262_v26 }
  0x68   : > { %326 = vmatprep.subr.mxu0 %v261_v27  ;;  %4803 = vmatprep.subr.mxu1 %v261_v27 }
  0x69   : > { %327 = vmatpush1.msra.mxu0 %v260_v28  ;;  %4819 = vmatpush1.msra.mxu1 %v260_v28 }
  0x6a   : > { %328 = vmatprep.subr.mxu0 %v259_v29  ;;  %4804 = vmatprep.subr.mxu1 %v259_v29 }
  0x6b   : > { %329 = vmatpush1.msra.mxu0 %v258_v30  ;;  %4820 = vmatpush1.msra.mxu1 %v258_v30 }
  0x6c   : > { %330 = vmatprep.subr.mxu0 %v257_v31  ;;  %4805 = vmatprep.subr.mxu1 %v257_v31 }
  0x6d   : > { %331 = vmatpush1.msra.mxu0 %v256_v32  ;;  %4821 = vmatpush1.msra.mxu1 %v256_v32 }
  0x6e   : > { %365 = vmatmul.mubr.f32.vlgmr.msra.gmra.mxu0 %v240_v33  ;;  %413 = vmatmul.mubr.f32.vlgmr.msra.gmra.mxu1 %v248_v34 }
  0x6f   : > { %370 = vmatprep.mubr.f32.mxu0 %v6842_v0  ;;  %418 = vmatprep.mubr.f32.mxu1 %v6842_v0 }
  0x72   : > { %371 = vmatmul.mubr.f32.gmra.mxu0 %v241_v35  ;;  %419 = vmatmul.mubr.f32.gmra.mxu1 %v249_v36 }
  0x73   : > { %376 = vmatprep.mubr.f32.mxu0 %v6842_v0  ;;  %424 = vmatprep.mubr.f32.mxu1 %v6842_v0 }
  0x76   : > { %377 = vmatmul.mubr.f32.gmra.mxu0 %v242_v37  ;;  %425 = vmatmul.mubr.f32.gmra.mxu1 %v250_v38 }
  0x77   : > { %382 = vmatprep.mubr.f32.mxu0 %v6842_v0  ;;  %430 = vmatprep.mubr.f32.mxu1 %v6842_v0 }
  0x7a   : > { %383 = vmatmul.mubr.f32.gmra.mxu0 %v243_v39  ;;  %431 = vmatmul.mubr.f32.gmra.mxu1 %v251_v40 }
  0x7b   : > { %388 = vmatprep.mubr.f32.mxu0 %v6842_v0  ;;  %436 = vmatprep.mubr.f32.mxu1 %v6842_v0 }
  0x7e   : > { %389 = vmatmul.mubr.f32.gmra.mxu0 %v244_v41  ;;  %437 = vmatmul.mubr.f32.gmra.mxu1 %v252_v42 }
  0x7f   : > { %394 = vmatprep.mubr.f32.mxu0 %v6842_v0  ;;  %442 = vmatprep.mubr.f32.mxu1 %v6842_v0 }
  0x82   : > { %395 = vmatmul.mubr.f32.gmra.mxu0 %v245_v43  ;;  %443 = vmatmul.mubr.f32.gmra.mxu1 %v253_v44 }
  0x83   : > { %400 = vmatprep.mubr.f32.mxu0 %v6842_v0  ;;  %448 = vmatprep.mubr.f32.mxu1 %v6842_v0 }
  0x86   : > { %401 = vmatmul.mubr.f32.gmra.mxu0 %v246_v45  ;;  %449 = vmatmul.mubr.f32.gmra.mxu1 %v254_v46 }
  0x87   : > { %406 = vmatprep.mubr.f32.mxu0 %v6842_v0  ;;  %454 = vmatprep.mubr.f32.mxu1 %v6842_v0 }
  0x8a   : > { %407 = vmatmul.mubr.f32.gmra.mxu0 %v247_v47  ;;  %455 = vmatmul.mubr.f32.gmra.mxu1 %v255_v48 }
 0x12e   : > { %v366_v54 = vpop.f32.mrf.mxu0  ;;  %v414_v55 = vpop.f32.mrf.mxu1 }
 0x12f   : > { %v5226_v56 = vadd.f32 %v366_v54, %v5223_v53  ;;  %v5235_v63 = vadd.f32 %v414_v55, %v5223_v53 }
 0x130   : > { %v368_v58 = vpop.f32.mrf.mxu0  ;;  %v416_v59 = vpop.f32.mrf.mxu1 }
 0x131   : > { %477 = vrot.lane.b32.xlu0 %v5226_v56, %s5021_s24  ;;  %v5247_v4 = vadd.f32 %v368_v58, %v5237_v1  ;;  %v5257_v8 = vadd.f32 %v416_v59, %v5237_v1  ;;  %v5022_v59 = vmov 1983009808  }
 0x132   : > { %v372_v60 = vpop.f32.mrf.mxu0  ;;  %v420_v61 = vpop.f32.mrf.mxu1 }
 0x133   : > { %v5232_v62 = vadd.f32 %v420_v61, %v5223_v53  ;;  %v5267_v12 = vadd.f32 %v372_v60, %v5223_v53  ;;  %v527_v60 = vunpack.c.l.s4 %v5022_v59 }
 0x134   : > { %v374_v2 = vpop.f32.mrf.mxu0  ;;  %v422_v5 = vpop.f32.mrf.mxu1 }
 0x135   : > { %495 = vrot.lane.b32.xlu1 %v5232_v62, %s5021_s24  ;;  %493 = vrot.lane.b32.xlu0 %v5235_v63, %s5021_s24  ;;  %v5244_v3 = vadd.f32 %v374_v2, %v5237_v1  ;;  %v5254_v7 = vadd.f32 %v422_v5, %v5237_v1  ;;  %v528_v61 = vunpack.c.0.s8 %v527_v60  ;;  %v5023_v2 = vmov 1934713408  }
 0x136   : > { %v378_v6 = vpop.f32.mrf.mxu0  ;;  %v426_v10 = vpop.f32.mrf.mxu1  ;;  %v558_v5 = vunpack.c.l.s4 %v5023_v2 }
 0x137   : > { %v5260_v11 = vadd.f32 %v378_v6, %v5223_v53  ;;  %v5275_v16 = vadd.f32 %v426_v10, %v5223_v53  ;;  %v5389_v6 = vsub.s32 %v528_v61, %v5217_v50  ;;  %v525_v10 = vcombine.high %v5226_v56, %v6842_v0 }
 0x138   : > { %v380_v9 = vpop.f32.mrf.mxu0  ;;  %v428_v14 = vpop.f32.mrf.mxu1 }
 0x139   : > { %1599 = vrot.lane.b32.xlu1 %v5244_v3, %s5021_s24  ;;  %1597 = vrot.lane.b32.xlu0 %v5247_v4, %s5021_s24  ;;  %v5287_v20 = vadd.f32 %v380_v9, %v5237_v1  ;;  %v5297_v24 = vadd.f32 %v428_v14, %v5237_v1  ;;  %v559_v9 = vunpack.c.0.s8 %v558_v5  ;;  %v2173_v14 = vcombine.high %v5257_v8, %v6842_v0 }
 0x13a   : > { %v384_v13 = vpop.f32.mrf.mxu0  ;;  %v432_v17 = vpop.f32.mrf.mxu1 }
 0x13b   : > { %v5270_v15 = vadd.f32 %v384_v13, %v5223_v53  ;;  %v5280_v18 = vadd.f32 %v432_v17, %v5223_v53  ;;  %v1645_v13 = vcombine.high %v5247_v4, %v6842_v0  ;;  %v5401_v17 = vrot.slane %v5226_v56, %v5389_v6 }
 0x13c   : > { %v386_v19 = vpop.f32.mrf.mxu0  ;;  %v434_v22 = vpop.f32.mrf.mxu1  ;;  %v5426_v56 = vrot.slane %v5257_v8, %v5389_v6 }
 0x13d   : > { %1615 = vrot.lane.b32.xlu1 %v5254_v7, %s5021_s24  ;;  %1613 = vrot.lane.b32.xlu0 %v5257_v8, %s5021_s24  ;;  %v5294_v23 = vadd.f32 %v386_v19, %v5237_v1  ;;  %v5307_v28 = vadd.f32 %v434_v22, %v5237_v1  ;;  %v5404_v19 = vsub.s32 %v559_v9, %v5217_v50 }
 0x13e   : > { %v390_v21 = vpop.f32.mrf.mxu0  ;;  %v438_v26 = vpop.f32.mrf.mxu1  ;;  %v1119_v22 = vcombine.high %v5232_v62, %v6842_v0  ;;  %v5422_v50 = vrot.slane %v5247_v4, %v5389_v6  ;;  %v5440_v4 = vrot.slane %v2173_v14, %v5389_v6  ;;  %v5444_v8 = vrot.slane %v5232_v62, %v5389_v6 }
 0x13f   : > { %v5302_v27 = vadd.f32 %v390_v21, %v5223_v53  ;;  %v5315_v32 = vadd.f32 %v438_v26, %v5223_v53  ;;  %v591_v21 = vcombine.high %v5267_v12, %v6842_v0  ;;  %v5415_v26 = vrot.slane %v5235_v63, %v5389_v6 }
 0x140   : > { %v392_v25 = vpop.f32.mrf.mxu0  ;;  %v440_v30 = vpop.f32.mrf.mxu1  ;;  %v5464_v62 = vrot.slane %v5254_v7, %v5389_v6  ;;  %v1843_v60 = vcombine.high %v5294_v23, %v6842_v0  ;;  %v1251_v61 = vcombine.high %v5280_v18, %v6842_v0  ;;  %v5509_v9 = vrot.slane %v5270_v15, %v5389_v6 }
 0x141   : > { %481 = vrot.lane.b32.xlu1 %v5260_v11, %s5021_s24  ;;  %479 = vrot.lane.b32.xlu0 %v5267_v12, %s5021_s24  ;;  %v5327_v36 = vadd.f32 %v392_v25, %v5237_v1  ;;  %v5337_v41 = vadd.f32 %v440_v30, %v5237_v1  ;;  %v5411_v25 = vrot.slane %v525_v10, %v5389_v6 }
 0x142   : > { %v396_v29 = vpop.f32.mrf.mxu0  ;;  %v444_v33 = vpop.f32.mrf.mxu1  ;;  %v5430_v30 = vrot.slane %v5267_v12, %v5389_v6  ;;  %v657_v12 = vcombine.high %v5260_v11, %v6842_v0  ;;  %v5525_v14 = vrot.slane %v5294_v23, %v5389_v6 }
 0x143   : > { %v5310_v31 = vadd.f32 %v396_v29, %v5223_v53  ;;  %v5320_v34 = vadd.f32 %v444_v33, %v5223_v53  ;;  %v1711_v33 = vcombine.high %v5244_v3, %v6842_v0 }
 0x144   : > { %v398_v35 = vpop.f32.mrf.mxu0  ;;  %v446_v37 = vpop.f32.mrf.mxu1  ;;  %v5485_v59 = vrot.slane %v657_v12, %v5389_v6  ;;  %v5548_v12 = vrot.slane %v5302_v27, %v5389_v6 }
 0x145   : > { %483 = vrot.lane.b32.xlu1 %v5270_v15, %s5021_s24  ;;  %497 = vrot.lane.b32.xlu0 %v5275_v16, %s5021_s24  ;;  %v5334_v40 = vadd.f32 %v398_v35, %v5237_v1  ;;  %v5347_v45 = vadd.f32 %v446_v37, %v5237_v1  ;;  %v5437_v35 = vrot.slane %v1645_v13, %v5389_v6 }
 0x146   : > { %v402_v38 = vpop.f32.mrf.mxu0  ;;  %v450_v39 = vpop.f32.mrf.mxu1  ;;  %v5449_v37 = vrot.slane %v591_v21, %v5389_v6  ;;  %v789_v13 = vcombine.high %v5302_v27, %v6842_v0  ;;  %v1317_v21 = vcombine.high %v5315_v32, %v6842_v0 }
 0x147   : > { %v5342_v43 = vadd.f32 %v402_v38, %v5223_v53  ;;  %v5357_v48 = vadd.f32 %v450_v39, %v5223_v53  ;;  %v5452_v38 = vrot.slane %v1119_v22, %v5389_v6  ;;  %v1777_v39 = vcombine.high %v5287_v20, %v6842_v0 }
 0x148   : > { %v404_v42 = vpop.f32.mrf.mxu0  ;;  %v452_v44 = vpop.f32.mrf.mxu1  ;;  %v5532_v22 = vrot.slane %v1843_v60, %v5389_v6 }
 0x149   : > { %499 = vrot.lane.b32.xlu1 %v5280_v18, %s5021_s24  ;;  %1601 = vrot.lane.b32.xlu0 %v5287_v20, %s5021_s24  ;;  %v5367_v52 = vadd.f32 %v404_v42, %v5237_v1  ;;  %v5372_v55 = vadd.f32 %v452_v44, %v5237_v1  ;;  %v1185_v42 = vcombine.high %v5275_v16, %v6842_v0 }
 0x14a   : > { %v408_v46 = vpop.f32.mrf.mxu0  ;;  %v456_v49 = vpop.f32.mrf.mxu1  ;;  %v5460_v44 = vrot.slane %v5244_v3, %v5389_v6  ;;  %v723_v3 = vcombine.high %v5270_v15, %v6842_v0  ;;  %v5496_v2 = vrot.slane %v1777_v39, %v5389_v6  ;;  %v1909_v15 = vcombine.high %v5327_v36, %v6842_v0 }
 0x14b   : > { %v5350_v47 = vadd.f32 %v408_v46, %v5223_v53  ;;  %v5362_v51 = vadd.f32 %v456_v49, %v5223_v53  ;;  %v5468_v46 = vrot.slane %v5260_v11, %v5389_v6  ;;  %v2305_v49 = vcombine.high %v5297_v24, %v6842_v0 }
 0x14c   : > { %v410_v54 = vpop.f32.mrf.mxu0  ;;  %v458_v57 = vpop.f32.mrf.mxu1  ;;  %v5489_v11 = vrot.slane %v5287_v20, %v5389_v6  ;;  %v5499_v5 = vrot.slane %v1185_v42, %v5389_v6  ;;  %v2371_v20 = vcombine.high %v5307_v28, %v6842_v0  ;;  %v855_v39 = vcombine.high %v5310_v31, %v6842_v0 }
 0x14d   : > { %1603 = vrot.lane.b32.xlu1 %v5294_v23, %s5021_s24  ;;  %1617 = vrot.lane.b32.xlu0 %v5297_v24, %s5021_s24  ;;  %v5377_v53 = vadd.f32 %v410_v54, %v5237_v1  ;;  %v5382_v58 = vadd.f32 %v458_v57, %v5237_v1  ;;  %v1053_v1 = vcombine.high %v5235_v63, %v6842_v0 }
 0x14e   : > { %v2239_v63 = vcombine.high %v5254_v7, %v6842_v0  ;;  %v5473_v54 = vrot.slane %v1711_v33, %v5389_v6  ;;  %v5482_v7 = vrot.slane %v5275_v16, %v5389_v6  ;;  %v5503_v16 = vrot.slane %v5297_v24, %v5389_v6 }
 0x14f   : > { %v5418_v29 = vrot.slane %v1053_v1, %v5389_v6  ;;  %v5512_v10 = vrot.slane %v2305_v49, %v5389_v6  ;;  %v5516_v1 = vrot.slane %v5280_v18, %v5389_v6  ;;  %v5521_v24 = vrot.slane %v723_v3, %v5389_v6 }
 0x150   : > { %v5476_v57 = vrot.slane %v2239_v63, %v5389_v6  ;;  %v5535_v18 = vrot.slane %v1251_v61, %v5389_v6  ;;  %v5539_v33 = vrot.slane %v5307_v28, %v5389_v6  ;;  %v2437_v23 = vcombine.high %v5337_v41, %v6842_v0 }
 0x151   : > { %1619 = vrot.lane.b32.xlu1 %v5307_v28, %s5021_s24  ;;  %485 = vrot.lane.b32.xlu0 %v5302_v27, %s5021_s24  ;;  %v5544_v63 = vrot.slane %v2371_v20, %v5389_v6  ;;  %v5554_v42 = vrot.slane %v5315_v32, %v5389_v6  ;;  %v5557_v28 = vrot.slane %v789_v13, %v5389_v6 }
 0x152   : > { %v5561_v49 = vrot.slane %v5327_v36, %v5389_v6  ;;  %v1975_v3 = vcombine.high %v5334_v40, %v6842_v0  ;;  %v1383_v27 = vcombine.high %v5320_v34, %v6842_v0  ;;  %v5568_v60 = vrot.slane %v1909_v15, %v5389_v6 }
 0x153   : > { %6884 = vst [vmem:[#allocation12_spill] sm:$0xff] %v5554_v42  ;;  %6885 = vst [vmem:[#allocation13_spill] sm:$0xff] %v5557_v28  ;;  %v5571_v61 = vrot.slane %v1317_v21, %v5389_v6  ;;  %v5581_v20 = vrot.slane %v5310_v31, %v5389_v6  ;;  %v5584_v13 = vrot.slane %v2437_v23, %v5389_v6 }
 0x154   : > { %6886 = vst [vmem:[#allocation14_spill] sm:$0xff] %v5561_v49  ;;  %6887 = vst [vmem:[#allocation15_spill] sm:$0xff] %v5568_v60  ;;  %v921_v15 = vcombine.high %v5342_v43, %v6842_v0  ;;  %v1449_v21 = vcombine.high %v5357_v48, %v6842_v0  ;;  %v2569_v23 = vcombine.high %v5372_v55, %v6842_v0  ;;  %v6900_v49 = vmov 0.0  }
 0x155   : > { %487 = vrot.lane.b32.xlu1 %v5310_v31, %s5021_s24  ;;  %501 = vrot.lane.b32.xlu0 %v5315_v32, %s5021_s24  ;;  %6888 = vst [vmem:[#allocation16_spill] sm:$0xff] %v5571_v61  ;;  %v5575_v32 = vrot.slane %v5337_v41, %v5389_v6  ;;  %6890 = vst [vmem:[#allocation18_spill] sm:$0xff] %v5581_v20  ;;  %v2041_v31 = vcombine.high %v5367_v52, %v6842_v0 }
 0x156   : > { %6891 = vst [vmem:[#allocation19_spill] sm:$0xff] %v5584_v13  ;;  %v5603_v13 = vrot.slane %v5334_v40, %v5389_v6  ;;  %v5606_v20 = vrot.slane %v1975_v3, %v5389_v6  ;;  %v5626_v3 = vrot.slane %v5357_v48, %v5389_v6 }
 0x157   : > { %6889 = vst [vmem:[#allocation17_spill] sm:$0xff] %v5575_v32  ;;  %v5595_v32 = vrot.slane %v5320_v34, %v5389_v6 }
 0x158   : > { %6894 = vst [vmem:[#allocation22_spill] sm:$0xff] %v5603_v13  ;;  %6895 = vst [vmem:[#allocation23_spill] sm:$0xff] %v5606_v20 }
 0x159   : > { %503 = vrot.lane.b32.xlu1 %v5320_v34, %s5021_s24  ;;  %1605 = vrot.lane.b32.xlu0 %v5327_v36, %s5021_s24  ;;  %v2503_v36 = vcombine.high %v5347_v45, %v6842_v0  ;;  %6893 = vst [vmem:[#allocation21_spill] sm:$0xff] %v5595_v32  ;;  %v5613_v34 = vrot.slane %v5347_v45, %v5389_v6  ;;  %6901 = vst [vmem:[#allocation28_spill] sm:$0xff] %v5626_v3 }
 0x15a   : > { %v5620_v0 = vrot.slane %v5342_v43, %v5389_v6 }
 0x15b   : > { %6897 = vst [vmem:[#allocation25_spill] sm:$0xff] %v5613_v34 }
 0x15c   : > { %6899 = vst [vmem:[#allocation27_spill] sm:$0xff] %v5620_v0 }
 0x15d   : > { %1607 = vrot.lane.b32.xlu1 %v5334_v40, %s5021_s24  ;;  %1621 = vrot.lane.b32.xlu0 %v5337_v41, %s5021_s24  ;;  %v5591_v41 = vrot.slane %v855_v39, %v5389_v6  ;;  %v5609_v39 = vrot.slane %v1383_v27, %v5389_v6  ;;  %v987_v40 = vcombine.high %v5350_v47, %v6900_v49 }
 0x15e   : > { %v5629_v27 = vrot.slane %v921_v15, %v5389_v6  ;;  %v5650_v15 = vrot.slane %v2569_v23, %v5389_v6 }
 0x15f   : > { %6892 = vst [vmem:[#allocation20_spill] sm:$0xff] %v5591_v41  ;;  %6896 = vst [vmem:[#allocation24_spill] sm:$0xff] %v5609_v39  ;;  %v5616_v41 = vrot.slane %v2503_v36, %v5389_v6  ;;  %v5636_v36 = vrot.slane %v1449_v21, %v5389_v6 }
 0x160   : > { %6902 = vst [vmem:[#allocation29_spill] sm:$0xff] %v5629_v27  ;;  %6908 = vst [vmem:[#allocation35_spill] sm:$0xff] %v5650_v15 }
 0x161   : > { %1623 = vrot.lane.b32.xlu1 %v5347_v45, %s5021_s24  ;;  %489 = vrot.lane.b32.xlu0 %v5342_v43, %s5021_s24  ;;  %6898 = vst [vmem:[#allocation26_spill] sm:$0xff] %v5616_v41  ;;  %v5633_v45 = vrot.slane %v5367_v52, %v5389_v6  ;;  %6904 = vst [vmem:[#allocation31_spill] sm:$0xff] %v5636_v36  ;;  %v5640_v43 = vrot.slane %v5372_v55, %v5389_v6 }
 0x162   : > { %v5643_v41 = vrot.slane %v2041_v31, %v5389_v6 }
 0x163   : > { %6903 = vst [vmem:[#allocation30_spill] sm:$0xff] %v5633_v45  ;;  %6905 = vst [vmem:[#allocation32_spill] sm:$0xff] %v5640_v43 }
 0x164   : > { %6906 = vst [vmem:[#allocation33_spill] sm:$0xff] %v5643_v41  ;;  %v5661_v41 = vrot.slane %v987_v40, %v5389_v6 }
 0x165   : > { %491 = vrot.lane.b32.xlu1 %v5350_v47, %s5021_s24  ;;  %505 = vrot.lane.b32.xlu0 %v5357_v48, %s5021_s24  ;;  %v5647_v48 = vrot.slane %v5350_v47, %v5389_v6  ;;  %v5665_v47 = vrot.slane %v5362_v51, %v5389_v6 }
 0x166   : > { %6909 = vst [vmem:[#allocation36_spill] sm:$0xff] %v5661_v41 }
 0x167   : > { %6907 = vst [vmem:[#allocation34_spill] sm:$0xff] %v5647_v48  ;;  %6910 = vst [vmem:[#allocation37_spill] sm:$0xff] %v5665_v47 }
 0x169   : > { %507 = vrot.lane.b32.xlu1 %v5362_v51, %s5021_s24  ;;  %1609 = vrot.lane.b32.xlu0 %v5367_v52, %s5021_s24  ;;  %v5654_v52 = vcombine.high %v5362_v51, %v6900_v49 }
 0x16d   : > { %1611 = vrot.lane.b32.xlu1 %v5377_v53, %s5021_s24  ;;  %1625 = vrot.lane.b32.xlu0 %v5372_v55, %s5021_s24 }
 0x171   : > { %1627 = vrot.lane.b32.xlu1 %v5382_v58, %s5021_s24 }
 0x1a3   : > { %v478_v60 = vpop.permute.xlu0 %477 }
 0x1a4   : > { %v540_v23 = vcombine.high %v478_v60, %v6900_v49  ;;  %v5669_v15 = vrot.slane %v478_v60, %v5389_v6 }
 0x1a7   : > { %v496_v0 = vpop.permute.xlu1 %495  ;;  %v494_v21 = vpop.permute.xlu0 %493 }
 0x1a8   : > { %v1134_v45 = vcombine.high %v496_v0, %v6900_v49  ;;  %v1141_v55 = vrot.slane %v496_v0, %v5389_v6  ;;  %v1068_v43 = vcombine.high %v494_v21, %v6900_v49  ;;  %v1075_v31 = vrot.slane %v494_v21, %v5389_v6 }
 0x1aa   : > { %v1148_v36 = vrot.slane %v1134_v45, %v5389_v6  ;;  %v1149_v0 = vcombine.low %v5444_v8, %v1141_v55  ;;  %v1150_v3 = vcombine.high %v5444_v8, %v1141_v55  ;;  %v1082_v21 = vrot.slane %v1068_v43, %v5389_v6 }
 0x1ab   : > { %v1600_v48 = vpop.permute.xlu1 %1599  ;;  %v1083_v40 = vcombine.low %v5415_v26, %v1075_v31  ;;  %v1084_v41 = vcombine.high %v5415_v26, %v1075_v31  ;;  %v1598_v27 = vpop.permute.xlu0 %1597 }
 0x1ac   : > { %v1726_v51 = vcombine.high %v1600_v48, %v6900_v49  ;;  %v1733_v47 = vrot.slane %v1600_v48, %v5389_v6  ;;  %v5680_v60 = vrot.slane %v1149_v0, %v5404_v19  ;;  %v5683_v45 = vrot.slane %v1150_v3, %v5404_v19 }
 0x1ad   : > { %v1165_v8 = vcombine.low %v5452_v38, %v1148_v36  ;;  %v1166_v43 = vcombine.high %v5452_v38, %v1148_v36  ;;  %v5688_v55 = vrot.slane %v1083_v40, %v5404_v19  ;;  %v5691_v26 = vrot.slane %v1084_v41, %v5404_v19 }
 0x1ae   : > { %v1099_v31 = vcombine.low %v5418_v29, %v1082_v21  ;;  %v1100_v48 = vcombine.high %v5418_v29, %v1082_v21  ;;  %v5717_v40 = vcombine.high %v5377_v53, %v6900_v49  ;;  %v1740_v20 = vrot.slane %v1726_v51, %v5389_v6 }
 0x1af   : > { %v5696_v0 = vrot.slane %v1165_v8, %v5404_v19  ;;  %v5699_v3 = vrot.slane %v1166_v43, %v5404_v19  ;;  %v5720_v8 = vrot.slane %v540_v23, %v5389_v6  ;;  %v1614_v38 = vpop.permute.xlu0 %1613  ;;  %v1741_v43 = vcombine.low %v5460_v44, %v1733_v47 }
 0x1b0   : > { %v5706_v36 = vrot.slane %v1099_v31, %v5404_v19  ;;  %v5709_v41 = vrot.slane %v1100_v48, %v5404_v19  ;;  %v1616_v48 = vpop.permute.xlu1 %1615  ;;  %v1742_v31 = vcombine.high %v5460_v44, %v1733_v47  ;;  %v2188_v13 = vcombine.high %v1614_v38, %v6900_v49 }
 0x1b1   : > { %6911 = vst [vmem:[#allocation38_spill] sm:$0xff] %v5696_v0  ;;  %6912 = vst [vmem:[#allocation39_spill] sm:$0xff] %v5699_v3  ;;  %v1660_v3 = vcombine.high %v1598_v27, %v6900_v49  ;;  %v1667_v0 = vrot.slane %v1598_v27, %v5389_v6  ;;  %v2254_v29 = vcombine.high %v1616_v48, %v6900_v49 }
 0x1b2   : > { %6913 = vst [vmem:[#allocation40_spill] sm:$0xff] %v5706_v36  ;;  %6914 = vst [vmem:[#allocation41_spill] sm:$0xff] %v5709_v41  ;;  %v2261_v21 = vrot.slane %v1616_v48, %v5389_v6  ;;  %v1749_v34 = vrot.slane %v1741_v43, %v5404_v19  ;;  %v1756_v23 = vrot.slane %v1742_v31, %v5404_v19 }
 0x1b3   : > { %v1757_v51 = vcombine.low %v5473_v54, %v1740_v20  ;;  %v1758_v41 = vcombine.high %v5473_v54, %v1740_v20  ;;  %v1674_v44 = vrot.slane %v1660_v3, %v5389_v6  ;;  %v1675_v47 = vcombine.low %v5422_v50, %v1667_v0 }
 0x1b4   : > { %v1676_v27 = vcombine.high %v5422_v50, %v1667_v0  ;;  %v2268_v36 = vrot.slane %v2254_v29, %v5389_v6  ;;  %v3631_v32 = vcombine.low %v1749_v34, %v1756_v23  ;;  %v4751_v43 = vcombine.high %v1749_v34, %v1756_v23 }
 0x1b5   : > { %v1765_v48 = vrot.slane %v1757_v51, %v5404_v19  ;;  %v1772_v39 = vrot.slane %v1758_v41, %v5404_v19  ;;  %v1683_v31 = vrot.slane %v1675_v47, %v5404_v19  ;;  %v1691_v54 = vcombine.low %v5437_v35, %v1674_v44 }
 0x1b6   : > { %v1690_v61 = vrot.slane %v1676_v27, %v5404_v19  ;;  %v1692_v20 = vcombine.high %v5437_v35, %v1674_v44  ;;  %v3638_v3 = vrot.slane %v3631_v32, %v5389_v6  ;;  %v3646_v50 = vrot.slane %v4751_v43, %v5389_v6 }
 0x1b7   : > { %v3647_v0 = vcombine.low %v1765_v48, %v1772_v39  ;;  %v4752_v29 = vcombine.high %v1765_v48, %v1772_v39  ;;  %v1699_v41 = vrot.slane %v1691_v54, %v5404_v19  ;;  %v2269_v35 = vcombine.low %v5464_v62, %v2261_v21 }
 0x1b8   : > { %v1706_v34 = vrot.slane %v1692_v20, %v5404_v19  ;;  %v3581_v23 = vcombine.low %v1683_v31, %v1690_v61  ;;  %v4749_v51 = vcombine.high %v1683_v31, %v1690_v61  ;;  %v3663_v42 = vcombine.low %v3638_v3, %v3646_v50 }
 0x1b9   : > { %v3654_v47 = vrot.slane %v3647_v0, %v5389_v6  ;;  %v3662_v27 = vrot.slane %v4752_v29, %v5389_v6  ;;  %v2270_v54 = vcombine.high %v5464_v62, %v2261_v21  ;;  %v2277_v61 = vrot.slane %v2269_v35, %v5404_v19 }
 0x1ba   : > { %v3588_v32 = vrot.slane %v3581_v23, %v5389_v6  ;;  %v3596_v44 = vrot.slane %v4749_v51, %v5389_v6  ;;  %v3597_v43 = vcombine.low %v1699_v41, %v1706_v34  ;;  %v4750_v28 = vcombine.high %v1699_v41, %v1706_v34 }
 0x1bb   : > { %v3670_v39 = vrot.slane %v3663_v42, %v5404_v19  ;;  %v3671_v48 = vcombine.low %v3654_v47, %v3662_v27  ;;  %v2285_v50 = vcombine.low %v5476_v57, %v2268_v36  ;;  %v2284_v29 = vrot.slane %v2270_v54, %v5404_v19 }
 0x1bc   : > { %v3604_v31 = vrot.slane %v3597_v43, %v5389_v6  ;;  %v3612_v20 = vrot.slane %v4750_v28, %v5389_v6  ;;  %v3613_v3 = vcombine.low %v3588_v32, %v3596_v44  ;;  %v2286_v41 = vcombine.high %v5476_v57, %v2268_v36 }
 0x1bd   : > { %v3678_v0 = vrot.slane %v3671_v48, %v5404_v19  ;;  %v2195_v42 = vrot.slane %v1614_v38, %v5389_v6  ;;  %v2293_v21 = vrot.slane %v2285_v50, %v5404_v19  ;;  %v2202_v23 = vrot.slane %v2188_v13, %v5389_v6 }
 0x1be   : > { %v3620_v34 = vrot.slane %v3613_v3, %v5404_v19  ;;  %v3621_v62 = vcombine.low %v3604_v31, %v3612_v20  ;;  %v2300_v47 = vrot.slane %v2286_v41, %v5404_v19  ;;  %v4031_v27 = vcombine.low %v2277_v61, %v2284_v29 }
 0x1bf   : > { %v3679_v51 = vcombine.low %v3670_v39, %v3678_v0  ;;  %v3680_v28 = vcombine.high %v3670_v39, %v3678_v0  ;;  %v4767_v32 = vcombine.high %v2277_v61, %v2284_v29  ;;  %v2203_v44 = vcombine.low %v5426_v56, %v2195_v42  ;;  %v482_v39 = vpop.permute.xlu1 %481 }
 0x1c0   : > { %v3628_v35 = vrot.slane %v3621_v62, %v5404_v19  ;;  %v2204_v57 = vcombine.high %v5426_v56, %v2195_v42  ;;  %v4038_v13 = vrot.slane %v4031_v27, %v5389_v6  ;;  %v4047_v38 = vcombine.low %v2293_v21, %v2300_v47 }
 0x1c1   : > { %4383 = vst.msk [vmem:[%s5783_s28 + $0x8] sm:$0xff] %vm4381_vm0, %v3679_v51  ;;  %4399 = vst.msk [vmem:[%s5783_s28 + $0x88] sm:$0xff] %vm4381_vm0, %v3680_v28  ;;  %v4768_v36 = vcombine.high %v2293_v21, %v2300_v47  ;;  %v2219_v43 = vcombine.low %v5440_v4, %v2202_v23  ;;  %v4046_v56 = vrot.slane %v4767_v32, %v5389_v6 }
 0x1c2   : > { %v3629_v48 = vcombine.low %v3620_v34, %v3628_v35  ;;  %v3630_v54 = vcombine.high %v3620_v34, %v3628_v35  ;;  %v2211_v61 = vrot.slane %v2203_v44, %v5404_v19  ;;  %v4054_v31 = vrot.slane %v4047_v38, %v5389_v6 }
 0x1c3   : > { %v4062_v20 = vrot.slane %v4768_v36, %v5389_v6  ;;  %v2218_v3 = vrot.slane %v2204_v57, %v5404_v19  ;;  %v2220_v50 = vcombine.high %v5440_v4, %v2202_v23  ;;  %v6915_v0 = vcombine.low %v5401_v17, %v5669_v15 }
 0x1c4   : > { %4382 = vst.msk [vmem:[%s5783_s28] sm:$0xff] %vm4381_vm0, %v3629_v48  ;;  %4398 = vst.msk [vmem:[%s5783_s28 + $0x80] sm:$0xff] %vm4381_vm0, %v3630_v54  ;;  %v4063_v41 = vcombine.low %v4038_v13, %v4046_v56  ;;  %v2227_v42 = vrot.slane %v2219_v43, %v5404_v19  ;;  %v679_v34 = vrot.slane %v482_v39, %v5389_v6  ;;  %v480_v43 = vpop.permute.xlu0 %479 }
 0x1c5   : > { %v563_v29 = vrot.slane %v6915_v0, %v5404_v19  ;;  %v4071_v62 = vcombine.low %v4054_v31, %v4062_v20  ;;  %v2234_v21 = vrot.slane %v2220_v50, %v5404_v19  ;;  %v3981_v51 = vcombine.low %v2211_v61, %v2218_v3 }
 0x1c6   : > { %v4765_v28 = vcombine.high %v2211_v61, %v2218_v3  ;;  %v6916_v4 = vcombine.high %v5401_v17, %v5669_v15  ;;  %v571_v47 = vcombine.low %v5411_v25, %v5720_v8  ;;  %v4070_v27 = vrot.slane %v4063_v41, %v5404_v19 }
 0x1c7   : > { %v672_v35 = vcombine.high %v482_v39, %v6900_v49  ;;  %v4078_v32 = vrot.slane %v4071_v62, %v5404_v19  ;;  %v3988_v44 = vrot.slane %v3981_v51, %v5389_v6  ;;  %v3997_v13 = vcombine.low %v2227_v42, %v2234_v21 }
 0x1c8   : > { %v570_v23 = vrot.slane %v6916_v4, %v5404_v19  ;;  %v3996_v57 = vrot.slane %v4765_v28, %v5389_v6  ;;  %v572_v17 = vcombine.high %v5411_v25, %v5720_v8  ;;  %v4766_v15 = vcombine.high %v2227_v42, %v2234_v21 }
 0x1c9   : > { %v687_v38 = vcombine.low %v5468_v46, %v679_v34  ;;  %v688_v36 = vcombine.high %v5468_v46, %v679_v34  ;;  %v4079_v48 = vcombine.low %v4070_v27, %v4078_v32  ;;  %v4080_v39 = vcombine.high %v4070_v27, %v4078_v32 }
 0x1ca   : > { %v4004_v54 = vrot.slane %v3997_v13, %v5389_v6  ;;  %v4013_v56 = vcombine.low %v3988_v44, %v3996_v57  ;;  %v5826_v61 = vrot.slane %v5377_v53, %v5389_v6  ;;  %v2701_v31 = vcombine.low %v563_v29, %v570_v23  ;;  %v484_v13 = vpop.permute.xlu1 %483 }
 0x1cb   : > { %v4717_v20 = vcombine.high %v563_v29, %v570_v23  ;;  %v4012_v3 = vrot.slane %v4766_v15, %v5389_v6  ;;  %v5831_v25 = vrot.slane %v5654_v52, %v5389_v6  ;;  %4391 = vst.msk [vmem:[%s5783_s28 + $0x48] sm:$0xff] %vm4381_vm0, %v4079_v48  ;;  %4407 = vst.msk [vmem:[%s5783_s28 + $0xc8] sm:$0xff] %vm4381_vm0, %v4080_v39  ;;  %v498_v39 = vpop.permute.xlu0 %497 }
 0x1cc   : > { %v686_v46 = vrot.slane %v672_v35, %v5389_v6  ;;  %v606_v8 = vcombine.high %v480_v43, %v6900_v49  ;;  %v613_v50 = vrot.slane %v480_v43, %v5389_v6  ;;  %v2635_v53 = vcombine.high %v5382_v58, %v6900_v49 }
 0x1cd   : > { %v579_v0 = vrot.slane %v571_v47, %v5404_v19  ;;  %v586_v29 = vrot.slane %v572_v17, %v5404_v19  ;;  %v4021_v41 = vcombine.low %v4004_v54, %v4012_v3  ;;  %v4020_v52 = vrot.slane %v4013_v56, %v5404_v19 }
 0x1ce   : > { %v695_v42 = vrot.slane %v687_v38, %v5404_v19  ;;  %v702_v34 = vrot.slane %v688_v36, %v5404_v19  ;;  %v621_v62 = vcombine.low %v5430_v30, %v613_v50  ;;  %v622_v51 = vcombine.high %v5430_v30, %v613_v50 }
 0x1cf   : > { %v4028_v21 = vrot.slane %v4021_v41, %v5404_v19  ;;  %v2708_v28 = vrot.slane %v2701_v31, %v5389_v6  ;;  %v2716_v4 = vrot.slane %v4717_v20, %v5389_v6  ;;  %v5854_v23 = vrot.slane %v5717_v40, %v5389_v6 }
 0x1d0   : > { %v5858_v47 = vrot.slane %v5382_v58, %v5389_v6  ;;  %v703_v27 = vcombine.low %v5485_v59, %v686_v46  ;;  %v620_v35 = vrot.slane %v606_v8, %v5389_v6  ;;  %v2717_v44 = vcombine.low %v579_v0, %v586_v29 }
 0x1d1   : > { %v4029_v32 = vcombine.low %v4020_v52, %v4028_v21  ;;  %v4030_v30 = vcombine.high %v4020_v52, %v4028_v21  ;;  %v4718_v57 = vcombine.high %v579_v0, %v586_v29  ;;  %v5863_v17 = vrot.slane %v2635_v53, %v5389_v6 }
 0x1d2   : > { %v704_v15 = vcombine.high %v5485_v59, %v686_v46  ;;  %v2801_v40 = vcombine.low %v695_v42, %v702_v34  ;;  %v629_v38 = vrot.slane %v621_v62, %v5404_v19  ;;  %v636_v58 = vrot.slane %v622_v51, %v5404_v19  ;;  %v500_v51 = vpop.permute.xlu1 %499 }
 0x1d3   : > { %4390 = vst.msk [vmem:[%s5783_s28 + $0x40] sm:$0xff] %vm4381_vm0, %v4029_v32  ;;  %4406 = vst.msk [vmem:[%s5783_s28 + $0xc0] sm:$0xff] %vm4381_vm0, %v4030_v30  ;;  %v2724_v36 = vrot.slane %v2717_v44, %v5389_v6  ;;  %v2732_v43 = vrot.slane %v4718_v57, %v5389_v6  ;;  %v2733_v48 = vcombine.low %v2708_v28, %v2716_v4 }
 0x1d4   : > { %v6917_v54 = vcombine.low %v5680_v60, %v5683_v45  ;;  %v6918_v56 = vcombine.high %v5680_v60, %v5683_v45  ;;  %v6919_v20 = vcombine.low %v5688_v55, %v5691_v26  ;;  %v6920_v46 = vcombine.high %v5688_v55, %v5691_v26 }
 0x1d5   : > { %v5899_v50 = vrot.slane %v703_v27, %v5404_v19  ;;  %v637_v53 = vcombine.low %v5449_v37, %v620_v35  ;;  %v638_v60 = vcombine.high %v5449_v37, %v620_v35  ;;  %v2741_v45 = vcombine.low %v2724_v36, %v2732_v43 }
 0x1d6   : > { %v5878_v59 = vrot.slane %v6917_v54, %v5389_v6  ;;  %v5884_v31 = vrot.slane %v6918_v56, %v5389_v6  ;;  %v5890_v3 = vrot.slane %v6919_v20, %v5389_v6  ;;  %v5896_v8 = vrot.slane %v6920_v46, %v5389_v6 }
 0x1d7   : > { %v5904_v0 = vrot.slane %v704_v15, %v5404_v19  ;;  %v4721_v29 = vcombine.high %v695_v42, %v702_v34  ;;  %v1200_v41 = vcombine.high %v498_v39, %v6900_v49  ;;  %v1207_v52 = vrot.slane %v498_v39, %v5389_v6  ;;  %v1602_v39 = vpop.permute.xlu0 %1601 }
 0x1d8   : > { %v5909_v55 = vrot.slane %v2801_v40, %v5389_v6  ;;  %v2751_v26 = vcombine.low %v629_v38, %v636_v58  ;;  %v2740_v62 = vrot.slane %v2733_v48, %v5404_v19  ;;  %v2748_v21 = vrot.slane %v2741_v45, %v5404_v19 }
 0x1d9   : > { %v4719_v28 = vcombine.high %v629_v38, %v636_v58  ;;  %v1214_v37 = vrot.slane %v1200_v41, %v5389_v6  ;;  %v1215_v4 = vcombine.low %v5482_v7, %v1207_v52  ;;  %v1216_v42 = vcombine.high %v5482_v7, %v1207_v52 }
 0x1da   : > { %v5917_v34 = vrot.slane %v637_v53, %v5404_v19  ;;  %v5920_v27 = vrot.slane %v638_v60, %v5404_v19  ;;  %v2750_v35 = vcombine.high %v2740_v62, %v2748_v21  ;;  %v2749_v32 = vcombine.low %v2740_v62, %v2748_v21  ;;  %v1604_v62 = vpop.permute.xlu1 %1603 }
 0x1db   : > { %v5923_v30 = vrot.slane %v1215_v4, %v5404_v19  ;;  %v5926_v44 = vrot.slane %v1216_v42, %v5404_v19  ;;  %v1266_v57 = vcombine.high %v500_v51, %v6900_v49  ;;  %v1273_v15 = vrot.slane %v500_v51, %v5389_v6 }
 0x1dc   : > { %v5931_v7 = vrot.slane %v4721_v29, %v5389_v6  ;;  %3533 = vxpose.xlu1.b32.start [1/16] (narrow) %v2750_v35, 64  ;;  %3501 = vxpose.xlu0.b32.start [1/16] (narrow) %v2749_v32, 64  ;;  %v738_v40 = vcombine.high %v484_v13, %v6900_v49  ;;  %v1231_v38 = vcombine.low %v5499_v5, %v1214_v37 }
 0x1dd   : > { %v5936_v58 = vrot.slane %v2751_v26, %v5389_v6  ;;  %v5939_v36 = vrot.slane %v4719_v28, %v5389_v6  ;;  %v1232_v43 = vcombine.high %v5499_v5, %v1214_v37  ;;  %v2767_v54 = vcombine.low %v5917_v34, %v5920_v27 }
 0x1de   : > { %v4720_v56 = vcombine.high %v5917_v34, %v5920_v27  ;;  %v5949_v20 = vrot.slane %v1231_v38, %v5404_v19  ;;  %v5954_v53 = vrot.slane %v484_v13, %v5389_v6  ;;  %v1280_v60 = vrot.slane %v1266_v57, %v5389_v6  ;;  %v1618_v13 = vpop.permute.xlu0 %1617 }
 0x1df   : > { %v5957_v5 = vrot.slane %v1232_v43, %v5404_v19  ;;  %v1281_v45 = vcombine.low %v5516_v1, %v1273_v15  ;;  %v5962_v29 = vrot.slane %v738_v40, %v5389_v6  ;;  %v1282_v41 = vcombine.high %v5516_v1, %v1273_v15 }
 0x1e0   : > { %v1792_v52 = vcombine.high %v1602_v39, %v6900_v49  ;;  %v1799_v26 = vrot.slane %v1602_v39, %v5389_v6  ;;  %v1297_v28 = vcombine.low %v5535_v18, %v1280_v60  ;;  %v1298_v1 = vcombine.high %v5535_v18, %v1280_v60 }
 0x1e1   : > { %v5972_v51 = vrot.slane %v1281_v45, %v5404_v19  ;;  %v5976_v37 = vrot.slane %v1282_v41, %v5404_v19  ;;  %v1858_v57 = vcombine.high %v1604_v62, %v6900_v49  ;;  %v1865_v15 = vrot.slane %v1604_v62, %v5389_v6 }
 0x1e2   : > { %v1806_v4 = vrot.slane %v1792_v52, %v5389_v6  ;;  %v1807_v42 = vcombine.low %v5489_v11, %v1799_v26  ;;  %v5982_v35 = vrot.slane %v1297_v28, %v5404_v19  ;;  %v1808_v32 = vcombine.high %v5489_v11, %v1799_v26 }
 0x1e3   : > { %v5988_v40 = vrot.slane %v1298_v1, %v5404_v19  ;;  %v1872_v45 = vrot.slane %v1858_v57, %v5389_v6  ;;  %v753_v41 = vcombine.low %v5509_v9, %v5954_v53  ;;  %v754_v52 = vcombine.high %v5509_v9, %v5954_v53 }
 0x1e4   : > { %v1815_v43 = vrot.slane %v1807_v42, %v5404_v19  ;;  %v1822_v39 = vrot.slane %v1808_v32, %v5404_v19  ;;  %v1823_v60 = vcombine.low %v5496_v2, %v1806_v4  ;;  %v1824_v11 = vcombine.high %v5496_v2, %v1806_v4 }
 0x1e5   : > { %v1873_v4 = vcombine.low %v5525_v14, %v1865_v15  ;;  %v1874_v32 = vcombine.high %v5525_v14, %v1865_v15  ;;  %v1889_v57 = vcombine.low %v5532_v22, %v1872_v45  ;;  %v1890_v21 = vcombine.high %v5532_v22, %v1872_v45 }
 0x1e6   : > { %v1831_v28 = vrot.slane %v1823_v60, %v5404_v19  ;;  %v1838_v1 = vrot.slane %v1824_v11, %v5404_v19  ;;  %v3681_v42 = vcombine.low %v1815_v43, %v1822_v39  ;;  %v4753_v2 = vcombine.high %v1815_v43, %v1822_v39 }
 0x1e7   : > { %v1881_v60 = vrot.slane %v1873_v4, %v5404_v19  ;;  %v1888_v11 = vrot.slane %v1874_v32, %v5404_v19  ;;  %v1897_v43 = vrot.slane %v1889_v57, %v5404_v19  ;;  %v1904_v39 = vrot.slane %v1890_v21, %v5404_v19  ;;  %v1620_v57 = vpop.permute.xlu1 %1619 }
 0x1e8   : > { %v3688_v26 = vrot.slane %v3681_v42, %v5389_v6  ;;  %v3696_v18 = vrot.slane %v4753_v2, %v5389_v6  ;;  %v3697_v62 = vcombine.low %v1831_v28, %v1838_v1  ;;  %v4754_v38 = vcombine.high %v1831_v28, %v1838_v1 }
 0x1e9   : > { %v2320_v45 = vcombine.high %v1618_v13, %v6900_v49  ;;  %v3731_v42 = vcombine.low %v1881_v60, %v1888_v11  ;;  %v4755_v46 = vcombine.high %v1881_v60, %v1888_v11  ;;  %v3747_v2 = vcombine.low %v1897_v43, %v1904_v39 }
 0x1ea   : > { %v3704_v14 = vrot.slane %v3697_v62, %v5389_v6  ;;  %v3712_v15 = vrot.slane %v4754_v38, %v5389_v6  ;;  %v3713_v22 = vcombine.low %v3688_v26, %v3696_v18  ;;  %v4756_v48 = vcombine.high %v1897_v43, %v1904_v39 }
 0x1eb   : > { %v2327_v4 = vrot.slane %v1618_v13, %v5389_v6  ;;  %v2334_v32 = vrot.slane %v2320_v45, %v5389_v6  ;;  %v3738_v21 = vrot.slane %v3731_v42, %v5389_v6  ;;  %v3746_v62 = vrot.slane %v4755_v46, %v5389_v6 }
 0x1ec   : > { %v3720_v28 = vrot.slane %v3713_v22, %v5404_v19  ;;  %v3721_v1 = vcombine.low %v3704_v14, %v3712_v15  ;;  %v3754_v38 = vrot.slane %v3747_v2, %v5389_v6  ;;  %v3762_v18 = vrot.slane %v4756_v48, %v5389_v6 }
 0x1ed   : > { %v2335_v60 = vcombine.low %v5503_v16, %v2327_v4  ;;  %v2336_v11 = vcombine.high %v5503_v16, %v2327_v4  ;;  %v2351_v13 = vcombine.low %v5512_v10, %v2334_v32  ;;  %v3763_v43 = vcombine.low %v3738_v21, %v3746_v62 }
 0x1ee   : > { %v3728_v26 = vrot.slane %v3721_v1, %v5404_v19  ;;  %v3771_v39 = vcombine.low %v3754_v38, %v3762_v18  ;;  %v2352_v14 = vcombine.high %v5512_v10, %v2334_v32  ;;  %v2386_v46 = vcombine.high %v1620_v57, %v6900_v49 }
 0x1ef   : > { %v2343_v48 = vrot.slane %v2335_v60, %v5404_v19  ;;  %v2350_v45 = vrot.slane %v2336_v11, %v5404_v19  ;;  %v3770_v42 = vrot.slane %v3763_v43, %v5404_v19  ;;  %v2359_v16 = vrot.slane %v2351_v13, %v5404_v19 }
 0x1f0   : > { %v3729_v15 = vcombine.low %v3720_v28, %v3728_v26  ;;  %v3730_v22 = vcombine.high %v3720_v28, %v3728_v26  ;;  %v3778_v2 = vrot.slane %v3771_v39, %v5404_v19  ;;  %v2366_v1 = vrot.slane %v2352_v14, %v5404_v19 }
 0x1f1   : > { %v4081_v10 = vcombine.low %v2343_v48, %v2350_v45  ;;  %v4769_v28 = vcombine.high %v2343_v48, %v2350_v45  ;;  %v2393_v4 = vrot.slane %v1620_v57, %v5389_v6  ;;  %v2400_v32 = vrot.slane %v2386_v46, %v5389_v6  ;;  %v486_v46 = vpop.permute.xlu0 %485 }
 0x1f2   : > { %4384 = vst.msk [vmem:[%s5783_s28 + $0x10] sm:$0xff] %vm4381_vm0, %v3729_v15  ;;  %4400 = vst.msk [vmem:[%s5783_s28 + $0x90] sm:$0xff] %vm4381_vm0, %v3730_v22  ;;  %v3779_v21 = vcombine.low %v3770_v42, %v3778_v2  ;;  %v3780_v62 = vcombine.high %v3770_v42, %v3778_v2  ;;  %v4097_v38 = vcombine.low %v2359_v16, %v2366_v1 }
 0x1f3   : > { %v4770_v18 = vcombine.high %v2359_v16, %v2366_v1  ;;  %v4088_v26 = vrot.slane %v4081_v10, %v5389_v6  ;;  %v4096_v60 = vrot.slane %v4769_v28, %v5389_v6  ;;  %v2401_v11 = vcombine.low %v5539_v33, %v2393_v4 }
 0x1f4   : > { %v2402_v13 = vcombine.high %v5539_v33, %v2393_v4  ;;  %4385 = vst.msk [vmem:[%s5783_s28 + $0x18] sm:$0xff] %vm4381_vm0, %v3779_v21  ;;  %4401 = vst.msk [vmem:[%s5783_s28 + $0x98] sm:$0xff] %vm4381_vm0, %v3780_v62  ;;  %v4104_v57 = vrot.slane %v4097_v38, %v5389_v6  ;;  %v2417_v39 = vcombine.low %v5544_v63, %v2400_v32 }
 0x1f5   : > { %v4112_v43 = vrot.slane %v4770_v18, %v5389_v6  ;;  %v2418_v14 = vcombine.high %v5544_v63, %v2400_v32  ;;  %v769_v15 = vcombine.low %v5521_v24, %v5962_v29  ;;  %v4113_v22 = vcombine.low %v4088_v26, %v4096_v60  ;;  %v502_v34 = vpop.permute.xlu0 %501 }
 0x1f6   : > { %v2409_v48 = vrot.slane %v2401_v11, %v5404_v19  ;;  %v2416_v33 = vrot.slane %v2402_v13, %v5404_v19  ;;  %v770_v45 = vcombine.high %v5521_v24, %v5962_v29  ;;  %v2425_v2 = vrot.slane %v2417_v39, %v5404_v19 }
 0x1f7   : > { %v4121_v42 = vcombine.low %v4104_v57, %v4112_v43  ;;  %v2432_v16 = vrot.slane %v2418_v14, %v5404_v19  ;;  %v804_v63 = vcombine.high %v486_v46, %v6900_v49  ;;  %v811_v28 = vrot.slane %v486_v46, %v5389_v6 }
 0x1f8   : > { %v4131_v1 = vcombine.low %v2409_v48, %v2416_v33  ;;  %v4771_v10 = vcombine.high %v2409_v48, %v2416_v33  ;;  %v4120_v4 = vrot.slane %v4113_v22, %v5404_v19  ;;  %v761_v24 = vrot.slane %v753_v41, %v5404_v19 }
 0x1f9   : > { %v4128_v32 = vrot.slane %v4121_v42, %v5404_v19  ;;  %v4147_v21 = vcombine.low %v2425_v2, %v2432_v16  ;;  %v4772_v62 = vcombine.high %v2425_v2, %v2432_v16  ;;  %v768_v29 = vrot.slane %v754_v52, %v5404_v19 }
 0x1fa   : > { %v4138_v38 = vrot.slane %v4131_v1, %v5389_v6  ;;  %v4146_v18 = vrot.slane %v4771_v10, %v5389_v6  ;;  %v818_v43 = vrot.slane %v804_v63, %v5389_v6  ;;  %v819_v41 = vcombine.low %v5548_v12, %v811_v28 }
 0x1fb   : > { %v4129_v26 = vcombine.low %v4120_v4, %v4128_v32  ;;  %v4130_v60 = vcombine.high %v4120_v4, %v4128_v32  ;;  %v4154_v11 = vrot.slane %v4147_v21, %v5389_v6  ;;  %v4162_v13 = vrot.slane %v4772_v62, %v5389_v6 }
 0x1fc   : > { %v4163_v57 = vcombine.low %v4138_v38, %v4146_v18  ;;  %v820_v39 = vcombine.high %v5548_v12, %v811_v28  ;;  %v2817_v9 = vcombine.low %v5899_v50, %v5904_v0  ;;  %v2774_v52 = vrot.slane %v2767_v54, %v5389_v6 }
 0x1fd   : > { %4392 = vst.msk [vmem:[%s5783_s28 + $0x50] sm:$0xff] %vm4381_vm0, %v4129_v26  ;;  %4408 = vst.msk [vmem:[%s5783_s28 + $0xd0] sm:$0xff] %vm4381_vm0, %v4130_v60  ;;  %v4171_v53 = vcombine.low %v4154_v11, %v4162_v13  ;;  %v2782_v14 = vrot.slane %v4720_v56, %v5389_v6  ;;  %v4722_v12 = vcombine.high %v5899_v50, %v5904_v0  ;;  %v6921_v56 = vld [vmem:[#allocation13_spill] sm:$0xff]  ;;  %v6922_v11 = vld [vmem:[#allocation12_spill] sm:$0xff] }
 0x1fe   : > { %v6103_v46 = vrot.slane %v769_v15, %v5404_v19  ;;  %v6106_v22 = vrot.slane %v770_v45, %v5404_v19  ;;  %v2851_v48 = vcombine.low %v761_v24, %v768_v29  ;;  %v4170_v33 = vrot.slane %v4163_v57, %v5404_v19 }
 0x1ff   : > { %v4178_v42 = vrot.slane %v4171_v53, %v5404_v19  ;;  %v2783_v54 = vcombine.low %v5936_v58, %v5939_v36  ;;  %v2791_v2 = vcombine.low %v2774_v52, %v2782_v14  ;;  %v4723_v27 = vcombine.high %v761_v24, %v768_v29  ;;  %v488_v24 = vpop.permute.xlu1 %487 }
 0x200   : > { %v827_v50 = vrot.slane %v819_v41, %v5404_v19  ;;  %v834_v0 = vrot.slane %v820_v39, %v5404_v19  ;;  %v835_v15 = vcombine.low %v6921_v56, %v818_v43  ;;  %v2867_v58 = vcombine.low %v6103_v46, %v6106_v22 }
 0x201   : > { %v4179_v45 = vcombine.low %v4170_v33, %v4178_v42  ;;  %v4180_v16 = vcombine.high %v4170_v33, %v4178_v42  ;;  %v2790_v1 = vrot.slane %v2783_v54, %v5404_v19  ;;  %v2798_v10 = vrot.slane %v2791_v2, %v5404_v19 }
 0x202   : > { %v836_v36 = vcombine.high %v6921_v56, %v818_v43  ;;  %v1332_v63 = vcombine.high %v502_v34, %v6900_v49  ;;  %v1339_v28 = vrot.slane %v502_v34, %v5389_v6  ;;  %v6123_v4 = vrot.slane %v2851_v48, %v5389_v6 }
 0x203   : > { %v4724_v32 = vcombine.high %v6103_v46, %v6106_v22  ;;  %4393 = vst.msk [vmem:[%s5783_s28 + $0x58] sm:$0xff] %vm4381_vm0, %v4179_v45  ;;  %4409 = vst.msk [vmem:[%s5783_s28 + $0xd8] sm:$0xff] %vm4381_vm0, %v4180_v16  ;;  %v2800_v21 = vcombine.high %v2790_v1, %v2798_v10  ;;  %v2799_v62 = vcombine.low %v2790_v1, %v2798_v10  ;;  %v6923_v46 = vld [vmem:[#allocation16_spill] sm:$0xff]  ;;  %v1606_v16 = vpop.permute.xlu0 %1605 }
 0x204   : > { %v6132_v29 = vrot.slane %v4723_v27, %v5389_v6  ;;  %v6135_v38 = vrot.slane %v835_v15, %v5404_v19  ;;  %v2901_v18 = vcombine.low %v827_v50, %v834_v0  ;;  %v4725_v26 = vcombine.high %v827_v50, %v834_v0 }
 0x205   : > { %3534 = vxpose.xlu1.b32.cont [2/16] (narrow) %v2800_v21, 64  ;;  %3502 = vxpose.xlu0.b32.cont [2/16] (narrow) %v2799_v62, 64  ;;  %v1346_v60 = vrot.slane %v1332_v63, %v5389_v6  ;;  %v1347_v13 = vcombine.low %v6922_v11, %v1339_v28  ;;  %v1348_v57 = vcombine.high %v6922_v11, %v1339_v28 }
 0x206   : > { %v6141_v43 = vrot.slane %v836_v36, %v5404_v19  ;;  %v870_v41 = vcombine.high %v488_v24, %v6900_v49  ;;  %v2824_v39 = vrot.slane %v2817_v9, %v5389_v6  ;;  %v2832_v53 = vrot.slane %v4722_v12, %v5389_v6 }
 0x207   : > { %v6147_v52 = vrot.slane %v1347_v13, %v5404_v19  ;;  %v6150_v14 = vrot.slane %v1348_v57, %v5404_v19  ;;  %v1363_v22 = vcombine.low %v6923_v46, %v1346_v60  ;;  %v1364_v48 = vcombine.high %v6923_v46, %v1346_v60  ;;  %v6926_v57 = vld [vmem:[#allocation21_spill] sm:$0xff]  ;;  %v6927_v46 = vld [vmem:[#allocation14_spill] sm:$0xff] }
 0x208   : > { %v6924_v33 = vcombine.low %v5923_v30, %v5926_v44  ;;  %v6925_v9 = vcombine.high %v5923_v30, %v5926_v44  ;;  %v6167_v54 = vrot.slane %v2901_v18, %v5389_v6  ;;  %v6170_v2 = vrot.slane %v4725_v26, %v5389_v6  ;;  %v504_v44 = vpop.permute.xlu1 %503 }
 0x209   : > { %v6173_v34 = vrot.slane %v1363_v22, %v5404_v19  ;;  %v6176_v27 = vrot.slane %v1364_v48, %v5404_v19  ;;  %v3301_v50 = vcombine.low %v6147_v52, %v6150_v14  ;;  %v2917_v0 = vcombine.low %v6135_v38, %v6141_v43 }
 0x20a   : > { %v6158_v42 = vrot.slane %v6924_v33, %v5389_v6  ;;  %v6164_v12 = vrot.slane %v6925_v9, %v5389_v6  ;;  %v4726_v56 = vcombine.high %v6135_v38, %v6141_v43  ;;  %v2833_v15 = vcombine.low %v5909_v55, %v5931_v7 }
 0x20b   : > { %v2841_v45 = vcombine.low %v2824_v39, %v2832_v53  ;;  %v6189_v1 = vrot.slane %v488_v24, %v5389_v6  ;;  %v6192_v10 = vrot.slane %v870_v41, %v5389_v6  ;;  %v1398_v55 = vcombine.high %v504_v44, %v6900_v49 }
 0x20c   : > { %v2840_v28 = vrot.slane %v2833_v15, %v5404_v19  ;;  %v1405_v7 = vrot.slane %v504_v44, %v5389_v6  ;;  %v1924_v62 = vcombine.high %v1606_v16, %v6900_v49  ;;  %v1931_v24 = vrot.slane %v1606_v16, %v5389_v6  ;;  %v6929_v16 = vld [vmem:[#allocation15_spill] sm:$0xff] }
 0x20d   : > { %v2848_v21 = vrot.slane %v2841_v45, %v5404_v19  ;;  %v2874_v18 = vrot.slane %v2867_v58, %v5389_v6  ;;  %v2882_v26 = vrot.slane %v4724_v32, %v5389_v6  ;;  %v1412_v13 = vrot.slane %v1398_v55, %v5389_v6  ;;  %v6928_v32 = vld [vmem:[#allocation24_spill] sm:$0xff] }
 0x20e   : > { %v1413_v41 = vcombine.low %v6926_v57, %v1405_v7  ;;  %v1414_v39 = vcombine.high %v6926_v57, %v1405_v7  ;;  %v1938_v53 = vrot.slane %v1924_v62, %v5389_v6  ;;  %v1939_v22 = vcombine.low %v6927_v46, %v1931_v24 }
 0x20f   : > { %v2850_v60 = vcombine.high %v2840_v28, %v2848_v21  ;;  %v2849_v11 = vcombine.low %v2840_v28, %v2848_v21  ;;  %v1940_v48 = vcombine.high %v6927_v46, %v1931_v24  ;;  %v1429_v33 = vcombine.low %v6928_v32, %v1412_v13  ;;  %v1608_v46 = vpop.permute.xlu1 %1607 }
 0x210   : > { %v6213_v58 = vrot.slane %v1413_v41, %v5404_v19  ;;  %v1430_v9 = vcombine.high %v6928_v32, %v1412_v13  ;;  %v6218_v44 = vrot.slane %v1414_v39, %v5404_v19  ;;  %v1947_v15 = vrot.slane %v1939_v22, %v5404_v19 }
 0x211   : > { %3535 = vxpose.xlu1.b32.cont [3/16] (narrow) %v2850_v60, 64  ;;  %3503 = vxpose.xlu0.b32.cont [3/16] (narrow) %v2849_v11, 64  ;;  %v1954_v45 = vrot.slane %v1940_v48, %v5404_v19  ;;  %v1955_v28 = vcombine.low %v6929_v16, %v1938_v53  ;;  %v6224_v21 = vrot.slane %v1429_v33, %v5404_v19  ;;  %v6931_v60 = vld [vmem:[#allocation22_spill] sm:$0xff] }
 0x212   : > { %v6227_v55 = vrot.slane %v1430_v9, %v5404_v19  ;;  %v1956_v7 = vcombine.high %v6929_v16, %v1938_v53  ;;  %v2883_v62 = vcombine.low %v6123_v4, %v6132_v29  ;;  %v1622_v4 = vpop.permute.xlu0 %1621  ;;  %v6930_v29 = vld [vmem:[#allocation18_spill] sm:$0xff]  ;;  %v2891_v41 = vcombine.low %v2874_v18, %v2882_v26 }
 0x213   : > { %v1963_v11 = vrot.slane %v1955_v28, %v5404_v19  ;;  %v3781_v13 = vcombine.low %v1947_v15, %v1954_v45  ;;  %v4757_v53 = vcombine.high %v1947_v15, %v1954_v45  ;;  %v885_v22 = vcombine.low %v6930_v29, %v6189_v1 }
 0x214   : > { %v1970_v39 = vrot.slane %v1956_v7, %v5404_v19  ;;  %v886_v48 = vcombine.high %v6930_v29, %v6189_v1  ;;  %v2890_v33 = vrot.slane %v2883_v62, %v5404_v19  ;;  %v1990_v7 = vcombine.high %v1608_v46, %v6900_v49 }
 0x215   : > { %v3788_v32 = vrot.slane %v3781_v13, %v5389_v6  ;;  %v3796_v9 = vrot.slane %v4757_v53, %v5389_v6  ;;  %v1997_v15 = vrot.slane %v1608_v46, %v5389_v6  ;;  %v2452_v45 = vcombine.high %v1622_v4, %v6900_v49 }
 0x216   : > { %v3797_v16 = vcombine.low %v1963_v11, %v1970_v39  ;;  %v4758_v28 = vcombine.high %v1963_v11, %v1970_v39  ;;  %v2459_v57 = vrot.slane %v1622_v4, %v5389_v6  ;;  %v2898_v62 = vrot.slane %v2891_v41, %v5404_v19 }
 0x217   : > { %v3813_v13 = vcombine.low %v3788_v32, %v3796_v9  ;;  %v2004_v53 = vrot.slane %v1990_v7, %v5389_v6  ;;  %v2005_v11 = vcombine.low %v6931_v60, %v1997_v15  ;;  %v2006_v18 = vcombine.high %v6931_v60, %v1997_v15  ;;  %v6932_v32 = vld [vmem:[#allocation23_spill] sm:$0xff]  ;;  %v6933_v60 = vld [vmem:[#allocation17_spill] sm:$0xff] }
 0x218   : > { %v3804_v63 = vrot.slane %v3797_v16, %v5389_v6  ;;  %v3812_v36 = vrot.slane %v4758_v28, %v5389_v6  ;;  %v2466_v26 = vrot.slane %v2452_v45, %v5389_v6  ;;  %v2900_v24 = vcombine.high %v2890_v33, %v2898_v62 }
 0x219   : > { %v3820_v39 = vrot.slane %v3813_v13, %v5404_v19  ;;  %v2899_v4 = vcombine.low %v2890_v33, %v2898_v62  ;;  %v2013_v16 = vrot.slane %v2005_v11, %v5404_v19  ;;  %v2020_v28 = vrot.slane %v2006_v18, %v5404_v19 }
 0x21a   : > { %v3821_v46 = vcombine.low %v3804_v63, %v3812_v36  ;;  %v2021_v9 = vcombine.low %v6932_v32, %v2004_v53  ;;  %v2022_v41 = vcombine.high %v6932_v32, %v2004_v53  ;;  %3536 = vxpose.xlu1.b32.cont [4/16] (narrow) %v2900_v24, 64  ;;  %v2467_v15 = vcombine.low %v6933_v60, %v2459_v57  ;;  %v1624_v24 = vpop.permute.xlu1 %1623 }
 0x21b   : > { %3504 = vxpose.xlu0.b32.cont [4/16] (narrow) %v2899_v4, 64  ;;  %v2468_v36 = vcombine.high %v6933_v60, %v2459_v57  ;;  %v3831_v45 = vcombine.low %v2013_v16, %v2020_v28  ;;  %v4759_v13 = vcombine.high %v2013_v16, %v2020_v28  ;;  %v6934_v57 = vld [vmem:[#allocation19_spill] sm:$0xff] }
 0x21c   : > { %v3828_v7 = vrot.slane %v3821_v46, %v5404_v19  ;;  %v2029_v63 = vrot.slane %v2021_v9, %v5404_v19  ;;  %v2036_v33 = vrot.slane %v2022_v41, %v5404_v19  ;;  %v2475_v53 = vrot.slane %v2467_v15, %v5404_v19 }
 0x21d   : > { %v2482_v18 = vrot.slane %v2468_v36, %v5404_v19  ;;  %v3838_v46 = vrot.slane %v3831_v45, %v5389_v6  ;;  %v3846_v4 = vrot.slane %v4759_v13, %v5389_v6  ;;  %v2483_v9 = vcombine.low %v6934_v57, %v2466_v26  ;;  %v6935_v13 = vld [vmem:[#allocation20_spill] sm:$0xff] }
 0x21e   : > { %v3829_v62 = vcombine.low %v3820_v39, %v3828_v7  ;;  %v3830_v11 = vcombine.high %v3820_v39, %v3828_v7  ;;  %v3847_v32 = vcombine.low %v2029_v63, %v2036_v33  ;;  %v4760_v30 = vcombine.high %v2029_v63, %v2036_v33 }
 0x21f   : > { %v2484_v16 = vcombine.high %v6934_v57, %v2466_v26  ;;  %v4181_v39 = vcombine.low %v2475_v53, %v2482_v18  ;;  %v4773_v28 = vcombine.high %v2475_v53, %v2482_v18  ;;  %v3863_v60 = vcombine.low %v3838_v46, %v3846_v4  ;;  %v6936_v57 = vld [vmem:[#allocation25_spill] sm:$0xff] }
 0x220   : > { %4386 = vst.msk [vmem:[%s5783_s28 + $0x20] sm:$0xff] %vm4381_vm0, %v3829_v62  ;;  %4402 = vst.msk [vmem:[%s5783_s28 + $0xa0] sm:$0xff] %vm4381_vm0, %v3830_v11  ;;  %v3854_v41 = vrot.slane %v3847_v32, %v5389_v6  ;;  %v3862_v7 = vrot.slane %v4760_v30, %v5389_v6  ;;  %v2518_v15 = vcombine.high %v1624_v24, %v6900_v49 }
 0x221   : > { %v2491_v36 = vrot.slane %v2483_v9, %v5404_v19  ;;  %v2498_v63 = vrot.slane %v2484_v16, %v5404_v19  ;;  %v4188_v33 = vrot.slane %v4181_v39, %v5389_v6  ;;  %v4196_v45 = vrot.slane %v4773_v28, %v5389_v6  ;;  %v6937_v39 = vld [vmem:[#allocation26_spill] sm:$0xff] }
 0x222   : > { %v901_v26 = vcombine.low %v6935_v13, %v6192_v10  ;;  %v3871_v62 = vcombine.low %v3854_v41, %v3862_v7  ;;  %v2525_v11 = vrot.slane %v1624_v24, %v5389_v6  ;;  %v2532_v53 = vrot.slane %v2518_v15, %v5389_v6 }
 0x223   : > { %v902_v30 = vcombine.high %v6935_v13, %v6192_v10  ;;  %v3870_v18 = vrot.slane %v3863_v60, %v5404_v19  ;;  %v4197_v46 = vcombine.low %v2491_v36, %v2498_v63  ;;  %v4774_v4 = vcombine.high %v2491_v36, %v2498_v63  ;;  %v490_v60 = vpop.permute.xlu0 %489 }
 0x224   : > { %v3878_v32 = vrot.slane %v3871_v62, %v5404_v19  ;;  %v2533_v9 = vcombine.low %v6936_v57, %v2525_v11  ;;  %v2534_v16 = vcombine.high %v6936_v57, %v2525_v11  ;;  %v2549_v28 = vcombine.low %v6937_v39, %v2532_v53 }
 0x225   : > { %v4204_v24 = vrot.slane %v4197_v46, %v5389_v6  ;;  %v4212_v41 = vrot.slane %v4774_v4, %v5389_v6  ;;  %v4213_v7 = vcombine.low %v4188_v33, %v4196_v45  ;;  %v2550_v10 = vcombine.high %v6937_v39, %v2532_v53 }
 0x226   : > { %v3879_v15 = vcombine.low %v3870_v18, %v3878_v32  ;;  %v3880_v36 = vcombine.high %v3870_v18, %v3878_v32  ;;  %v2541_v63 = vrot.slane %v2533_v9, %v5404_v19  ;;  %v2548_v13 = vrot.slane %v2534_v16, %v5404_v19 }
 0x227   : > { %v893_v62 = vrot.slane %v885_v22, %v5404_v19  ;;  %v4221_v11 = vcombine.low %v4204_v24, %v4212_v41  ;;  %v2557_v46 = vrot.slane %v2549_v28, %v5404_v19  ;;  %v2564_v4 = vrot.slane %v2550_v10, %v5404_v19 }
 0x228   : > { %v900_v33 = vrot.slane %v886_v48, %v5404_v19  ;;  %4387 = vst.msk [vmem:[%s5783_s28 + $0x28] sm:$0xff] %vm4381_vm0, %v3879_v15  ;;  %4403 = vst.msk [vmem:[%s5783_s28 + $0xa8] sm:$0xff] %vm4381_vm0, %v3880_v36  ;;  %v4231_v45 = vcombine.low %v2541_v63, %v2548_v13  ;;  %v4775_v53 = vcombine.high %v2541_v63, %v2548_v13  ;;  %v6939_v36 = vld [vmem:[#allocation27_spill] sm:$0xff]  ;;  %v492_v13 = vpop.permute.xlu1 %491 }
 0x229   : > { %v943_v18 = vrot.slane %v490_v60, %v5389_v6  ;;  %v4220_v22 = vrot.slane %v4213_v7, %v5404_v19  ;;  %v4228_v32 = vrot.slane %v4221_v11, %v5404_v19  ;;  %v4247_v57 = vcombine.low %v2557_v46, %v2564_v4 }
 0x22a   : > { %v4776_v9 = vcombine.high %v2557_v46, %v2564_v4  ;;  %v4238_v16 = vrot.slane %v4231_v45, %v5389_v6  ;;  %v4246_v1 = vrot.slane %v4775_v53, %v5389_v6  ;;  %v936_v29 = vcombine.high %v490_v60, %v6900_v49 }
 0x22b   : > { %v2924_v48 = vrot.slane %v2917_v0, %v5389_v6  ;;  %v4229_v39 = vcombine.low %v4220_v22, %v4228_v32  ;;  %v4230_v28 = vcombine.high %v4220_v22, %v4228_v32  ;;  %v4254_v24 = vrot.slane %v4247_v57, %v5389_v6 }
 0x22c   : > { %v4262_v41 = vrot.slane %v4776_v9, %v5389_v6  ;;  %v6938_v7 = vcombine.low %v5972_v51, %v5976_v37  ;;  %v4263_v15 = vcombine.low %v4238_v16, %v4246_v1  ;;  %v951_v60 = vcombine.low %v6939_v36, %v943_v18  ;;  %v506_v1 = vpop.permute.xlu0 %505 }
 0x22d   : > { %v952_v63 = vcombine.high %v6939_v36, %v943_v18  ;;  %v6940_v0 = vcombine.high %v5972_v51, %v5976_v37  ;;  %4394 = vst.msk [vmem:[%s5783_s28 + $0x60] sm:$0xff] %vm4381_vm0, %v4229_v39  ;;  %4410 = vst.msk [vmem:[%s5783_s28 + $0xe0] sm:$0xff] %vm4381_vm0, %v4230_v28  ;;  %v2932_v4 = vrot.slane %v4726_v56, %v5389_v6  ;;  %v6941_v39 = vld [vmem:[#allocation29_spill] sm:$0xff] }
 0x22e   : > { %v6333_v10 = vrot.slane %v6938_v7, %v5389_v6  ;;  %v4271_v46 = vcombine.low %v4254_v24, %v4262_v41  ;;  %v2933_v45 = vcombine.low %v6167_v54, %v6170_v2  ;;  %v909_v53 = vrot.slane %v901_v26, %v5404_v19 }
 0x22f   : > { %v6341_v11 = vrot.slane %v6940_v0, %v5389_v6  ;;  %v916_v18 = vrot.slane %v902_v30, %v5404_v19  ;;  %v2951_v51 = vcombine.low %v893_v62, %v900_v33  ;;  %v950_v37 = vrot.slane %v936_v29, %v5389_v6  ;;  %v6942_v0 = vld [vmem:[#allocation34_spill] sm:$0xff] }
 0x230   : > { %v4270_v22 = vrot.slane %v4263_v15, %v5404_v19  ;;  %v4278_v32 = vrot.slane %v4271_v46, %v5404_v19  ;;  %v2941_v57 = vcombine.low %v2924_v48, %v2932_v4  ;;  %v1002_v9 = vcombine.high %v492_v13, %v6900_v49 }
 0x231   : > { %v4727_v38 = vcombine.high %v893_v62, %v900_v33  ;;  %v959_v43 = vrot.slane %v951_v60, %v5404_v19  ;;  %v966_v54 = vrot.slane %v952_v63, %v5404_v19  ;;  %v2940_v2 = vrot.slane %v2933_v45, %v5404_v19 }
 0x232   : > { %v4279_v56 = vcombine.low %v4270_v22, %v4278_v32  ;;  %v4280_v26 = vcombine.high %v4270_v22, %v4278_v32  ;;  %v2948_v30 = vrot.slane %v2941_v57, %v5404_v19  ;;  %v1009_v16 = vrot.slane %v492_v13, %v5389_v6 }
 0x233   : > { %v2967_v29 = vcombine.low %v909_v53, %v916_v18  ;;  %v4728_v48 = vcombine.high %v909_v53, %v916_v18  ;;  %v967_v28 = vcombine.low %v6941_v39, %v950_v37  ;;  %v968_v24 = vcombine.high %v6941_v39, %v950_v37  ;;  %v508_v37 = vpop.permute.xlu1 %507 }
 0x234   : > { %v2958_v62 = vrot.slane %v2951_v51, %v5389_v6  ;;  %4395 = vst.msk [vmem:[%s5783_s28 + $0x68] sm:$0xff] %vm4381_vm0, %v4279_v56  ;;  %4411 = vst.msk [vmem:[%s5783_s28 + $0xe8] sm:$0xff] %vm4381_vm0, %v4280_v26  ;;  %v2950_v33 = vcombine.high %v2940_v2, %v2948_v30  ;;  %v2949_v41 = vcombine.low %v2940_v2, %v2948_v30 }
 0x235   : > { %v1016_v7 = vrot.slane %v1002_v9, %v5389_v6  ;;  %v2966_v15 = vrot.slane %v4727_v38, %v5389_v6  ;;  %v3001_v36 = vcombine.low %v959_v43, %v966_v54  ;;  %v1464_v60 = vcombine.high %v506_v1, %v6900_v49  ;;  %v6945_v9 = vld [vmem:[#allocation36_spill] sm:$0xff] }
 0x236   : > { %v1471_v63 = vrot.slane %v506_v1, %v5389_v6  ;;  %v4729_v13 = vcombine.high %v959_v43, %v966_v54  ;;  %3537 = vxpose.xlu1.b32.cont [5/16] (narrow) %v2950_v33, 64  ;;  %3505 = vxpose.xlu0.b32.cont [5/16] (narrow) %v2949_v41, 64  ;;  %v1017_v46 = vcombine.low %v6942_v0, %v1009_v16 }
 0x237   : > { %v1018_v4 = vcombine.high %v6942_v0, %v1009_v16  ;;  %v6381_v45 = vrot.slane %v3301_v50, %v5389_v6  ;;  %v6384_v53 = vrot.slane %v967_v28, %v5404_v19  ;;  %v6387_v18 = vrot.slane %v968_v24, %v5404_v19  ;;  %v1610_v24 = vpop.permute.xlu0 %1609 }
 0x238   : > { %v2974_v51 = vrot.slane %v2967_v29, %v5389_v6  ;;  %v6943_v22 = vcombine.high %v6147_v52, %v6150_v14  ;;  %v6944_v50 = vcombine.low %v6213_v58, %v6218_v44  ;;  %v1033_v38 = vcombine.low %v6945_v9, %v1016_v7  ;;  %v6947_v14 = vld [vmem:[#allocation28_spill] sm:$0xff] }
 0x239   : > { %v1034_v43 = vcombine.high %v6945_v9, %v1016_v7  ;;  %v6946_v54 = vcombine.high %v6213_v58, %v6218_v44  ;;  %v1478_v52 = vrot.slane %v1464_v60, %v5389_v6  ;;  %v1479_v56 = vcombine.low %v6947_v14, %v1471_v63  ;;  %v6948_v60 = vld [vmem:[#allocation31_spill] sm:$0xff]  ;;  %v6951_v58 = vld [vmem:[#allocation32_spill] sm:$0xff] }
 0x23a   : > { %v6394_v32 = vrot.slane %v6943_v22, %v5389_v6  ;;  %v6400_v57 = vrot.slane %v6944_v50, %v5389_v6  ;;  %v2982_v26 = vrot.slane %v4728_v48, %v5389_v6  ;;  %v6414_v30 = vrot.slane %v3001_v36, %v5389_v6 }
 0x23b   : > { %v6408_v2 = vrot.slane %v6946_v54, %v5389_v6  ;;  %v6417_v16 = vrot.slane %v4729_v13, %v5389_v6  ;;  %v1025_v1 = vrot.slane %v1017_v46, %v5404_v19  ;;  %v1032_v29 = vrot.slane %v1018_v4, %v5404_v19 }
 0x23c   : > { %v1480_v44 = vcombine.high %v6947_v14, %v1471_v63  ;;  %v2983_v39 = vcombine.low %v2958_v62, %v2966_v15  ;;  %v2991_v28 = vcombine.low %v2974_v51, %v2982_v26  ;;  %v6427_v33 = vrot.slane %v1033_v38, %v5404_v19  ;;  %v1612_v63 = vpop.permute.xlu1 %1611 }
 0x23d   : > { %v6430_v41 = vrot.slane %v1034_v43, %v5404_v19  ;;  %v1530_v7 = vcombine.high %v508_v37, %v6900_v49  ;;  %v6434_v36 = vrot.slane %v1479_v56, %v5404_v19  ;;  %v1495_v13 = vcombine.low %v6948_v60, %v1478_v52  ;;  %v6949_v56 = vld [vmem:[#allocation30_spill] sm:$0xff] }
 0x23e   : > { %v2990_v62 = vrot.slane %v2983_v39, %v5404_v19  ;;  %v2998_v15 = vrot.slane %v2991_v28, %v5404_v19  ;;  %v3051_v0 = vcombine.low %v1025_v1, %v1032_v29  ;;  %v4731_v46 = vcombine.high %v1025_v1, %v1032_v29 }
 0x23f   : > { %v2056_v4 = vcombine.high %v1610_v24, %v6900_v49  ;;  %v2063_v51 = vrot.slane %v1610_v24, %v5389_v6  ;;  %v6442_v22 = vrot.slane %v1480_v44, %v5404_v19  ;;  %v1496_v50 = vcombine.high %v6948_v60, %v1478_v52  ;;  %v6950_v24 = vld [vmem:[#allocation33_spill] sm:$0xff] }
 0x240   : > { %v3000_v9 = vcombine.high %v2990_v62, %v2998_v15  ;;  %v2999_v38 = vcombine.low %v2990_v62, %v2998_v15  ;;  %v6448_v54 = vrot.slane %v1530_v7, %v5389_v6  ;;  %v6455_v29 = vrot.slane %v1495_v13, %v5404_v19 }
 0x241   : > { %v2070_v14 = vrot.slane %v2056_v4, %v5389_v6  ;;  %v2071_v26 = vcombine.low %v6949_v56, %v2063_v51  ;;  %v2072_v52 = vcombine.high %v6949_v56, %v2063_v51  ;;  %v6459_v44 = vrot.slane %v3051_v0, %v5389_v6  ;;  %v1626_v4 = vpop.permute.xlu0 %1625  ;;  %v1628_v0 = vpop.permute.xlu1 %1627 }
 0x242   : > { %3538 = vxpose.xlu1.b32.cont [6/16] (narrow) %v3000_v9, 64  ;;  %3506 = vxpose.xlu0.b32.cont [6/16] (narrow) %v2999_v38, 64  ;;  %v6462_v39 = vrot.slane %v4731_v46, %v5389_v6  ;;  %v6467_v60 = vrot.slane %v1496_v50, %v5404_v19  ;;  %v6470_v13 = vrot.slane %v508_v37, %v5389_v6 }
 0x243   : > { %v2079_v28 = vrot.slane %v2071_v26, %v5404_v19  ;;  %v2087_v7 = vcombine.low %v6950_v24, %v2070_v14  ;;  %v2086_v62 = vrot.slane %v2072_v52, %v5404_v19  ;;  %v2088_v15 = vcombine.high %v6950_v24, %v2070_v14 }
 0x244   : > { %v2122_v50 = vcombine.high %v1612_v63, %v6900_v49  ;;  %v2129_v26 = vrot.slane %v1612_v63, %v5389_v6  ;;  %v2584_v52 = vcombine.high %v1626_v4, %v6900_v49  ;;  %v2591_v24 = vrot.slane %v1626_v4, %v5389_v6 }
 0x245   : > { %v2095_v9 = vrot.slane %v2087_v7, %v5404_v19  ;;  %v2102_v38 = vrot.slane %v2088_v15, %v5404_v19  ;;  %v3881_v37 = vcombine.low %v2079_v28, %v2086_v62  ;;  %v4761_v56 = vcombine.high %v2079_v28, %v2086_v62 }
 0x246   : > { %v2136_v14 = vrot.slane %v2122_v50, %v5389_v6  ;;  %v2650_v46 = vcombine.high %v1628_v0, %v6900_v49  ;;  %v2137_v15 = vcombine.low %v5826_v61, %v2129_v26  ;;  %v2138_v28 = vcombine.high %v5826_v61, %v2129_v26 }
 0x247   : > { %v3888_v51 = vrot.slane %v3881_v37, %v5389_v6  ;;  %v3896_v7 = vrot.slane %v4761_v56, %v5389_v6  ;;  %v3897_v1 = vcombine.low %v2095_v9, %v2102_v38  ;;  %v4762_v43 = vcombine.high %v2095_v9, %v2102_v38 }
 0x248   : > { %v2153_v63 = vcombine.low %v5854_v23, %v2136_v14  ;;  %v2154_v62 = vcombine.high %v5854_v23, %v2136_v14  ;;  %v2598_v49 = vrot.slane %v2584_v52, %v5389_v6  ;;  %v2145_v37 = vrot.slane %v2137_v15, %v5404_v19 }
 0x249   : > { %v3904_v50 = vrot.slane %v3897_v1, %v5389_v6  ;;  %v3912_v4 = vrot.slane %v4762_v43, %v5389_v6  ;;  %v3913_v48 = vcombine.low %v3888_v51, %v3896_v7  ;;  %v2152_v56 = vrot.slane %v2138_v28, %v5404_v19 }
 0x24a   : > { %v2161_v9 = vrot.slane %v2153_v63, %v5404_v19  ;;  %v2168_v38 = vrot.slane %v2154_v62, %v5404_v19  ;;  %v2599_v23 = vcombine.low %v6951_v58, %v2591_v24  ;;  %v2600_v1 = vcombine.high %v6951_v58, %v2591_v24  ;;  %v6952_v63 = vld [vmem:[#allocation35_spill] sm:$0xff] }
 0x24b   : > { %v3920_v61 = vrot.slane %v3913_v48, %v5404_v19  ;;  %v3921_v26 = vcombine.low %v3904_v50, %v3912_v4  ;;  %v3931_v14 = vcombine.low %v2145_v37, %v2152_v56  ;;  %v4763_v43 = vcombine.high %v2145_v37, %v2152_v56 }
 0x24c   : > { %v3947_v51 = vcombine.low %v2161_v9, %v2168_v38  ;;  %v4764_v7 = vcombine.high %v2161_v9, %v2168_v38  ;;  %v2607_v15 = vrot.slane %v2599_v23, %v5404_v19  ;;  %v2614_v28 = vrot.slane %v2600_v1, %v5404_v19 }
 0x24d   : > { %v3928_v52 = vrot.slane %v3921_v26, %v5404_v19  ;;  %v2615_v62 = vcombine.low %v6952_v63, %v2598_v49  ;;  %v3938_v48 = vrot.slane %v3931_v14, %v5389_v6  ;;  %v3946_v50 = vrot.slane %v4763_v43, %v5389_v6 }
 0x24e   : > { %v3954_v58 = vrot.slane %v3947_v51, %v5389_v6  ;;  %v3962_v24 = vrot.slane %v4764_v7, %v5389_v6  ;;  %v2616_v56 = vcombine.high %v6952_v63, %v2598_v49  ;;  %v4281_v23 = vcombine.low %v2607_v15, %v2614_v28 }
 0x24f   : > { %v3929_v4 = vcombine.low %v3920_v61, %v3928_v52  ;;  %v3930_v37 = vcombine.high %v3920_v61, %v3928_v52  ;;  %v2623_v9 = vrot.slane %v2615_v62, %v5404_v19  ;;  %v3963_v38 = vcombine.low %v3938_v48, %v3946_v50 }
 0x250   : > { %v3971_v26 = vcombine.low %v3954_v58, %v3962_v24  ;;  %v4777_v1 = vcombine.high %v2607_v15, %v2614_v28  ;;  %v2630_v14 = vrot.slane %v2616_v56, %v5404_v19  ;;  %v2657_v43 = vrot.slane %v1628_v0, %v5389_v6 }
 0x251   : > { %4388 = vst.msk [vmem:[%s5783_s28 + $0x30] sm:$0xff] %vm4381_vm0, %v3929_v4  ;;  %4404 = vst.msk [vmem:[%s5783_s28 + $0xb0] sm:$0xff] %vm4381_vm0, %v3930_v37  ;;  %v2664_v51 = vrot.slane %v2650_v46, %v5389_v6  ;;  %v6953_v49 = vcombine.low %v6384_v53, %v6387_v18  ;;  %v3970_v7 = vrot.slane %v3963_v38, %v5404_v19 }
 0x252   : > { %v3978_v52 = vrot.slane %v3971_v26, %v5404_v19  ;;  %v4288_v15 = vrot.slane %v4281_v23, %v5389_v6  ;;  %v4296_v28 = vrot.slane %v4777_v1, %v5389_v6  ;;  %v4297_v63 = vcombine.low %v2623_v9, %v2630_v14 }
 0x253   : > { %v3024_v61 = vrot.slane %v6953_v49, %v5389_v6  ;;  %v4778_v62 = vcombine.high %v2623_v9, %v2630_v14  ;;  %v2665_v0 = vcombine.low %v5858_v47, %v2657_v43  ;;  %v2666_v46 = vcombine.high %v5858_v47, %v2657_v43 }
 0x254   : > { %v3979_v48 = vcombine.low %v3970_v7, %v3978_v52  ;;  %v3980_v50 = vcombine.high %v3970_v7, %v3978_v52  ;;  %v4313_v58 = vcombine.low %v4288_v15, %v4296_v28  ;;  %v2681_v24 = vcombine.low %v5863_v17, %v2664_v51 }
 0x255   : > { %v4304_v4 = vrot.slane %v4297_v63, %v5389_v6  ;;  %v4312_v37 = vrot.slane %v4778_v62, %v5389_v6  ;;  %v2673_v56 = vrot.slane %v2665_v0, %v5404_v19  ;;  %v2680_v38 = vrot.slane %v2666_v46, %v5404_v19 }
 0x256   : > { %4389 = vst.msk [vmem:[%s5783_s28 + $0x38] sm:$0xff] %vm4381_vm0, %v3979_v48  ;;  %4405 = vst.msk [vmem:[%s5783_s28 + $0xb8] sm:$0xff] %vm4381_vm0, %v3980_v50  ;;  %v4320_v9 = vrot.slane %v4313_v58, %v5404_v19  ;;  %v2682_v47 = vcombine.high %v5863_v17, %v2664_v51  ;;  %v2689_v26 = vrot.slane %v2681_v24, %v5404_v19 }
 0x257   : > { %v6954_v23 = vcombine.high %v6384_v53, %v6387_v18  ;;  %v4321_v14 = vcombine.low %v4304_v4, %v4312_v37  ;;  %v4331_v43 = vcombine.low %v2673_v56, %v2680_v38  ;;  %v4779_v49 = vcombine.high %v2673_v56, %v2680_v38 }
 0x258   : > { %v3033_v7 = vcombine.low %v6414_v30, %v6417_v16  ;;  %v2696_v52 = vrot.slane %v2682_v47, %v5404_v19  ;;  %v6955_v17 = vcombine.low %v6427_v33, %v6430_v41  ;;  %v6956_v28 = vcombine.high %v6427_v33, %v6430_v41 }
 0x259   : > { %v3032_v1 = vrot.slane %v6954_v23, %v5389_v6  ;;  %v4328_v18 = vrot.slane %v4321_v14, %v5404_v19  ;;  %v4338_v63 = vrot.slane %v4331_v43, %v5389_v6  ;;  %v4346_v30 = vrot.slane %v4779_v49, %v5389_v6 }
 0x25a   : > { %v3074_v51 = vrot.slane %v6955_v17, %v5389_v6  ;;  %v3082_v53 = vrot.slane %v6956_v28, %v5389_v6  ;;  %v3040_v16 = vrot.slane %v3033_v7, %v5404_v19  ;;  %v4780_v62 = vcombine.high %v2689_v26, %v2696_v52 }
 0x25b   : > { %v3041_v15 = vcombine.low %v3024_v61, %v3032_v1  ;;  %v4347_v61 = vcombine.low %v2689_v26, %v2696_v52  ;;  %v3083_v46 = vcombine.low %v6459_v44, %v6462_v39  ;;  %v4329_v48 = vcombine.low %v4320_v9, %v4328_v18  ;;  %v6957_v39 = vld [vmem:[#allocation40_spill] sm:$0xff]  ;;  %v6961_v52 = vld [vmem:[#allocation38_spill] sm:$0xff] }
 0x25c   : > { %v4330_v33 = vcombine.high %v4320_v9, %v4328_v18  ;;  %v4363_v41 = vcombine.low %v4338_v63, %v4346_v30  ;;  %v3091_v50 = vcombine.low %v3074_v51, %v3082_v53  ;;  %v4362_v24 = vrot.slane %v4780_v62, %v5389_v6  ;;  %v6958_v9 = vld [vmem:[#allocation41_spill] sm:$0xff] }
 0x25d   : > { %v3048_v0 = vrot.slane %v3041_v15, %v5404_v19  ;;  %v4354_v58 = vrot.slane %v4347_v61, %v5389_v6  ;;  %4396 = vst.msk [vmem:[%s5783_s28 + $0x70] sm:$0xff] %vm4381_vm0, %v4329_v48  ;;  %v3090_v38 = vrot.slane %v3083_v46, %v5404_v19  ;;  %v6959_v47 = vcombine.low %v6957_v39, %v6958_v9  ;;  %v6962_v15 = vld [vmem:[#allocation39_spill] sm:$0xff] }
 0x25e   : > { %4412 = vst.msk [vmem:[%s5783_s28 + $0xf0] sm:$0xff] %vm4381_vm0, %v4330_v33  ;;  %v4370_v56 = vrot.slane %v4363_v41, %v5404_v19  ;;  %v3098_v44 = vrot.slane %v3091_v50, %v5404_v19  ;;  %v6960_v1 = vcombine.high %v6957_v39, %v6958_v9  ;;  %v3133_v43 = vcombine.low %v5890_v3, %v5896_v8 }
 0x25f   : > { %v3050_v4 = vcombine.high %v3040_v16, %v3048_v0  ;;  %v3049_v37 = vcombine.low %v3040_v16, %v3048_v0  ;;  %v3124_v26 = vrot.slane %v6959_v47, %v5389_v6  ;;  %v4371_v23 = vcombine.low %v4354_v58, %v4362_v24 }
 0x260   : > { %v3132_v14 = vrot.slane %v6960_v1, %v5389_v6  ;;  %v3100_v49 = vcombine.high %v3090_v38, %v3098_v44  ;;  %v3099_v7 = vcombine.low %v3090_v38, %v3098_v44  ;;  %v6963_v17 = vcombine.low %v6961_v52, %v6962_v15 }
 0x261   : > { %3539 = vxpose.xlu1.b32.cont [7/16] (narrow) %v3050_v4, 64  ;;  %3507 = vxpose.xlu0.b32.cont [7/16] (narrow) %v3049_v37, 64  ;;  %v6964_v28 = vcombine.high %v6961_v52, %v6962_v15  ;;  %v4378_v18 = vrot.slane %v4371_v23, %v5404_v19  ;;  %v3140_v63 = vrot.slane %v3133_v43, %v5404_v19 }
 0x262   : > { %v3174_v51 = vrot.slane %v6963_v17, %v5389_v6  ;;  %v3141_v30 = vcombine.low %v3124_v26, %v3132_v14  ;;  %v3183_v3 = vcombine.low %v5878_v59, %v5884_v31  ;;  %v6965_v16 = vcombine.low %v5949_v20, %v5957_v5 }
 0x263   : > { %v3182_v53 = vrot.slane %v6964_v28, %v5389_v6  ;;  %v6966_v62 = vcombine.high %v5949_v20, %v5957_v5  ;;  %v3233_v46 = vcombine.low %v6158_v42, %v6164_v12  ;;  %v4379_v48 = vcombine.low %v4370_v56, %v4378_v18 }
 0x264   : > { %v3224_v61 = vrot.slane %v6965_v16, %v5389_v6  ;;  %v4380_v33 = vcombine.high %v4370_v56, %v4378_v18  ;;  %v3148_v59 = vrot.slane %v3141_v30, %v5404_v19  ;;  %v3190_v31 = vrot.slane %v3183_v3, %v5404_v19 }
 0x265   : > { %v3191_v8 = vcombine.low %v3174_v51, %v3182_v53  ;;  %v3232_v0 = vrot.slane %v6966_v62, %v5389_v6  ;;  %3540 = vxpose.xlu1.b32.cont [8/16] (narrow) %v3100_v49, 64  ;;  %3508 = vxpose.xlu0.b32.cont [8/16] (narrow) %v3099_v7, 64  ;;  %v3240_v50 = vrot.slane %v3233_v46, %v5404_v19  ;;  %v6973_v7 = vld [vmem:[#allocation37_spill] sm:$0xff] }
 0x266   : > { %4397 = vst.msk [vmem:[%s5783_s28 + $0x78] sm:$0xff] %vm4381_vm0, %v4379_v48  ;;  %4413 = vst.msk [vmem:[%s5783_s28 + $0xf8] sm:$0xff] %vm4381_vm0, %v4380_v33  ;;  %v3150_v20 = vcombine.high %v3140_v63, %v3148_v59  ;;  %v3149_v5 = vcombine.low %v3140_v63, %v3148_v59  ;;  %v6967_v42 = vcombine.low %v5982_v35, %v5988_v40 }
 0x267   : > { %v3198_v41 = vrot.slane %v3191_v8, %v5404_v19  ;;  %v3241_v58 = vcombine.low %v3224_v61, %v3232_v0  ;;  %v6968_v24 = vcombine.high %v5982_v35, %v5988_v40  ;;  %v3283_v44 = vcombine.low %v6333_v10, %v6341_v11 }
 0x268   : > { %v3274_v12 = vrot.slane %v6967_v42, %v5389_v6  ;;  %v6969_v9 = vcombine.low %v6173_v34, %v6176_v27  ;;  %v6970_v35 = vcombine.high %v6173_v34, %v6176_v27  ;;  %v3333_v10 = vcombine.low %v6381_v45, %v6394_v32 }
 0x269   : > { %v3282_v4 = vrot.slane %v6968_v24, %v5389_v6  ;;  %v3200_v37 = vcombine.high %v3190_v31, %v3198_v41  ;;  %v3199_v56 = vcombine.low %v3190_v31, %v3198_v41  ;;  %v3248_v38 = vrot.slane %v3241_v58, %v5404_v19  ;;  %3541 = vxpose.xlu1.b32.cont [9/16] (narrow) %v3150_v20, 64 }
 0x26a   : > { %3509 = vxpose.xlu0.b32.cont [9/16] (narrow) %v3149_v5, 64  ;;  %v3324_v47 = vrot.slane %v6969_v9, %v5389_v6  ;;  %v3332_v40 = vrot.slane %v6970_v35, %v5389_v6  ;;  %v3290_v1 = vrot.slane %v3283_v44, %v5404_v19  ;;  %v6971_v43 = vcombine.low %v6224_v21, %v6227_v55 }
 0x26b   : > { %v3291_v39 = vcombine.low %v3274_v12, %v3282_v4  ;;  %v3250_v26 = vcombine.high %v3240_v50, %v3248_v38  ;;  %v3249_v23 = vcombine.low %v3240_v50, %v3248_v38  ;;  %v6972_v34 = vcombine.high %v6224_v21, %v6227_v55 }
 0x26c   : > { %v3341_v14 = vcombine.low %v3324_v47, %v3332_v40  ;;  %v3374_v49 = vrot.slane %v6971_v43, %v5389_v6  ;;  %v1545_v52 = vcombine.low %v6973_v7, %v6470_v13  ;;  %v1546_v15 = vcombine.high %v6973_v7, %v6470_v13 }
 0x26d   : > { %v3298_v11 = vrot.slane %v3291_v39, %v5404_v19  ;;  %v3382_v27 = vrot.slane %v6972_v34, %v5389_v6  ;;  %v3340_v45 = vrot.slane %v3333_v10, %v5404_v19  ;;  %v3383_v32 = vcombine.low %v6400_v57, %v6408_v2  ;;  %3542 = vxpose.xlu1.b32.cont [10/16] (narrow) %v3200_v37, 64 }
 0x26e   : > { %3510 = vxpose.xlu0.b32.cont [10/16] (narrow) %v3199_v56, 64  ;;  %v3348_v28 = vrot.slane %v3341_v14, %v5404_v19  ;;  %v3417_v21 = vcombine.low %v6455_v29, %v6467_v60  ;;  %v4746_v55 = vcombine.high %v6455_v29, %v6467_v60  ;;  %v6974_v13 = vcombine.low %v5831_v25, %v6448_v54 }
 0x26f   : > { %v3300_v17 = vcombine.high %v3290_v1, %v3298_v11  ;;  %v3299_v51 = vcombine.low %v3290_v1, %v3298_v11  ;;  %v3391_v53 = vcombine.low %v3374_v49, %v3382_v27  ;;  %v6975_v57 = vcombine.high %v5831_v25, %v6448_v54 }
 0x270   : > { %v1569_v18 = vrot.slane %v6974_v13, %v5404_v19  ;;  %v3350_v63 = vcombine.high %v3340_v45, %v3348_v28  ;;  %v3349_v30 = vcombine.low %v3340_v45, %v3348_v28  ;;  %v3401_v3 = vcombine.low %v6434_v36, %v6442_v22 }
 0x271   : > { %v1576_v2 = vrot.slane %v6975_v57, %v5404_v19  ;;  %v3390_v8 = vrot.slane %v3383_v32, %v5404_v19  ;;  %v3398_v29 = vrot.slane %v3391_v53, %v5404_v19  ;;  %v4745_v60 = vcombine.high %v6434_v36, %v6442_v22  ;;  %3543 = vxpose.xlu1.b32.cont [11/16] (narrow) %v3250_v26, 64 }
 0x272   : > { %v1553_v16 = vrot.slane %v1545_v52, %v5404_v19  ;;  %v1560_v61 = vrot.slane %v1546_v15, %v5404_v19  ;;  %3511 = vxpose.xlu0.b32.cont [11/16] (narrow) %v3249_v23, 64  ;;  %v3424_v46 = vrot.slane %v3417_v21, %v5389_v6  ;;  %v3432_v48 = vrot.slane %v4746_v55, %v5389_v6 }
 0x273   : > { %v3400_v25 = vcombine.high %v3390_v8, %v3398_v29  ;;  %v3399_v54 = vcombine.low %v3390_v8, %v3398_v29  ;;  %v3467_v62 = vcombine.low %v1569_v18, %v1576_v2  ;;  %v4748_v0 = vcombine.high %v1569_v18, %v1576_v2 }
 0x274   : > { %v3408_v33 = vrot.slane %v3401_v3, %v5389_v6  ;;  %v3416_v59 = vrot.slane %v4745_v60, %v5389_v6  ;;  %v3451_v31 = vcombine.low %v1553_v16, %v1560_v61  ;;  %v4747_v36 = vcombine.high %v1553_v16, %v1560_v61 }
 0x275   : > { %3544 = vxpose.xlu1.b32.cont [12/16] (narrow) %v3300_v17, 64  ;;  %v3441_v22 = vcombine.low %v3424_v46, %v3432_v48  ;;  %v3474_v41 = vrot.slane %v3467_v62, %v5389_v6  ;;  %v3482_v50 = vrot.slane %v4748_v0, %v5389_v6 }
 0x276   : > { %3512 = vxpose.xlu0.b32.cont [12/16] (narrow) %v3299_v51, 64  ;;  %v3458_v58 = vrot.slane %v3451_v31, %v5389_v6  ;;  %v3466_v20 = vrot.slane %v4747_v36, %v5389_v6  ;;  %v3433_v5 = vcombine.low %v3408_v33, %v3416_v59 }
 0x277   : > { %v3448_v42 = vrot.slane %v3441_v22, %v5404_v19  ;;  %v3491_v12 = vcombine.low %v3474_v41, %v3482_v50 }
 0x278   : > { %v3440_v24 = vrot.slane %v3433_v5, %v5404_v19  ;;  %v3483_v4 = vcombine.low %v3458_v58, %v3466_v20 }
 0x279   : > { %3545 = vxpose.xlu1.b32.cont [13/16] (narrow) %v3350_v63, 64  ;;  %v3498_v38 = vrot.slane %v3491_v12, %v5404_v19 }
 0x27a   : > { %3513 = vxpose.xlu0.b32.cont [13/16] (narrow) %v3349_v30, 64  ;;  %v3450_v37 = vcombine.high %v3440_v24, %v3448_v42  ;;  %v3449_v56 = vcombine.low %v3440_v24, %v3448_v42  ;;  %v3490_v6 = vrot.slane %v3483_v4, %v5404_v19 }
 0x27c   : > { %v3500_v44 = vcombine.high %v3490_v6, %v3498_v38  ;;  %v3499_v39 = vcombine.low %v3490_v6, %v3498_v38 }
 0x27d   : > { %3546 = vxpose.xlu1.b32.cont [14/16] (narrow) %v3400_v25, 64 }
 0x27e   : > { %3514 = vxpose.xlu0.b32.cont [14/16] (narrow) %v3399_v54, 64 }
 0x281   : > { %3547 = vxpose.xlu1.b32.cont [15/16] (narrow) %v3450_v37, 64 }
 0x282   : > { %3515 = vxpose.xlu0.b32.cont [15/16] (narrow) %v3449_v56, 64 }
 0x285   : > { %3548 = vxpose.xlu1.b32.end [16/16] (narrow) %v3500_v44, 64 }
 0x286   : > { %3516 = vxpose.xlu0.b32.end [16/16] (narrow) %v3499_v39, 64 }
 0x2c5   : > { %v3549_v9 = vpop.trf.xlu1 }
 0x2c6   : > { %v3517_v47 = vpop.trf.xlu0  ;;  %3573 = vst [vmem:[%s6685_s29 + $0x40] sm:$0xff] %v3549_v9 }
 0x2c7   : > { %3565 = vst [vmem:[%s6685_s29] sm:$0xff] %v3517_v47 }
 0x2c9   : > { %v3550_v19 = vpop.trf.xlu1 }
 0x2ca   : > { %v3518_v35 = vpop.trf.xlu0  ;;  %3574 = vst [vmem:[%s6685_s29 + $0x48] sm:$0xff] %v3550_v19 }
 0x2cb   : > { %3566 = vst [vmem:[%s6685_s29 + $0x8] sm:$0xff] %v3518_v35 }
 0x2cd   : > { %v3551_v40 = vpop.trf.xlu1 }
 0x2ce   : > { %v3519_v26 = vpop.trf.xlu0  ;;  %3575 = vst [vmem:[%s6685_s29 + $0x50] sm:$0xff] %v3551_v40 }
 0x2cf   : > { %3567 = vst [vmem:[%s6685_s29 + $0x10] sm:$0xff] %v3519_v26 }
 0x2d1   : > { %v3552_v23 = vpop.trf.xlu1 }
 0x2d2   : > { %v3520_v1 = vpop.trf.xlu0  ;;  %3576 = vst [vmem:[%s6685_s29 + $0x58] sm:$0xff] %v3552_v23 }
 0x2d3   : > { %3568 = vst [vmem:[%s6685_s29 + $0x18] sm:$0xff] %v3520_v1 }
 0x2d5   : > { %v3553_v10 = vpop.trf.xlu1 }
 0x2d6   : > { %v3521_v11 = vpop.trf.xlu0  ;;  %3577 = vst [vmem:[%s6685_s29 + $0x60] sm:$0xff] %v3553_v10 }
 0x2d7   : > { %3569 = vst [vmem:[%s6685_s29 + $0x20] sm:$0xff] %v3521_v11 }
 0x2d9   : > { %v3554_v14 = vpop.trf.xlu1 }
 0x2da   : > { %v3522_v43 = vpop.trf.xlu0  ;;  %3578 = vst [vmem:[%s6685_s29 + $0x68] sm:$0xff] %v3554_v14 }
 0x2db   : > { %3570 = vst [vmem:[%s6685_s29 + $0x28] sm:$0xff] %v3522_v43 }
 0x2dd   : > { %v3555_v49 = vpop.trf.xlu1 }
 0x2de   : > { %v3523_v34 = vpop.trf.xlu0  ;;  %3579 = vst [vmem:[%s6685_s29 + $0x70] sm:$0xff] %v3555_v49 }
 0x2df   : > { %3571 = vst [vmem:[%s6685_s29 + $0x30] sm:$0xff] %v3523_v34 }
 0x2e1   : > { %v3556_v27 = vpop.trf.xlu1 }
 0x2e2   : > { %v3524_v7 = vpop.trf.xlu0  ;;  %3580 = vst [vmem:[%s6685_s29 + $0x78] sm:$0xff] %v3556_v27 }
 0x2e3   : > { %3572 = vst [vmem:[%s6685_s29 + $0x38] sm:$0xff] %v3524_v7 }
 0x2e4   : > { %4957 = shalt.err (!%p4954_p0)
}
 0x2e5   : > { %s4958_s21 = scalar_lea.hbm %s6708_s20, 2048  ;;  %s4962_s26 = scalar_lea.hbm %s6831_s3, 4096 }
 0x2e6   : > { %p4959_p5 = scmp.ne.s32.totalorder %s6708_s20, %s4958_s21  ;;  %p4963_p4 = scmp.lt.s32.totalorder %s6708_s20, %s6831_s3 }
 0x2e7   : > { %p4964_p6 = scmp.lt.s32.totalorder %s4962_s26, %s4958_s21 }
 0x2e8   : > { %p4960_p9 = pnand %p4959_p5, %p6976_p11 }
 0x2e9   : > { %p4965_p8 = por %p4964_p6, %p4963_p4 }
 0x2ea   : > { %p4961_p1 = pneg %p4960_p9 }
 0x2ec   : > { %p4966_p3 = pnand %p4965_p8, %p4961_p1 }
 0x2ee   : > { %4969 = shalt.err (!%p4966_p3)
}
 0x2ef   : > { %s5025_s14 = smov 128   ;;  %s5026_s30 = smov 256   ;;  %v4534_v52 = vld [vmem:[%s5783_s28] sm:$0xff] (%p6976_p11)  ;;  %v4536_v15 = vld [vmem:[%s5783_s28 + $0x8] sm:$0xff] (%p6976_p11)  ;;  %v4538_v45 = vld [vmem:[%s5783_s28 + $0x10] sm:$0xff] (%p6976_p11) }
 0x2f0   : > { %s5027_s6 = smov 8   ;;  %4440 = sbr.rel (!%p6976_p11) target bundleno = 771 (0x303), region = 48  ;;  %v4540_v32 = vld [vmem:[%s5783_s28 + $0x18] sm:$0xff] (%p6976_p11)  ;;  %v4542_v17 = vld [vmem:[%s5783_s28 + $0x20] sm:$0xff] (%p6976_p11)  ;;  %v4544_v51 = vld [vmem:[%s5783_s28 + $0x28] sm:$0xff] (%p6976_p11) }
 0x2f1   : > { %4828 = dma.vmem_to_hbm [thread:$0]  (%p6976_p11), %s6710_s11, 2048, %s6708_s20, %s4415_s25, %s5025_s14, %s5026_s30, %s5027_s6  }
 0x2f2   : > { %s6744_s21 = scalar_lea.vmem (%p6976_p11), %s6832_s4, %s4783_s12  ;;  %v4546_v28 = vld [vmem:[%s5783_s28 + $0x30] sm:$0xff] (%p6976_p11)  ;;  %v4548_v21 = vld [vmem:[%s5783_s28 + $0x38] sm:$0xff] (%p6976_p11)  ;;  %v4550_v55 = vld [vmem:[%s5783_s28 + $0x40] sm:$0xff] (%p6976_p11) }
 0x2f3   : > { %4535 = vst [vmem:[%s6744_s21] sm:$0xff] (%p6976_p11), %v4534_v52  ;;  %4537 = vst [vmem:[%s6744_s21 + $0x8] sm:$0xff] (%p6976_p11), %v4536_v15  ;;  %v4552_v53 = vld [vmem:[%s5783_s28 + $0x48] sm:$0xff] (%p6976_p11)  ;;  %v4554_v13 = vld [vmem:[%s5783_s28 + $0x50] sm:$0xff] (%p6976_p11) }
 0x2f4   : > { %4539 = vst [vmem:[%s6744_s21 + $0x10] sm:$0xff] (%p6976_p11), %v4538_v45  ;;  %4541 = vst [vmem:[%s6744_s21 + $0x18] sm:$0xff] (%p6976_p11), %v4540_v32  ;;  %v4556_v18 = vld [vmem:[%s5783_s28 + $0x58] sm:$0xff] (%p6976_p11)  ;;  %v4558_v57 = vld [vmem:[%s5783_s28 + $0x60] sm:$0xff] (%p6976_p11) }
 0x2f5   : > { %4543 = vst [vmem:[%s6744_s21 + $0x20] sm:$0xff] %v4542_v17  ;;  %4545 = vst [vmem:[%s6744_s21 + $0x28] sm:$0xff] %v4544_v51  ;;  %v4560_v2 = vld [vmem:[%s5783_s28 + $0x68] sm:$0xff]  ;;  %v4562_v63 = vld [vmem:[%s5783_s28 + $0x70] sm:$0xff] }
 0x2f6   : > { %4547 = vst [vmem:[%s6744_s21 + $0x30] sm:$0xff] %v4546_v28  ;;  %4549 = vst [vmem:[%s6744_s21 + $0x38] sm:$0xff] %v4548_v21  ;;  %v4564_v30 = vld [vmem:[%s5783_s28 + $0x78] sm:$0xff]  ;;  %v4566_v3 = vld [vmem:[%s5783_s28 + $0x80] sm:$0xff] }
 0x2f7   : > { %4551 = vst [vmem:[%s6744_s21 + $0x40] sm:$0xff] %v4550_v55  ;;  %4553 = vst [vmem:[%s6744_s21 + $0x48] sm:$0xff] %v4552_v53  ;;  %v4568_v8 = vld [vmem:[%s5783_s28 + $0x88] sm:$0xff]  ;;  %v4570_v29 = vld [vmem:[%s5783_s28 + $0x90] sm:$0xff] }
 0x2f8   : > { %4555 = vst [vmem:[%s6744_s21 + $0x50] sm:$0xff] %v4554_v13  ;;  %4557 = vst [vmem:[%s6744_s21 + $0x58] sm:$0xff] %v4556_v18  ;;  %v4572_v60 = vld [vmem:[%s5783_s28 + $0x98] sm:$0xff]  ;;  %v4574_v16 = vld [vmem:[%s5783_s28 + $0xa0] sm:$0xff] }
 0x2f9   : > { %4559 = vst [vmem:[%s6744_s21 + $0x60] sm:$0xff] %v4558_v57  ;;  %4561 = vst [vmem:[%s6744_s21 + $0x68] sm:$0xff] %v4560_v2  ;;  %v4576_v61 = vld [vmem:[%s5783_s28 + $0xa8] sm:$0xff]  ;;  %v4578_v25 = vld [vmem:[%s5783_s28 + $0xb0] sm:$0xff] }
 0x2fa   : > { %4563 = vst [vmem:[%s6744_s21 + $0x70] sm:$0xff] %v4562_v63  ;;  %4565 = vst [vmem:[%s6744_s21 + $0x78] sm:$0xff] %v4564_v30  ;;  %v4580_v54 = vld [vmem:[%s5783_s28 + $0xb8] sm:$0xff]  ;;  %v4582_v62 = vld [vmem:[%s5783_s28 + $0xc0] sm:$0xff] }
 0x2fb   : > { %4567 = vst [vmem:[%s6744_s21 + $0x100] sm:$0xff] %v4566_v3  ;;  %4569 = vst [vmem:[%s6744_s21 + $0x108] sm:$0xff] %v4568_v8  ;;  %v4584_v0 = vld [vmem:[%s5783_s28 + $0xc8] sm:$0xff]  ;;  %v4586_v46 = vld [vmem:[%s5783_s28 + $0xd0] sm:$0xff] }
 0x2fc   : > { %4571 = vst [vmem:[%s6744_s21 + $0x110] sm:$0xff] %v4570_v29  ;;  %4573 = vst [vmem:[%s6744_s21 + $0x118] sm:$0xff] %v4572_v60  ;;  %v4588_v48 = vld [vmem:[%s5783_s28 + $0xd8] sm:$0xff]  ;;  %v4590_v33 = vld [vmem:[%s5783_s28 + $0xe0] sm:$0xff] }
 0x2fd   : > { %4575 = vst [vmem:[%s6744_s21 + $0x120] sm:$0xff] %v4574_v16  ;;  %4577 = vst [vmem:[%s6744_s21 + $0x128] sm:$0xff] %v4576_v61  ;;  %v4592_v59 = vld [vmem:[%s5783_s28 + $0xe8] sm:$0xff]  ;;  %v4594_v31 = vld [vmem:[%s5783_s28 + $0xf0] sm:$0xff] }
 0x2fe   : > { %4579 = vst [vmem:[%s6744_s21 + $0x130] sm:$0xff] %v4578_v25  ;;  %4581 = vst [vmem:[%s6744_s21 + $0x138] sm:$0xff] %v4580_v54  ;;  %v4596_v36 = vld [vmem:[%s5783_s28 + $0xf8] sm:$0xff] }
 0x2ff   : > { %4583 = vst [vmem:[%s6744_s21 + $0x140] sm:$0xff] %v4582_v62  ;;  %4585 = vst [vmem:[%s6744_s21 + $0x148] sm:$0xff] %v4584_v0 }
 0x300   : > { %4587 = vst [vmem:[%s6744_s21 + $0x150] sm:$0xff] %v4586_v46  ;;  %4589 = vst [vmem:[%s6744_s21 + $0x158] sm:$0xff] %v4588_v48 }
 0x301   : > { %4591 = vst [vmem:[%s6744_s21 + $0x160] sm:$0xff] %v4590_v33  ;;  %4593 = vst [vmem:[%s6744_s21 + $0x168] sm:$0xff] %v4592_v59 }
 0x302   : > { %4595 = vst [vmem:[%s6744_s21 + $0x170] sm:$0xff] %v4594_v31  ;;  %4597 = vst [vmem:[%s6744_s21 + $0x178] sm:$0xff] %v4596_v36 }
 0x303 PF: > { %s4609_s19 = sand.u32 1, %s5000_s15   ;;  %p6977_p11 = scmp.ne.s32.totalorder %s6874_s22, 0 }
 0x304   : > { %p6978_p7 = scmp.ge.s32.totalorder %s5012_s18, 2  ;;  %s4610_s10 = scalar_lea.sflag [#allocation4], %s4609_s19 }
 0x306   : > { %p4839_p12 = pnand %p6978_p7, %p6977_p11 }
 0x308   : > { %p4840_p10 = pneg %p4839_p12 }
 0x30a   : > { %4995 = dma.done.wait (%p4840_p10), %s4610_s10, 2048  }
 0x30b   : > { %4997 = vsyncadd (%p4840_p10), %s4610_s10, 4294965248  ;;  %p19_p2 = scmp.ge.s32.totalorder %s5107_s27, 4   ;;  %s6979_s15 = smov %s5004_s16 }
 0x30c   : > { %s6980_s16 = smov %s5008_s17  ;;  %s6981_s17 = smov %s5124_s9 }
 0x30d   : > { %s6982_s18 = smov %s5107_s27  ;;  %21 = sbr.rel (!%p19_p2) target bundleno = 6 (0x6), region = 131 }
 0x312   :  { %4622 = vsyncpa [#allocation3], 1 }
 0x313   :  { %4624 = vsyncpa [#allocation3 + $0x1], 1 }
 0x314   :  { %4625 = vsyncpa [#allocation6], 1 }
 0x315   :  { %4626 = vsyncpa [#allocation4], 1 }
 0x316   :  { %4628 = vsyncpa [#allocation4 + $0x1], 1 }

</bundles_post_ra>
